<compile_context>
chip_gen: v7x
topology: tpu7x:2x2x1
jax: 0.10.0
libtpu: 0.0.40
codegen_flags: <defaults>
</compile_context>

<pallas_src>
import functools
import math

import jax
import jax.numpy as jnp
from jax.experimental import pallas as pl
from jax.experimental.pallas import tpu as pltpu

LANE = 128  # vreg lane width (last-dim alignment)


def _round_up(x, m):
    return (x + m - 1) // m * m


@functools.lru_cache(maxsize=None)
def _vmem_limit_bytes():
    # Explicit scoped-VMEM budget (default scoped limit is only 16/32 MiB and
    # v7x has just 64 MiB physical).  Worst realistic layer here uses ~25 MiB.
    try:
        cap = int(pltpu.get_tpu_info().vmem_capacity_bytes)
    except Exception:
        cap = 128 * 1024 * 1024
    return int(min(cap // 2, 64 * 1024 * 1024))


# ------------------------- Pallas kernels -------------------------

def _conv_taps(tap_refs, w_ref, b_ref, *, wo, m, leaky_slope):
    """9-tap 3x3/stride-2 conv on pre-gathered tap planes -> f32 (m, Cout).

    tap_refs[(ky % 2)][kx] holds, flattened over (output_row, output_col), the
    padded-input pixels xpad[2*oy + (ky - ky%2), 2*ox + kx, :]; the extra row
    parity shift (dy = ky // 2) is a contiguous row offset of dy*wo.
    """
    acc = None
    for ky in range(3):
        dy = ky // 2
        row_planes = tap_refs[ky % 2]
        for kx in range(3):
            x = row_planes[kx][pl.ds(dy * wo, m), :]              # (m, C) bf16
            d = jnp.dot(x, w_ref[ky * 3 + kx],                    # (C, Cout) resident
                        preferred_element_type=jnp.float32)       # MXU, f32 acc
            acc = d if acc is None else acc + d
    out = acc + b_ref[...]                                        # (1, Cout) broadcast
    return jnp.where(out >= 0.0, out, out * leaky_slope)


def _conv_kernel(t00, t01, t02, t10, t11, t12, w_ref, b_ref, o_ref, *,
                 wo, m, leaky_slope):
    h = _conv_taps(((t00, t01, t02), (t10, t11, t12)), w_ref, b_ref,
                   wo=wo, m=m, leaky_slope=leaky_slope)
    o_ref[...] = h.astype(o_ref.dtype)


def _conv_linear_kernel(t00, t01, t02, t10, t11, t12, w_ref, b_ref,
                        lw_ref, lb_ref, o_ref, *, wo, m, leaky_slope):
    # Fused tail: last conv + LeakyReLU feeding the EqualLinear head; the f32
    # conv activation goes straight into the second (f32) matmul.
    h = _conv_taps(((t00, t01, t02), (t10, t11, t12)), w_ref, b_ref,
                   wo=wo, m=m, leaky_slope=leaky_slope)
    out = jnp.dot(h, lw_ref[...], preferred_element_type=jnp.float32)
    o_ref[...] = (out + lb_ref[...]).astype(o_ref.dtype)


# ------------------------- host-side tap-plane prep -------------------------

def _conv_tap_planes(x_nhwc):
    """Six strided slices of the zero-padded input such that every 3x3/stride-2
    tap (ky, kx) is a contiguous row window of plane[(ky%2)*3 + kx]:

        plane[(ky%2)*3+kx][n, (oy + ky//2)*Wo + ox, :] == xpad[n, 2*oy+ky, 2*ox+kx, :]

    Total size ~1.5x the input (vs 2.25x, 9*C-wide, for full im2col).
    """
    n, h, w, c = x_nhwc.shape
    ho = (h - 1) // 2 + 1
    wo = (w - 1) // 2 + 1
    # Pad by (1,2)/(1,2): the extra bottom/right zero row/col only keeps all six
    # slices the same shape for odd extents; it is never read by the kernel.
    xp = jnp.pad(x_nhwc, ((0, 0), (1, 2), (1, 2), (0, 0)))
    planes = []
    for a in (0, 1):                        # row parity of the tap row (ky % 2)
        for kx in (0, 1, 2):                # column tap
            t = xp[:, a:a + 2 * ho + 1:2, kx:kx + 2 * wo:2, :]    # (n, ho+1, wo, c)
            planes.append(t.reshape(n, (ho + 1) * wo, c))
    return planes, (n, ho, wo)


# ------------------------- pallas_call wrapper -------------------------

def pallas_conv3x3_s2(x_nhwc, w_taps, bias, *, leaky_slope, out_dtype,
                      lin_w=None, lin_b=None):
    """y[n, oy*Wo+ox, :] = LeakyReLU(conv3x3_s2_p1(x)[n, oy, ox, :]) (+ optional
    fused EqualLinear head y @ lin_w + lin_b).  Returns ((n, Ho*Wo, Coutp), dims)."""
    planes, (n, ho, wo) = _conv_tap_planes(x_nhwc)
    c = x_nhwc.shape[-1]
    coutp = w_taps.shape[-1]
    assert c % LANE == 0 and coutp % LANE == 0, "pad channels to 128 on the host"
    assert w_taps.shape == (9, c, coutp) and bias.shape == (1, coutp)
    m = ho * wo
    rows_in = (ho + 1) * wo

    tap_spec = pl.BlockSpec((None, rows_in, c), lambda i: (i, 0, 0))
    in_specs = [tap_spec] * 6 + [
        # Constant index_map: weights/bias DMA'd once, VMEM-resident across grid.
        pl.BlockSpec((9, c, coutp), lambda i: (0, 0, 0)),
        pl.BlockSpec((1, coutp), lambda i: (0, 0)),
    ]
    args = list(planes) + [w_taps, bias]

    flops = 2 * n * m * 9 * c * coutp
    bytes_accessed = ((6 * n * rows_in * c + 9 * c * coutp)
                      * x_nhwc.dtype.itemsize
                      + n * m * coutp * jnp.dtype(out_dtype).itemsize
                      + 4 * coutp)

    if lin_w is None:
        kern = functools.partial(_conv_kernel, wo=wo, m=m, leaky_slope=leaky_slope)
    else:
        kern = functools.partial(_conv_linear_kernel, wo=wo, m=m,
                                 leaky_slope=leaky_slope)
        in_specs += [pl.BlockSpec((coutp, coutp), lambda i: (0, 0)),
                     pl.BlockSpec((1, coutp), lambda i: (0, 0))]
        args += [lin_w, lin_b]
        flops += 2 * n * m * coutp * coutp
        bytes_accessed += 4 * (coutp * coutp + coutp)

    out = pl.pallas_call(
        kern,
        out_shape=jax.ShapeDtypeStruct((n, m, coutp), out_dtype),
        grid_spec=pltpu.PrefetchScalarGridSpec(
            num_scalar_prefetch=0,
            grid=(n,),
            in_specs=in_specs,
            out_specs=pl.BlockSpec((None, m, coutp), lambda i: (i, 0, 0)),
        ),
        compiler_params=pltpu.CompilerParams(
            dimension_semantics=("parallel",),     # batch >= 2 feeds both v7x TCs
            vmem_limit_bytes=_vmem_limit_bytes(),
        ),
        cost_estimate=pl.CostEstimate(flops=int(flops), transcendentals=0,
                                      bytes_accessed=int(bytes_accessed)),
    )(*args)
    return out, (n, ho, wo)


# ------------------------------ module ------------------------------

class GradualStyleBlockPallas:
    """Mirrors GradualStyleBlock(in_c, out_c, spatial).forward() semantics."""

    LEAKY_SLOPE = 0.01            # nn.LeakyReLU() default
    COMPUTE_DTYPE = jnp.bfloat16  # MXU input dtype (f32 accumulation in-kernel)

    def __init__(self, in_c, out_c, spatial, key):
        self.in_c = in_c
        self.out_c = out_c
        self.spatial = spatial
        num_pools = int(math.log2(spatial))
        n_convs = 1 + max(num_pools - 1, 0)
        keys = jax.random.split(key, n_convs + 1)

        # ---- raw parameters (f32, same shapes / init style as PyTorch) ----
        self.conv_params = []
        c_in = in_c
        for i in range(n_convs):
            wk, bk = jax.random.split(keys[i])
            fan_in = c_in * 9
            bound = 1.0 / math.sqrt(fan_in)
            w = jax.random.uniform(wk, (out_c, c_in, 3, 3), jnp.float32, -bound, bound)
            b = jax.random.uniform(bk, (out_c,), jnp.float32, -bound, bound)
            self.conv_params.append((w, b))
            c_in = out_c
        # EqualLinear(out_c, out_c, lr_mul=1): weight ~ randn / lr_mul, bias = 0.
        self.lr_mul = 1.0
        self.lin_w = jax.random.normal(keys[-1], (out_c, out_c), jnp.float32) / self.lr_mul
        self.lin_b = jnp.zeros((out_c,), jnp.float32)
        self.lin_scale = 1.0 / math.sqrt(out_c) * self.lr_mul

        # ---- Pallas-side weights: lane-padded channels, (9, Cin, Cout) taps ----
        self.cin_pad = _round_up(in_c, LANE)
        self.cout_pad = _round_up(out_c, LANE)
        self.conv_taps = []
        c_in_p = self.cin_pad
        for (w, b) in self.conv_params:
            oc, ic, kh, kw = w.shape
            wt = jnp.transpose(w, (2, 3, 1, 0))                     # (ky,kx,cin,cout)
            wt = jnp.pad(wt, ((0, 0), (0, 0),
                              (0, c_in_p - ic), (0, self.cout_pad - oc)))
            w_taps = wt.reshape(kh * kw, c_in_p, self.cout_pad).astype(self.COMPUTE_DTYPE)
            b_pad = jnp.pad(b, (0, self.cout_pad - oc)).reshape(1, -1).astype(jnp.float32)
            self.conv_taps.append((w_taps, b_pad))
            c_in_p = self.cout_pad
        # EqualLinear: out = x @ (W*scale).T + bias*lr_mul, precomputed, padded,
        # kept in f32 so the fused tail consumes the f32 conv activation directly.
        w_eff = (self.lin_w * self.lin_scale).T                     # (in=out_c, out=out_c)
        w_eff = jnp.pad(w_eff, ((0, self.cout_pad - out_c), (0, self.cout_pad - out_c)))
        self.lin_w_eff = w_eff.astype(jnp.float32)
        self.lin_b_eff = jnp.pad(self.lin_b * self.lr_mul,
                                 (0, self.cout_pad - out_c)
                                 ).reshape(1, -1).astype(jnp.float32)

    def __call__(self, x_nchw):
        cdt = self.COMPUTE_DTYPE
        x = jnp.transpose(x_nchw, (0, 2, 3, 1))                     # NCHW -> NHWC
        x = jnp.pad(x, ((0, 0), (0, 0), (0, 0), (0, self.cin_pad - self.in_c)))
        x = x.astype(cdt)

        # All but the last conv: fused 9-tap conv + bias + LeakyReLU, bf16 out.
        for (w_taps, b_pad) in self.conv_taps[:-1]:
            y, (n, ho, wo) = pallas_conv3x3_s2(
                x, w_taps, b_pad, leaky_slope=self.LEAKY_SLOPE, out_dtype=cdt)
            x = y.reshape(n, ho, wo, self.cout_pad)

        # Last conv (HW -> 1x1) fused with the EqualLinear head, f32 out.
        w_taps, b_pad = self.conv_taps[-1]
        out, (n, ho, wo) = pallas_conv3x3_s2(
            x, w_taps, b_pad, leaky_slope=self.LEAKY_SLOPE, out_dtype=jnp.float32,
            lin_w=self.lin_w_eff, lin_b=self.lin_b_eff)
        # n*ho*wo == n (final HW == 1 for power-of-two spatial), matching
        # the PyTorch x.view(-1, out_c).
        out = out.reshape(n * ho * wo, self.cout_pad)
        return out[:, :self.out_c]


# Pure-JAX reference (lax.conv, f32) to validate the Pallas path end-to-end.
def reference_forward(block, x_nchw):
    x = x_nchw
    for (w, b) in block.conv_params:
        x = jax.lax.conv_general_dilated(
            x, w, window_strides=(2, 2), padding=((1, 1), (1, 1)),
            dimension_numbers=("NCHW", "OIHW", "NCHW"))
        x = x + b.reshape(1, -1, 1, 1)
        x = jnp.where(x >= 0, x, 0.01 * x)
    x = x.reshape(-1, block.out_c)
    return x @ (block.lin_w * block.lin_scale).T + block.lin_b * block.lr_mul


if __name__ == "__main__":
    key = jax.random.PRNGKey(0)
    pkey, xkey = jax.random.split(key)

    batch, in_c, out_c, spatial = 2, 4, 32, 16   # log2(16)=4 stride-2 convs: 16->8->4->2->1
    block = GradualStyleBlockPallas(in_c, out_c, spatial, pkey)
    x = jax.random.normal(xkey, (batch, in_c, spatial, spatial), jnp.float32)

    fwd = jax.jit(block.__call__)
    y = jax.block_until_ready(fwd(x))
    assert y.shape == (batch, out_c), y.shape

    # bf16 MXU inputs with f32 accumulation vs f32 reference: per-element error
    # bounded by 3% of the output scale (tightened from the previous 10%).
    y_ref = reference_forward(block, x)
    scale = float(jnp.max(jnp.abs(y_ref)))
    err = float(jnp.max(jnp.abs(y - y_ref)))
    tol = 0.03 * scale + 1e-5
    assert err <= tol, f"Pallas output mismatch vs reference: err={err} tol={tol}"

    print("KERNEL_OK")
</pallas_src>

<mosaic_0001>
module attributes {stable_mosaic.version = 11 : i64} {
  func.func @_conv_kernel(%arg0: i32, %arg1: memref<1x72x128xbf16, #tpu.memory_space<vmem>>, %arg2: memref<1x72x128xbf16, #tpu.memory_space<vmem>>, %arg3: memref<1x72x128xbf16, #tpu.memory_space<vmem>>, %arg4: memref<1x72x128xbf16, #tpu.memory_space<vmem>>, %arg5: memref<1x72x128xbf16, #tpu.memory_space<vmem>>, %arg6: memref<1x72x128xbf16, #tpu.memory_space<vmem>>, %arg7: memref<9x128x128xbf16, #tpu.memory_space<vmem>>, %arg8: memref<1x128xf32, #tpu.memory_space<vmem>>, %arg9: memref<1x64x128xbf16, #tpu.memory_space<vmem>>) attributes {dimension_semantics = [#tpu.dimension_semantics<parallel>], iteration_bounds = array<i64: 2>, scalar_prefetch = 0 : i64, scratch_operands = 0 : i64, tpu.core_type = #tpu.core_type<tc>, window_params = [{transform_indices = @transform_0, window_bounds = array<i64: 1, 72, 128>}, {transform_indices = @transform_1, window_bounds = array<i64: 1, 72, 128>}, {transform_indices = @transform_2, window_bounds = array<i64: 1, 72, 128>}, {transform_indices = @transform_3, window_bounds = array<i64: 1, 72, 128>}, {transform_indices = @transform_4, window_bounds = array<i64: 1, 72, 128>}, {transform_indices = @transform_5, window_bounds = array<i64: 1, 72, 128>}, {pipeline_mode = #tpu.pipeline_mode<synchronous>, transform_indices = @transform_6, window_bounds = array<i64: 9, 128, 128>}, {pipeline_mode = #tpu.pipeline_mode<synchronous>, transform_indices = @transform_7, window_bounds = array<i64: 1, 128>}, {transform_indices = @transform_8, window_bounds = array<i64: 1, 64, 128>}]} {
    %c0 = arith.constant 0 : index
    %c0_0 = arith.constant 0 : index
    %c0_1 = arith.constant 0 : index
    %0 = vector.load %arg1[%c0, %c0_0, %c0_1] : memref<1x72x128xbf16, #tpu.memory_space<vmem>>, vector<1x64x128xbf16>
    %1 = vector.shape_cast %0 : vector<1x64x128xbf16> to vector<64x128xbf16>
    %c0_2 = arith.constant 0 : index
    %c0_3 = arith.constant 0 : index
    %c0_4 = arith.constant 0 : index
    %2 = vector.load %arg7[%c0_2, %c0_3, %c0_4] : memref<9x128x128xbf16, #tpu.memory_space<vmem>>, vector<1x128x128xbf16>
    %3 = vector.shape_cast %2 : vector<1x128x128xbf16> to vector<128x128xbf16>
    %cst = arith.constant dense<0.000000e+00> : vector<64x128xf32>
    %4 = tpu.matmul %1, %3, %cst {dimension_numbers = #tpu.dot_dimension_numbers<[1], [0], [0], [1], [0, 0, 1, 1], [], []>} : vector<64x128xbf16>, vector<128x128xbf16>, vector<64x128xf32> -> vector<64x128xf32>
    %c0_5 = arith.constant 0 : index
    %c0_6 = arith.constant 0 : index
    %c0_7 = arith.constant 0 : index
    %5 = vector.load %arg2[%c0_5, %c0_6, %c0_7] : memref<1x72x128xbf16, #tpu.memory_space<vmem>>, vector<1x64x128xbf16>
    %6 = vector.shape_cast %5 : vector<1x64x128xbf16> to vector<64x128xbf16>
    %c1 = arith.constant 1 : index
    %c0_8 = arith.constant 0 : index
    %c0_9 = arith.constant 0 : index
    %7 = vector.load %arg7[%c1, %c0_8, %c0_9] : memref<9x128x128xbf16, #tpu.memory_space<vmem>>, vector<1x128x128xbf16>
    %8 = vector.shape_cast %7 : vector<1x128x128xbf16> to vector<128x128xbf16>
    %cst_10 = arith.constant dense<0.000000e+00> : vector<64x128xf32>
    %9 = tpu.matmul %6, %8, %cst_10 {dimension_numbers = #tpu.dot_dimension_numbers<[1], [0], [0], [1], [0, 0, 1, 1], [], []>} : vector<64x128xbf16>, vector<128x128xbf16>, vector<64x128xf32> -> vector<64x128xf32>
    %10 = arith.addf %4, %9 : vector<64x128xf32>
    %c0_11 = arith.constant 0 : index
    %c0_12 = arith.constant 0 : index
    %c0_13 = arith.constant 0 : index
    %11 = vector.load %arg3[%c0_11, %c0_12, %c0_13] : memref<1x72x128xbf16, #tpu.memory_space<vmem>>, vector<1x64x128xbf16>
    %12 = vector.shape_cast %11 : vector<1x64x128xbf16> to vector<64x128xbf16>
    %c2 = arith.constant 2 : index
    %c0_14 = arith.constant 0 : index
    %c0_15 = arith.constant 0 : index
    %13 = vector.load %arg7[%c2, %c0_14, %c0_15] : memref<9x128x128xbf16, #tpu.memory_space<vmem>>, vector<1x128x128xbf16>
    %14 = vector.shape_cast %13 : vector<1x128x128xbf16> to vector<128x128xbf16>
    %cst_16 = arith.constant dense<0.000000e+00> : vector<64x128xf32>
    %15 = tpu.matmul %12, %14, %cst_16 {dimension_numbers = #tpu.dot_dimension_numbers<[1], [0], [0], [1], [0, 0, 1, 1], [], []>} : vector<64x128xbf16>, vector<128x128xbf16>, vector<64x128xf32> -> vector<64x128xf32>
    %16 = arith.addf %10, %15 : vector<64x128xf32>
    %c0_17 = arith.constant 0 : index
    %c0_18 = arith.constant 0 : index
    %c0_19 = arith.constant 0 : index
    %17 = vector.load %arg4[%c0_17, %c0_18, %c0_19] : memref<1x72x128xbf16, #tpu.memory_space<vmem>>, vector<1x64x128xbf16>
    %18 = vector.shape_cast %17 : vector<1x64x128xbf16> to vector<64x128xbf16>
    %c3 = arith.constant 3 : index
    %c0_20 = arith.constant 0 : index
    %c0_21 = arith.constant 0 : index
    %19 = vector.load %arg7[%c3, %c0_20, %c0_21] : memref<9x128x128xbf16, #tpu.memory_space<vmem>>, vector<1x128x128xbf16>
    %20 = vector.shape_cast %19 : vector<1x128x128xbf16> to vector<128x128xbf16>
    %cst_22 = arith.constant dense<0.000000e+00> : vector<64x128xf32>
    %21 = tpu.matmul %18, %20, %cst_22 {dimension_numbers = #tpu.dot_dimension_numbers<[1], [0], [0], [1], [0, 0, 1, 1], [], []>} : vector<64x128xbf16>, vector<128x128xbf16>, vector<64x128xf32> -> vector<64x128xf32>
    %22 = arith.addf %16, %21 : vector<64x128xf32>
    %c0_23 = arith.constant 0 : index
    %c0_24 = arith.constant 0 : index
    %c0_25 = arith.constant 0 : index
    %23 = vector.load %arg5[%c0_23, %c0_24, %c0_25] : memref<1x72x128xbf16, #tpu.memory_space<vmem>>, vector<1x64x128xbf16>
    %24 = vector.shape_cast %23 : vector<1x64x128xbf16> to vector<64x128xbf16>
    %c4 = arith.constant 4 : index
    %c0_26 = arith.constant 0 : index
    %c0_27 = arith.constant 0 : index
    %25 = vector.load %arg7[%c4, %c0_26, %c0_27] : memref<9x128x128xbf16, #tpu.memory_space<vmem>>, vector<1x128x128xbf16>
    %26 = vector.shape_cast %25 : vector<1x128x128xbf16> to vector<128x128xbf16>
    %cst_28 = arith.constant dense<0.000000e+00> : vector<64x128xf32>
    %27 = tpu.matmul %24, %26, %cst_28 {dimension_numbers = #tpu.dot_dimension_numbers<[1], [0], [0], [1], [0, 0, 1, 1], [], []>} : vector<64x128xbf16>, vector<128x128xbf16>, vector<64x128xf32> -> vector<64x128xf32>
    %28 = arith.addf %22, %27 : vector<64x128xf32>
    %c0_29 = arith.constant 0 : index
    %c0_30 = arith.constant 0 : index
    %c0_31 = arith.constant 0 : index
    %29 = vector.load %arg6[%c0_29, %c0_30, %c0_31] : memref<1x72x128xbf16, #tpu.memory_space<vmem>>, vector<1x64x128xbf16>
    %30 = vector.shape_cast %29 : vector<1x64x128xbf16> to vector<64x128xbf16>
    %c5 = arith.constant 5 : index
    %c0_32 = arith.constant 0 : index
    %c0_33 = arith.constant 0 : index
    %31 = vector.load %arg7[%c5, %c0_32, %c0_33] : memref<9x128x128xbf16, #tpu.memory_space<vmem>>, vector<1x128x128xbf16>
    %32 = vector.shape_cast %31 : vector<1x128x128xbf16> to vector<128x128xbf16>
    %cst_34 = arith.constant dense<0.000000e+00> : vector<64x128xf32>
    %33 = tpu.matmul %30, %32, %cst_34 {dimension_numbers = #tpu.dot_dimension_numbers<[1], [0], [0], [1], [0, 0, 1, 1], [], []>} : vector<64x128xbf16>, vector<128x128xbf16>, vector<64x128xf32> -> vector<64x128xf32>
    %34 = arith.addf %28, %33 : vector<64x128xf32>
    %c0_35 = arith.constant 0 : index
    %c8 = arith.constant 8 : index
    %c0_36 = arith.constant 0 : index
    %35 = vector.load %arg1[%c0_35, %c8, %c0_36] : memref<1x72x128xbf16, #tpu.memory_space<vmem>>, vector<1x64x128xbf16>
    %36 = vector.shape_cast %35 : vector<1x64x128xbf16> to vector<64x128xbf16>
    %c6 = arith.constant 6 : index
    %c0_37 = arith.constant 0 : index
    %c0_38 = arith.constant 0 : index
    %37 = vector.load %arg7[%c6, %c0_37, %c0_38] : memref<9x128x128xbf16, #tpu.memory_space<vmem>>, vector<1x128x128xbf16>
    %38 = vector.shape_cast %37 : vector<1x128x128xbf16> to vector<128x128xbf16>
    %cst_39 = arith.constant dense<0.000000e+00> : vector<64x128xf32>
    %39 = tpu.matmul %36, %38, %cst_39 {dimension_numbers = #tpu.dot_dimension_numbers<[1], [0], [0], [1], [0, 0, 1, 1], [], []>} : vector<64x128xbf16>, vector<128x128xbf16>, vector<64x128xf32> -> vector<64x128xf32>
    %40 = arith.addf %34, %39 : vector<64x128xf32>
    %c0_40 = arith.constant 0 : index
    %c8_41 = arith.constant 8 : index
    %c0_42 = arith.constant 0 : index
    %41 = vector.load %arg2[%c0_40, %c8_41, %c0_42] : memref<1x72x128xbf16, #tpu.memory_space<vmem>>, vector<1x64x128xbf16>
    %42 = vector.shape_cast %41 : vector<1x64x128xbf16> to vector<64x128xbf16>
    %c7 = arith.constant 7 : index
    %c0_43 = arith.constant 0 : index
    %c0_44 = arith.constant 0 : index
    %43 = vector.load %arg7[%c7, %c0_43, %c0_44] : memref<9x128x128xbf16, #tpu.memory_space<vmem>>, vector<1x128x128xbf16>
    %44 = vector.shape_cast %43 : vector<1x128x128xbf16> to vector<128x128xbf16>
    %cst_45 = arith.constant dense<0.000000e+00> : vector<64x128xf32>
    %45 = tpu.matmul %42, %44, %cst_45 {dimension_numbers = #tpu.dot_dimension_numbers<[1], [0], [0], [1], [0, 0, 1, 1], [], []>} : vector<64x128xbf16>, vector<128x128xbf16>, vector<64x128xf32> -> vector<64x128xf32>
    %46 = arith.addf %40, %45 : vector<64x128xf32>
    %c0_46 = arith.constant 0 : index
    %c8_47 = arith.constant 8 : index
    %c0_48 = arith.constant 0 : index
    %47 = vector.load %arg3[%c0_46, %c8_47, %c0_48] : memref<1x72x128xbf16, #tpu.memory_space<vmem>>, vector<1x64x128xbf16>
    %48 = vector.shape_cast %47 : vector<1x64x128xbf16> to vector<64x128xbf16>
    %c8_49 = arith.constant 8 : index
    %c0_50 = arith.constant 0 : index
    %c0_51 = arith.constant 0 : index
    %49 = vector.load %arg7[%c8_49, %c0_50, %c0_51] : memref<9x128x128xbf16, #tpu.memory_space<vmem>>, vector<1x128x128xbf16>
    %50 = vector.shape_cast %49 : vector<1x128x128xbf16> to vector<128x128xbf16>
    %cst_52 = arith.constant dense<0.000000e+00> : vector<64x128xf32>
    %51 = tpu.matmul %48, %50, %cst_52 {dimension_numbers = #tpu.dot_dimension_numbers<[1], [0], [0], [1], [0, 0, 1, 1], [], []>} : vector<64x128xbf16>, vector<128x128xbf16>, vector<64x128xf32> -> vector<64x128xf32>
    %52 = arith.addf %46, %51 : vector<64x128xf32>
    %c0_53 = arith.constant 0 : index
    %c0_54 = arith.constant 0 : index
    %53 = vector.load %arg8[%c0_53, %c0_54] : memref<1x128xf32, #tpu.memory_space<vmem>>, vector<1x128xf32>
    %54 = vector.broadcast %53 : vector<1x128xf32> to vector<64x128xf32>
    %55 = arith.addf %52, %54 : vector<64x128xf32>
    %cst_55 = arith.constant 0.000000e+00 : f32
    %56 = vector.broadcast %cst_55 : f32 to vector<64x128xf32>
    %57 = arith.cmpf oge, %55, %56 : vector<64x128xf32>
    %cst_56 = arith.constant 0.00999999977 : f32
    %58 = vector.broadcast %cst_56 : f32 to vector<64x128xf32>
    %59 = arith.mulf %55, %58 : vector<64x128xf32>
    %60 = arith.select %57, %55, %59 : vector<64x128xi1>, vector<64x128xf32>
    %61 = arith.truncf %60 : vector<64x128xf32> to vector<64x128xbf16>
    %c0_57 = arith.constant 0 : index
    %c0_58 = arith.constant 0 : index
    %c0_59 = arith.constant 0 : index
    %62 = vector.load %arg9[%c0_57, %c0_58, %c0_59] : memref<1x64x128xbf16, #tpu.memory_space<vmem>>, vector<1x64x128xbf16>
    %63 = vector.shape_cast %62 : vector<1x64x128xbf16> to vector<64x128xbf16>
    %64 = vector.shape_cast %61 : vector<64x128xbf16> to vector<1x64x128xbf16>
    tpu.vector_store %arg9[%c0_57, %c0_58, %c0_59], %64 {strides = array<i32>} : memref<1x64x128xbf16, #tpu.memory_space<vmem>>, vector<1x64x128xbf16>,
    return
  }
  func.func @transform_0(%arg0: i32) -> (i32, i32, i32) {
    %c0_i32 = arith.constant 0 : i32
    %c0_i32_0 = arith.constant 0 : i32
    %c0_i32_1 = arith.constant 0 : i32
    return %arg0, %c0_i32, %c0_i32_0 : i32, i32, i32
  }
  func.func @transform_1(%arg0: i32) -> (i32, i32, i32) {
    %c0_i32 = arith.constant 0 : i32
    %c0_i32_0 = arith.constant 0 : i32
    %c0_i32_1 = arith.constant 0 : i32
    return %arg0, %c0_i32, %c0_i32_0 : i32, i32, i32
  }
  func.func @transform_2(%arg0: i32) -> (i32, i32, i32) {
    %c0_i32 = arith.constant 0 : i32
    %c0_i32_0 = arith.constant 0 : i32
    %c0_i32_1 = arith.constant 0 : i32
    return %arg0, %c0_i32, %c0_i32_0 : i32, i32, i32
  }
  func.func @transform_3(%arg0: i32) -> (i32, i32, i32) {
    %c0_i32 = arith.constant 0 : i32
    %c0_i32_0 = arith.constant 0 : i32
    %c0_i32_1 = arith.constant 0 : i32
    return %arg0, %c0_i32, %c0_i32_0 : i32, i32, i32
  }
  func.func @transform_4(%arg0: i32) -> (i32, i32, i32) {
    %c0_i32 = arith.constant 0 : i32
    %c0_i32_0 = arith.constant 0 : i32
    %c0_i32_1 = arith.constant 0 : i32
    return %arg0, %c0_i32, %c0_i32_0 : i32, i32, i32
  }
  func.func @transform_5(%arg0: i32) -> (i32, i32, i32) {
    %c0_i32 = arith.constant 0 : i32
    %c0_i32_0 = arith.constant 0 : i32
    %c0_i32_1 = arith.constant 0 : i32
    return %arg0, %c0_i32, %c0_i32_0 : i32, i32, i32
  }
  func.func @transform_6(%arg0: i32) -> (i32, i32, i32) {
    %c0_i32 = arith.constant 0 : i32
    %c0_i32_0 = arith.constant 0 : i32
    %c0_i32_1 = arith.constant 0 : i32
    %c0_i32_2 = arith.constant 0 : i32
    return %c0_i32, %c0_i32_0, %c0_i32_1 : i32, i32, i32
  }
  func.func @transform_7(%arg0: i32) -> (i32, i32) {
    %c0_i32 = arith.constant 0 : i32
    %c0_i32_0 = arith.constant 0 : i32
    %c0_i32_1 = arith.constant 0 : i32
    return %c0_i32, %c0_i32_0 : i32, i32
  }
  func.func @transform_8(%arg0: i32) -> (i32, i32, i32) {
    %c0_i32 = arith.constant 0 : i32
    %c0_i32_0 = arith.constant 0 : i32
    %c0_i32_1 = arith.constant 0 : i32
    return %arg0, %c0_i32, %c0_i32_0 : i32, i32, i32
  }
}

module attributes {stable_mosaic.version = 11 : i64} {
  func.func @_conv_kernel(%arg0: i32, %arg1: memref<1x20x128xbf16, #tpu.memory_space<vmem>>, %arg2: memref<1x20x128xbf16, #tpu.memory_space<vmem>>, %arg3: memref<1x20x128xbf16, #tpu.memory_space<vmem>>, %arg4: memref<1x20x128xbf16, #tpu.memory_space<vmem>>, %arg5: memref<1x20x128xbf16, #tpu.memory_space<vmem>>, %arg6: memref<1x20x128xbf16, #tpu.memory_space<vmem>>, %arg7: memref<9x128x128xbf16, #tpu.memory_space<vmem>>, %arg8: memref<1x128xf32, #tpu.memory_space<vmem>>, %arg9: memref<1x16x128xbf16, #tpu.memory_space<vmem>>) attributes {dimension_semantics = [#tpu.dimension_semantics<parallel>], iteration_bounds = array<i64: 2>, scalar_prefetch = 0 : i64, scratch_operands = 0 : i64, tpu.core_type = #tpu.core_type<tc>, window_params = [{transform_indices = @transform_0, window_bounds = array<i64: 1, 20, 128>}, {transform_indices = @transform_1, window_bounds = array<i64: 1, 20, 128>}, {transform_indices = @transform_2, window_bounds = array<i64: 1, 20, 128>}, {transform_indices = @transform_3, window_bounds = array<i64: 1, 20, 128>}, {transform_indices = @transform_4, window_bounds = array<i64: 1, 20, 128>}, {transform_indices = @transform_5, window_bounds = array<i64: 1, 20, 128>}, {pipeline_mode = #tpu.pipeline_mode<synchronous>, transform_indices = @transform_6, window_bounds = array<i64: 9, 128, 128>}, {pipeline_mode = #tpu.pipeline_mode<synchronous>, transform_indices = @transform_7, window_bounds = array<i64: 1, 128>}, {transform_indices = @transform_8, window_bounds = array<i64: 1, 16, 128>}]} {
    %c0 = arith.constant 0 : index
    %c0_0 = arith.constant 0 : index
    %c0_1 = arith.constant 0 : index
    %0 = vector.load %arg1[%c0, %c0_0, %c0_1] : memref<1x20x128xbf16, #tpu.memory_space<vmem>>, vector<1x16x128xbf16>
    %1 = vector.shape_cast %0 : vector<1x16x128xbf16> to vector<16x128xbf16>
    %c0_2 = arith.constant 0 : index
    %c0_3 = arith.constant 0 : index
    %c0_4 = arith.constant 0 : index
    %2 = vector.load %arg7[%c0_2, %c0_3, %c0_4] : memref<9x128x128xbf16, #tpu.memory_space<vmem>>, vector<1x128x128xbf16>
    %3 = vector.shape_cast %2 : vector<1x128x128xbf16> to vector<128x128xbf16>
    %cst = arith.constant dense<0.000000e+00> : vector<16x128xf32>
    %4 = tpu.matmul %1, %3, %cst {dimension_numbers = #tpu.dot_dimension_numbers<[1], [0], [0], [1], [0, 0, 1, 1], [], []>} : vector<16x128xbf16>, vector<128x128xbf16>, vector<16x128xf32> -> vector<16x128xf32>
    %c0_5 = arith.constant 0 : index
    %c0_6 = arith.constant 0 : index
    %c0_7 = arith.constant 0 : index
    %5 = vector.load %arg2[%c0_5, %c0_6, %c0_7] : memref<1x20x128xbf16, #tpu.memory_space<vmem>>, vector<1x16x128xbf16>
    %6 = vector.shape_cast %5 : vector<1x16x128xbf16> to vector<16x128xbf16>
    %c1 = arith.constant 1 : index
    %c0_8 = arith.constant 0 : index
    %c0_9 = arith.constant 0 : index
    %7 = vector.load %arg7[%c1, %c0_8, %c0_9] : memref<9x128x128xbf16, #tpu.memory_space<vmem>>, vector<1x128x128xbf16>
    %8 = vector.shape_cast %7 : vector<1x128x128xbf16> to vector<128x128xbf16>
    %cst_10 = arith.constant dense<0.000000e+00> : vector<16x128xf32>
    %9 = tpu.matmul %6, %8, %cst_10 {dimension_numbers = #tpu.dot_dimension_numbers<[1], [0], [0], [1], [0, 0, 1, 1], [], []>} : vector<16x128xbf16>, vector<128x128xbf16>, vector<16x128xf32> -> vector<16x128xf32>
    %10 = arith.addf %4, %9 : vector<16x128xf32>
    %c0_11 = arith.constant 0 : index
    %c0_12 = arith.constant 0 : index
    %c0_13 = arith.constant 0 : index
    %11 = vector.load %arg3[%c0_11, %c0_12, %c0_13] : memref<1x20x128xbf16, #tpu.memory_space<vmem>>, vector<1x16x128xbf16>
    %12 = vector.shape_cast %11 : vector<1x16x128xbf16> to vector<16x128xbf16>
    %c2 = arith.constant 2 : index
    %c0_14 = arith.constant 0 : index
    %c0_15 = arith.constant 0 : index
    %13 = vector.load %arg7[%c2, %c0_14, %c0_15] : memref<9x128x128xbf16, #tpu.memory_space<vmem>>, vector<1x128x128xbf16>
    %14 = vector.shape_cast %13 : vector<1x128x128xbf16> to vector<128x128xbf16>
    %cst_16 = arith.constant dense<0.000000e+00> : vector<16x128xf32>
    %15 = tpu.matmul %12, %14, %cst_16 {dimension_numbers = #tpu.dot_dimension_numbers<[1], [0], [0], [1], [0, 0, 1, 1], [], []>} : vector<16x128xbf16>, vector<128x128xbf16>, vector<16x128xf32> -> vector<16x128xf32>
    %16 = arith.addf %10, %15 : vector<16x128xf32>
    %c0_17 = arith.constant 0 : index
    %c0_18 = arith.constant 0 : index
    %c0_19 = arith.constant 0 : index
    %17 = vector.load %arg4[%c0_17, %c0_18, %c0_19] : memref<1x20x128xbf16, #tpu.memory_space<vmem>>, vector<1x16x128xbf16>
    %18 = vector.shape_cast %17 : vector<1x16x128xbf16> to vector<16x128xbf16>
    %c3 = arith.constant 3 : index
    %c0_20 = arith.constant 0 : index
    %c0_21 = arith.constant 0 : index
    %19 = vector.load %arg7[%c3, %c0_20, %c0_21] : memref<9x128x128xbf16, #tpu.memory_space<vmem>>, vector<1x128x128xbf16>
    %20 = vector.shape_cast %19 : vector<1x128x128xbf16> to vector<128x128xbf16>
    %cst_22 = arith.constant dense<0.000000e+00> : vector<16x128xf32>
    %21 = tpu.matmul %18, %20, %cst_22 {dimension_numbers = #tpu.dot_dimension_numbers<[1], [0], [0], [1], [0, 0, 1, 1], [], []>} : vector<16x128xbf16>, vector<128x128xbf16>, vector<16x128xf32> -> vector<16x128xf32>
    %22 = arith.addf %16, %21 : vector<16x128xf32>
    %c0_23 = arith.constant 0 : index
    %c0_24 = arith.constant 0 : index
    %c0_25 = arith.constant 0 : index
    %23 = vector.load %arg5[%c0_23, %c0_24, %c0_25] : memref<1x20x128xbf16, #tpu.memory_space<vmem>>, vector<1x16x128xbf16>
    %24 = vector.shape_cast %23 : vector<1x16x128xbf16> to vector<16x128xbf16>
    %c4 = arith.constant 4 : index
    %c0_26 = arith.constant 0 : index
    %c0_27 = arith.constant 0 : index
    %25 = vector.load %arg7[%c4, %c0_26, %c0_27] : memref<9x128x128xbf16, #tpu.memory_space<vmem>>, vector<1x128x128xbf16>
    %26 = vector.shape_cast %25 : vector<1x128x128xbf16> to vector<128x128xbf16>
    %cst_28 = arith.constant dense<0.000000e+00> : vector<16x128xf32>
    %27 = tpu.matmul %24, %26, %cst_28 {dimension_numbers = #tpu.dot_dimension_numbers<[1], [0], [0], [1], [0, 0, 1, 1], [], []>} : vector<16x128xbf16>, vector<128x128xbf16>, vector<16x128xf32> -> vector<16x128xf32>
    %28 = arith.addf %22, %27 : vector<16x128xf32>
    %c0_29 = arith.constant 0 : index
    %c0_30 = arith.constant 0 : index
    %c0_31 = arith.constant 0 : index
    %29 = vector.load %arg6[%c0_29, %c0_30, %c0_31] : memref<1x20x128xbf16, #tpu.memory_space<vmem>>, vector<1x16x128xbf16>
    %30 = vector.shape_cast %29 : vector<1x16x128xbf16> to vector<16x128xbf16>
    %c5 = arith.constant 5 : index
    %c0_32 = arith.constant 0 : index
    %c0_33 = arith.constant 0 : index
    %31 = vector.load %arg7[%c5, %c0_32, %c0_33] : memref<9x128x128xbf16, #tpu.memory_space<vmem>>, vector<1x128x128xbf16>
    %32 = vector.shape_cast %31 : vector<1x128x128xbf16> to vector<128x128xbf16>
    %cst_34 = arith.constant dense<0.000000e+00> : vector<16x128xf32>
    %33 = tpu.matmul %30, %32, %cst_34 {dimension_numbers = #tpu.dot_dimension_numbers<[1], [0], [0], [1], [0, 0, 1, 1], [], []>} : vector<16x128xbf16>, vector<128x128xbf16>, vector<16x128xf32> -> vector<16x128xf32>
    %34 = arith.addf %28, %33 : vector<16x128xf32>
    %c0_35 = arith.constant 0 : index
    %c4_36 = arith.constant 4 : index
    %c0_37 = arith.constant 0 : index
    %35 = vector.load %arg1[%c0_35, %c4_36, %c0_37] : memref<1x20x128xbf16, #tpu.memory_space<vmem>>, vector<1x16x128xbf16>
    %36 = vector.shape_cast %35 : vector<1x16x128xbf16> to vector<16x128xbf16>
    %c6 = arith.constant 6 : index
    %c0_38 = arith.constant 0 : index
    %c0_39 = arith.constant 0 : index
    %37 = vector.load %arg7[%c6, %c0_38, %c0_39] : memref<9x128x128xbf16, #tpu.memory_space<vmem>>, vector<1x128x128xbf16>
    %38 = vector.shape_cast %37 : vector<1x128x128xbf16> to vector<128x128xbf16>
    %cst_40 = arith.constant dense<0.000000e+00> : vector<16x128xf32>
    %39 = tpu.matmul %36, %38, %cst_40 {dimension_numbers = #tpu.dot_dimension_numbers<[1], [0], [0], [1], [0, 0, 1, 1], [], []>} : vector<16x128xbf16>, vector<128x128xbf16>, vector<16x128xf32> -> vector<16x128xf32>
    %40 = arith.addf %34, %39 : vector<16x128xf32>
    %c0_41 = arith.constant 0 : index
    %c4_42 = arith.constant 4 : index
    %c0_43 = arith.constant 0 : index
    %41 = vector.load %arg2[%c0_41, %c4_42, %c0_43] : memref<1x20x128xbf16, #tpu.memory_space<vmem>>, vector<1x16x128xbf16>
    %42 = vector.shape_cast %41 : vector<1x16x128xbf16> to vector<16x128xbf16>
    %c7 = arith.constant 7 : index
    %c0_44 = arith.constant 0 : index
    %c0_45 = arith.constant 0 : index
    %43 = vector.load %arg7[%c7, %c0_44, %c0_45] : memref<9x128x128xbf16, #tpu.memory_space<vmem>>, vector<1x128x128xbf16>
    %44 = vector.shape_cast %43 : vector<1x128x128xbf16> to vector<128x128xbf16>
    %cst_46 = arith.constant dense<0.000000e+00> : vector<16x128xf32>
    %45 = tpu.matmul %42, %44, %cst_46 {dimension_numbers = #tpu.dot_dimension_numbers<[1], [0], [0], [1], [0, 0, 1, 1], [], []>} : vector<16x128xbf16>, vector<128x128xbf16>, vector<16x128xf32> -> vector<16x128xf32>
    %46 = arith.addf %40, %45 : vector<16x128xf32>
    %c0_47 = arith.constant 0 : index
    %c4_48 = arith.constant 4 : index
    %c0_49 = arith.constant 0 : index
    %47 = vector.load %arg3[%c0_47, %c4_48, %c0_49] : memref<1x20x128xbf16, #tpu.memory_space<vmem>>, vector<1x16x128xbf16>
    %48 = vector.shape_cast %47 : vector<1x16x128xbf16> to vector<16x128xbf16>
    %c8 = arith.constant 8 : index
    %c0_50 = arith.constant 0 : index
    %c0_51 = arith.constant 0 : index
    %49 = vector.load %arg7[%c8, %c0_50, %c0_51] : memref<9x128x128xbf16, #tpu.memory_space<vmem>>, vector<1x128x128xbf16>
    %50 = vector.shape_cast %49 : vector<1x128x128xbf16> to vector<128x128xbf16>
    %cst_52 = arith.constant dense<0.000000e+00> : vector<16x128xf32>
    %51 = tpu.matmul %48, %50, %cst_52 {dimension_numbers = #tpu.dot_dimension_numbers<[1], [0], [0], [1], [0, 0, 1, 1], [], []>} : vector<16x128xbf16>, vector<128x128xbf16>, vector<16x128xf32> -> vector<16x128xf32>
    %52 = arith.addf %46, %51 : vector<16x128xf32>
    %c0_53 = arith.constant 0 : index
    %c0_54 = arith.constant 0 : index
    %53 = vector.load %arg8[%c0_53, %c0_54] : memref<1x128xf32, #tpu.memory_space<vmem>>, vector<1x128xf32>
    %54 = vector.broadcast %53 : vector<1x128xf32> to vector<16x128xf32>
    %55 = arith.addf %52, %54 : vector<16x128xf32>
    %cst_55 = arith.constant 0.000000e+00 : f32
    %56 = vector.broadcast %cst_55 : f32 to vector<16x128xf32>
    %57 = arith.cmpf oge, %55, %56 : vector<16x128xf32>
    %cst_56 = arith.constant 0.00999999977 : f32
    %58 = vector.broadcast %cst_56 : f32 to vector<16x128xf32>
    %59 = arith.mulf %55, %58 : vector<16x128xf32>
    %60 = arith.select %57, %55, %59 : vector<16x128xi1>, vector<16x128xf32>
    %61 = arith.truncf %60 : vector<16x128xf32> to vector<16x128xbf16>
    %c0_57 = arith.constant 0 : index
    %c0_58 = arith.constant 0 : index
    %c0_59 = arith.constant 0 : index
    %62 = vector.load %arg9[%c0_57, %c0_58, %c0_59] : memref<1x16x128xbf16, #tpu.memory_space<vmem>>, vector<1x16x128xbf16>
    %63 = vector.shape_cast %62 : vector<1x16x128xbf16> to vector<16x128xbf16>
    %64 = vector.shape_cast %61 : vector<16x128xbf16> to vector<1x16x128xbf16>
    tpu.vector_store %arg9[%c0_57, %c0_58, %c0_59], %64 {strides = array<i32>} : memref<1x16x128xbf16, #tpu.memory_space<vmem>>, vector<1x16x128xbf16>,
    return
  }
  func.func @transform_0(%arg0: i32) -> (i32, i32, i32) {
    %c0_i32 = arith.constant 0 : i32
    %c0_i32_0 = arith.constant 0 : i32
    %c0_i32_1 = arith.constant 0 : i32
    return %arg0, %c0_i32, %c0_i32_0 : i32, i32, i32
  }
  func.func @transform_1(%arg0: i32) -> (i32, i32, i32) {
    %c0_i32 = arith.constant 0 : i32
    %c0_i32_0 = arith.constant 0 : i32
    %c0_i32_1 = arith.constant 0 : i32
    return %arg0, %c0_i32, %c0_i32_0 : i32, i32, i32
  }
  func.func @transform_2(%arg0: i32) -> (i32, i32, i32) {
    %c0_i32 = arith.constant 0 : i32
    %c0_i32_0 = arith.constant 0 : i32
    %c0_i32_1 = arith.constant 0 : i32
    return %arg0, %c0_i32, %c0_i32_0 : i32, i32, i32
  }
  func.func @transform_3(%arg0: i32) -> (i32, i32, i32) {
    %c0_i32 = arith.constant 0 : i32
    %c0_i32_0 = arith.constant 0 : i32
    %c0_i32_1 = arith.constant 0 : i32
    return %arg0, %c0_i32, %c0_i32_0 : i32, i32, i32
  }
  func.func @transform_4(%arg0: i32) -> (i32, i32, i32) {
    %c0_i32 = arith.constant 0 : i32
    %c0_i32_0 = arith.constant 0 : i32
    %c0_i32_1 = arith.constant 0 : i32
    return %arg0, %c0_i32, %c0_i32_0 : i32, i32, i32
  }
  func.func @transform_5(%arg0: i32) -> (i32, i32, i32) {
    %c0_i32 = arith.constant 0 : i32
    %c0_i32_0 = arith.constant 0 : i32
    %c0_i32_1 = arith.constant 0 : i32
    return %arg0, %c0_i32, %c0_i32_0 : i32, i32, i32
  }
  func.func @transform_6(%arg0: i32) -> (i32, i32, i32) {
    %c0_i32 = arith.constant 0 : i32
    %c0_i32_0 = arith.constant 0 : i32
    %c0_i32_1 = arith.constant 0 : i32
    %c0_i32_2 = arith.constant 0 : i32
    return %c0_i32, %c0_i32_0, %c0_i32_1 : i32, i32, i32
  }
  func.func @transform_7(%arg0: i32) -> (i32, i32) {
    %c0_i32 = arith.constant 0 : i32
    %c0_i32_0 = arith.constant 0 : i32
    %c0_i32_1 = arith.constant 0 : i32
    return %c0_i32, %c0_i32_0 : i32, i32
  }
  func.func @transform_8(%arg0: i32) -> (i32, i32, i32) {
    %c0_i32 = arith.constant 0 : i32
    %c0_i32_0 = arith.constant 0 : i32
    %c0_i32_1 = arith.constant 0 : i32
    return %arg0, %c0_i32, %c0_i32_0 : i32, i32, i32
  }
}

module attributes {stable_mosaic.version = 11 : i64} {
  func.func @_conv_kernel(%arg0: i32, %arg1: memref<1x6x128xbf16, #tpu.memory_space<vmem>>, %arg2: memref<1x6x128xbf16, #tpu.memory_space<vmem>>, %arg3: memref<1x6x128xbf16, #tpu.memory_space<vmem>>, %arg4: memref<1x6x128xbf16, #tpu.memory_space<vmem>>, %arg5: memref<1x6x128xbf16, #tpu.memory_space<vmem>>, %arg6: memref<1x6x128xbf16, #tpu.memory_space<vmem>>, %arg7: memref<9x128x128xbf16, #tpu.memory_space<vmem>>, %arg8: memref<1x128xf32, #tpu.memory_space<vmem>>, %arg9: memref<1x4x128xbf16, #tpu.memory_space<vmem>>) attributes {dimension_semantics = [#tpu.dimension_semantics<parallel>], iteration_bounds = array<i64: 2>, scalar_prefetch = 0 : i64, scratch_operands = 0 : i64, tpu.core_type = #tpu.core_type<tc>, window_params = [{transform_indices = @transform_0, window_bounds = array<i64: 1, 6, 128>}, {transform_indices = @transform_1, window_bounds = array<i64: 1, 6, 128>}, {transform_indices = @transform_2, window_bounds = array<i64: 1, 6, 128>}, {transform_indices = @transform_3, window_bounds = array<i64: 1, 6, 128>}, {transform_indices = @transform_4, window_bounds = array<i64: 1, 6, 128>}, {transform_indices = @transform_5, window_bounds = array<i64: 1, 6, 128>}, {pipeline_mode = #tpu.pipeline_mode<synchronous>, transform_indices = @transform_6, window_bounds = array<i64: 9, 128, 128>}, {pipeline_mode = #tpu.pipeline_mode<synchronous>, transform_indices = @transform_7, window_bounds = array<i64: 1, 128>}, {transform_indices = @transform_8, window_bounds = array<i64: 1, 4, 128>}]} {
    %c0 = arith.constant 0 : index
    %c0_0 = arith.constant 0 : index
    %c0_1 = arith.constant 0 : index
    %0 = vector.load %arg1[%c0, %c0_0, %c0_1] : memref<1x6x128xbf16, #tpu.memory_space<vmem>>, vector<1x4x128xbf16>
    %1 = vector.shape_cast %0 : vector<1x4x128xbf16> to vector<4x128xbf16>
    %c0_2 = arith.constant 0 : index
    %c0_3 = arith.constant 0 : index
    %c0_4 = arith.constant 0 : index
    %2 = vector.load %arg7[%c0_2, %c0_3, %c0_4] : memref<9x128x128xbf16, #tpu.memory_space<vmem>>, vector<1x128x128xbf16>
    %3 = vector.shape_cast %2 : vector<1x128x128xbf16> to vector<128x128xbf16>
    %cst = arith.constant dense<0.000000e+00> : vector<4x128xf32>
    %4 = tpu.matmul %1, %3, %cst {dimension_numbers = #tpu.dot_dimension_numbers<[1], [0], [0], [1], [0, 0, 1, 1], [], []>} : vector<4x128xbf16>, vector<128x128xbf16>, vector<4x128xf32> -> vector<4x128xf32>
    %c0_5 = arith.constant 0 : index
    %c0_6 = arith.constant 0 : index
    %c0_7 = arith.constant 0 : index
    %5 = vector.load %arg2[%c0_5, %c0_6, %c0_7] : memref<1x6x128xbf16, #tpu.memory_space<vmem>>, vector<1x4x128xbf16>
    %6 = vector.shape_cast %5 : vector<1x4x128xbf16> to vector<4x128xbf16>
    %c1 = arith.constant 1 : index
    %c0_8 = arith.constant 0 : index
    %c0_9 = arith.constant 0 : index
    %7 = vector.load %arg7[%c1, %c0_8, %c0_9] : memref<9x128x128xbf16, #tpu.memory_space<vmem>>, vector<1x128x128xbf16>
    %8 = vector.shape_cast %7 : vector<1x128x128xbf16> to vector<128x128xbf16>
    %cst_10 = arith.constant dense<0.000000e+00> : vector<4x128xf32>
    %9 = tpu.matmul %6, %8, %cst_10 {dimension_numbers = #tpu.dot_dimension_numbers<[1], [0], [0], [1], [0, 0, 1, 1], [], []>} : vector<4x128xbf16>, vector<128x128xbf16>, vector<4x128xf32> -> vector<4x128xf32>
    %10 = arith.addf %4, %9 : vector<4x128xf32>
    %c0_11 = arith.constant 0 : index
    %c0_12 = arith.constant 0 : index
    %c0_13 = arith.constant 0 : index
    %11 = vector.load %arg3[%c0_11, %c0_12, %c0_13] : memref<1x6x128xbf16, #tpu.memory_space<vmem>>, vector<1x4x128xbf16>
    %12 = vector.shape_cast %11 : vector<1x4x128xbf16> to vector<4x128xbf16>
    %c2 = arith.constant 2 : index
    %c0_14 = arith.constant 0 : index
    %c0_15 = arith.constant 0 : index
    %13 = vector.load %arg7[%c2, %c0_14, %c0_15] : memref<9x128x128xbf16, #tpu.memory_space<vmem>>, vector<1x128x128xbf16>
    %14 = vector.shape_cast %13 : vector<1x128x128xbf16> to vector<128x128xbf16>
    %cst_16 = arith.constant dense<0.000000e+00> : vector<4x128xf32>
    %15 = tpu.matmul %12, %14, %cst_16 {dimension_numbers = #tpu.dot_dimension_numbers<[1], [0], [0], [1], [0, 0, 1, 1], [], []>} : vector<4x128xbf16>, vector<128x128xbf16>, vector<4x128xf32> -> vector<4x128xf32>
    %16 = arith.addf %10, %15 : vector<4x128xf32>
    %c0_17 = arith.constant 0 : index
    %c0_18 = arith.constant 0 : index
    %c0_19 = arith.constant 0 : index
    %17 = vector.load %arg4[%c0_17, %c0_18, %c0_19] : memref<1x6x128xbf16, #tpu.memory_space<vmem>>, vector<1x4x128xbf16>
    %18 = vector.shape_cast %17 : vector<1x4x128xbf16> to vector<4x128xbf16>
    %c3 = arith.constant 3 : index
    %c0_20 = arith.constant 0 : index
    %c0_21 = arith.constant 0 : index
    %19 = vector.load %arg7[%c3, %c0_20, %c0_21] : memref<9x128x128xbf16, #tpu.memory_space<vmem>>, vector<1x128x128xbf16>
    %20 = vector.shape_cast %19 : vector<1x128x128xbf16> to vector<128x128xbf16>
    %cst_22 = arith.constant dense<0.000000e+00> : vector<4x128xf32>
    %21 = tpu.matmul %18, %20, %cst_22 {dimension_numbers = #tpu.dot_dimension_numbers<[1], [0], [0], [1], [0, 0, 1, 1], [], []>} : vector<4x128xbf16>, vector<128x128xbf16>, vector<4x128xf32> -> vector<4x128xf32>
    %22 = arith.addf %16, %21 : vector<4x128xf32>
    %c0_23 = arith.constant 0 : index
    %c0_24 = arith.constant 0 : index
    %c0_25 = arith.constant 0 : index
    %23 = vector.load %arg5[%c0_23, %c0_24, %c0_25] : memref<1x6x128xbf16, #tpu.memory_space<vmem>>, vector<1x4x128xbf16>
    %24 = vector.shape_cast %23 : vector<1x4x128xbf16> to vector<4x128xbf16>
    %c4 = arith.constant 4 : index
    %c0_26 = arith.constant 0 : index
    %c0_27 = arith.constant 0 : index
    %25 = vector.load %arg7[%c4, %c0_26, %c0_27] : memref<9x128x128xbf16, #tpu.memory_space<vmem>>, vector<1x128x128xbf16>
    %26 = vector.shape_cast %25 : vector<1x128x128xbf16> to vector<128x128xbf16>
    %cst_28 = arith.constant dense<0.000000e+00> : vector<4x128xf32>
    %27 = tpu.matmul %24, %26, %cst_28 {dimension_numbers = #tpu.dot_dimension_numbers<[1], [0], [0], [1], [0, 0, 1, 1], [], []>} : vector<4x128xbf16>, vector<128x128xbf16>, vector<4x128xf32> -> vector<4x128xf32>
    %28 = arith.addf %22, %27 : vector<4x128xf32>
    %c0_29 = arith.constant 0 : index
    %c0_30 = arith.constant 0 : index
    %c0_31 = arith.constant 0 : index
    %29 = vector.load %arg6[%c0_29, %c0_30, %c0_31] : memref<1x6x128xbf16, #tpu.memory_space<vmem>>, vector<1x4x128xbf16>
    %30 = vector.shape_cast %29 : vector<1x4x128xbf16> to vector<4x128xbf16>
    %c5 = arith.constant 5 : index
    %c0_32 = arith.constant 0 : index
    %c0_33 = arith.constant 0 : index
    %31 = vector.load %arg7[%c5, %c0_32, %c0_33] : memref<9x128x128xbf16, #tpu.memory_space<vmem>>, vector<1x128x128xbf16>
    %32 = vector.shape_cast %31 : vector<1x128x128xbf16> to vector<128x128xbf16>
    %cst_34 = arith.constant dense<0.000000e+00> : vector<4x128xf32>
    %33 = tpu.matmul %30, %32, %cst_34 {dimension_numbers = #tpu.dot_dimension_numbers<[1], [0], [0], [1], [0, 0, 1, 1], [], []>} : vector<4x128xbf16>, vector<128x128xbf16>, vector<4x128xf32> -> vector<4x128xf32>
    %34 = arith.addf %28, %33 : vector<4x128xf32>
    %c0_35 = arith.constant 0 : index
    %c2_36 = arith.constant 2 : index
    %c0_37 = arith.constant 0 : index
    %35 = vector.load %arg1[%c0_35, %c2_36, %c0_37] : memref<1x6x128xbf16, #tpu.memory_space<vmem>>, vector<1x4x128xbf16>
    %36 = vector.shape_cast %35 : vector<1x4x128xbf16> to vector<4x128xbf16>
    %c6 = arith.constant 6 : index
    %c0_38 = arith.constant 0 : index
    %c0_39 = arith.constant 0 : index
    %37 = vector.load %arg7[%c6, %c0_38, %c0_39] : memref<9x128x128xbf16, #tpu.memory_space<vmem>>, vector<1x128x128xbf16>
    %38 = vector.shape_cast %37 : vector<1x128x128xbf16> to vector<128x128xbf16>
    %cst_40 = arith.constant dense<0.000000e+00> : vector<4x128xf32>
    %39 = tpu.matmul %36, %38, %cst_40 {dimension_numbers = #tpu.dot_dimension_numbers<[1], [0], [0], [1], [0, 0, 1, 1], [], []>} : vector<4x128xbf16>, vector<128x128xbf16>, vector<4x128xf32> -> vector<4x128xf32>
    %40 = arith.addf %34, %39 : vector<4x128xf32>
    %c0_41 = arith.constant 0 : index
    %c2_42 = arith.constant 2 : index
    %c0_43 = arith.constant 0 : index
    %41 = vector.load %arg2[%c0_41, %c2_42, %c0_43] : memref<1x6x128xbf16, #tpu.memory_space<vmem>>, vector<1x4x128xbf16>
    %42 = vector.shape_cast %41 : vector<1x4x128xbf16> to vector<4x128xbf16>
    %c7 = arith.constant 7 : index
    %c0_44 = arith.constant 0 : index
    %c0_45 = arith.constant 0 : index
    %43 = vector.load %arg7[%c7, %c0_44, %c0_45] : memref<9x128x128xbf16, #tpu.memory_space<vmem>>, vector<1x128x128xbf16>
    %44 = vector.shape_cast %43 : vector<1x128x128xbf16> to vector<128x128xbf16>
    %cst_46 = arith.constant dense<0.000000e+00> : vector<4x128xf32>
    %45 = tpu.matmul %42, %44, %cst_46 {dimension_numbers = #tpu.dot_dimension_numbers<[1], [0], [0], [1], [0, 0, 1, 1], [], []>} : vector<4x128xbf16>, vector<128x128xbf16>, vector<4x128xf32> -> vector<4x128xf32>
    %46 = arith.addf %40, %45 : vector<4x128xf32>
    %c0_47 = arith.constant 0 : index
    %c2_48 = arith.constant 2 : index
    %c0_49 = arith.constant 0 : index
    %47 = vector.load %arg3[%c0_47, %c2_48, %c0_49] : memref<1x6x128xbf16, #tpu.memory_space<vmem>>, vector<1x4x128xbf16>
    %48 = vector.shape_cast %47 : vector<1x4x128xbf16> to vector<4x128xbf16>
    %c8 = arith.constant 8 : index
    %c0_50 = arith.constant 0 : index
    %c0_51 = arith.constant 0 : index
    %49 = vector.load %arg7[%c8, %c0_50, %c0_51] : memref<9x128x128xbf16, #tpu.memory_space<vmem>>, vector<1x128x128xbf16>
    %50 = vector.shape_cast %49 : vector<1x128x128xbf16> to vector<128x128xbf16>
    %cst_52 = arith.constant dense<0.000000e+00> : vector<4x128xf32>
    %51 = tpu.matmul %48, %50, %cst_52 {dimension_numbers = #tpu.dot_dimension_numbers<[1], [0], [0], [1], [0, 0, 1, 1], [], []>} : vector<4x128xbf16>, vector<128x128xbf16>, vector<4x128xf32> -> vector<4x128xf32>
    %52 = arith.addf %46, %51 : vector<4x128xf32>
    %c0_53 = arith.constant 0 : index
    %c0_54 = arith.constant 0 : index
    %53 = vector.load %arg8[%c0_53, %c0_54] : memref<1x128xf32, #tpu.memory_space<vmem>>, vector<1x128xf32>
    %54 = vector.broadcast %53 : vector<1x128xf32> to vector<4x128xf32>
    %55 = arith.addf %52, %54 : vector<4x128xf32>
    %cst_55 = arith.constant 0.000000e+00 : f32
    %56 = vector.broadcast %cst_55 : f32 to vector<4x128xf32>
    %57 = arith.cmpf oge, %55, %56 : vector<4x128xf32>
    %cst_56 = arith.constant 0.00999999977 : f32
    %58 = vector.broadcast %cst_56 : f32 to vector<4x128xf32>
    %59 = arith.mulf %55, %58 : vector<4x128xf32>
    %60 = arith.select %57, %55, %59 : vector<4x128xi1>, vector<4x128xf32>
    %61 = arith.truncf %60 : vector<4x128xf32> to vector<4x128xbf16>
    %c0_57 = arith.constant 0 : index
    %c0_58 = arith.constant 0 : index
    %c0_59 = arith.constant 0 : index
    %62 = vector.load %arg9[%c0_57, %c0_58, %c0_59] : memref<1x4x128xbf16, #tpu.memory_space<vmem>>, vector<1x4x128xbf16>
    %63 = vector.shape_cast %62 : vector<1x4x128xbf16> to vector<4x128xbf16>
    %64 = vector.shape_cast %61 : vector<4x128xbf16> to vector<1x4x128xbf16>
    tpu.vector_store %arg9[%c0_57, %c0_58, %c0_59], %64 {strides = array<i32>} : memref<1x4x128xbf16, #tpu.memory_space<vmem>>, vector<1x4x128xbf16>,
    return
  }
  func.func @transform_0(%arg0: i32) -> (i32, i32, i32) {
    %c0_i32 = arith.constant 0 : i32
    %c0_i32_0 = arith.constant 0 : i32
    %c0_i32_1 = arith.constant 0 : i32
    return %arg0, %c0_i32, %c0_i32_0 : i32, i32, i32
  }
  func.func @transform_1(%arg0: i32) -> (i32, i32, i32) {
    %c0_i32 = arith.constant 0 : i32
    %c0_i32_0 = arith.constant 0 : i32
    %c0_i32_1 = arith.constant 0 : i32
    return %arg0, %c0_i32, %c0_i32_0 : i32, i32, i32
  }
  func.func @transform_2(%arg0: i32) -> (i32, i32, i32) {
    %c0_i32 = arith.constant 0 : i32
    %c0_i32_0 = arith.constant 0 : i32
    %c0_i32_1 = arith.constant 0 : i32
    return %arg0, %c0_i32, %c0_i32_0 : i32, i32, i32
  }
  func.func @transform_3(%arg0: i32) -> (i32, i32, i32) {
    %c0_i32 = arith.constant 0 : i32
    %c0_i32_0 = arith.constant 0 : i32
    %c0_i32_1 = arith.constant 0 : i32
    return %arg0, %c0_i32, %c0_i32_0 : i32, i32, i32
  }
  func.func @transform_4(%arg0: i32) -> (i32, i32, i32) {
    %c0_i32 = arith.constant 0 : i32
    %c0_i32_0 = arith.constant 0 : i32
    %c0_i32_1 = arith.constant 0 : i32
    return %arg0, %c0_i32, %c0_i32_0 : i32, i32, i32
  }
  func.func @transform_5(%arg0: i32) -> (i32, i32, i32) {
    %c0_i32 = arith.constant 0 : i32
    %c0_i32_0 = arith.constant 0 : i32
    %c0_i32_1 = arith.constant 0 : i32
    return %arg0, %c0_i32, %c0_i32_0 : i32, i32, i32
  }
  func.func @transform_6(%arg0: i32) -> (i32, i32, i32) {
    %c0_i32 = arith.constant 0 : i32
    %c0_i32_0 = arith.constant 0 : i32
    %c0_i32_1 = arith.constant 0 : i32
    %c0_i32_2 = arith.constant 0 : i32
    return %c0_i32, %c0_i32_0, %c0_i32_1 : i32, i32, i32
  }
  func.func @transform_7(%arg0: i32) -> (i32, i32) {
    %c0_i32 = arith.constant 0 : i32
    %c0_i32_0 = arith.constant 0 : i32
    %c0_i32_1 = arith.constant 0 : i32
    return %c0_i32, %c0_i32_0 : i32, i32
  }
  func.func @transform_8(%arg0: i32) -> (i32, i32, i32) {
    %c0_i32 = arith.constant 0 : i32
    %c0_i32_0 = arith.constant 0 : i32
    %c0_i32_1 = arith.constant 0 : i32
    return %arg0, %c0_i32, %c0_i32_0 : i32, i32, i32
  }
}

module attributes {stable_mosaic.version = 11 : i64} {
  func.func @_conv_linear_kernel(%arg0: i32, %arg1: memref<1x2x128xbf16, #tpu.memory_space<vmem>>, %arg2: memref<1x2x128xbf16, #tpu.memory_space<vmem>>, %arg3: memref<1x2x128xbf16, #tpu.memory_space<vmem>>, %arg4: memref<1x2x128xbf16, #tpu.memory_space<vmem>>, %arg5: memref<1x2x128xbf16, #tpu.memory_space<vmem>>, %arg6: memref<1x2x128xbf16, #tpu.memory_space<vmem>>, %arg7: memref<9x128x128xbf16, #tpu.memory_space<vmem>>, %arg8: memref<1x128xf32, #tpu.memory_space<vmem>>, %arg9: memref<128x128xf32, #tpu.memory_space<vmem>>, %arg10: memref<1x128xf32, #tpu.memory_space<vmem>>, %arg11: memref<1x1x128xf32, #tpu.memory_space<vmem>>) attributes {dimension_semantics = [#tpu.dimension_semantics<parallel>], iteration_bounds = array<i64: 2>, scalar_prefetch = 0 : i64, scratch_operands = 0 : i64, tpu.core_type = #tpu.core_type<tc>, window_params = [{transform_indices = @transform_0, window_bounds = array<i64: 1, 2, 128>}, {transform_indices = @transform_1, window_bounds = array<i64: 1, 2, 128>}, {transform_indices = @transform_2, window_bounds = array<i64: 1, 2, 128>}, {transform_indices = @transform_3, window_bounds = array<i64: 1, 2, 128>}, {transform_indices = @transform_4, window_bounds = array<i64: 1, 2, 128>}, {transform_indices = @transform_5, window_bounds = array<i64: 1, 2, 128>}, {pipeline_mode = #tpu.pipeline_mode<synchronous>, transform_indices = @transform_6, window_bounds = array<i64: 9, 128, 128>}, {pipeline_mode = #tpu.pipeline_mode<synchronous>, transform_indices = @transform_7, window_bounds = array<i64: 1, 128>}, {pipeline_mode = #tpu.pipeline_mode<synchronous>, transform_indices = @transform_8, window_bounds = array<i64: 128, 128>}, {pipeline_mode = #tpu.pipeline_mode<synchronous>, transform_indices = @transform_9, window_bounds = array<i64: 1, 128>}, {transform_indices = @transform_10, window_bounds = array<i64: 1, 1, 128>}]} {
    %c0 = arith.constant 0 : index
    %c0_0 = arith.constant 0 : index
    %c0_1 = arith.constant 0 : index
    %0 = vector.load %arg1[%c0, %c0_0, %c0_1] : memref<1x2x128xbf16, #tpu.memory_space<vmem>>, vector<1x1x128xbf16>
    %1 = vector.shape_cast %0 : vector<1x1x128xbf16> to vector<1x128xbf16>
    %c0_2 = arith.constant 0 : index
    %c0_3 = arith.constant 0 : index
    %c0_4 = arith.constant 0 : index
    %2 = vector.load %arg7[%c0_2, %c0_3, %c0_4] : memref<9x128x128xbf16, #tpu.memory_space<vmem>>, vector<1x128x128xbf16>
    %3 = vector.shape_cast %2 : vector<1x128x128xbf16> to vector<128x128xbf16>
    %cst = arith.constant dense<0.000000e+00> : vector<1x128xf32>
    %4 = tpu.matmul %1, %3, %cst {dimension_numbers = #tpu.dot_dimension_numbers<[1], [0], [0], [1], [0, 0, 1, 1], [], []>} : vector<1x128xbf16>, vector<128x128xbf16>, vector<1x128xf32> -> vector<1x128xf32>
    %c0_5 = arith.constant 0 : index
    %c0_6 = arith.constant 0 : index
    %c0_7 = arith.constant 0 : index
    %5 = vector.load %arg2[%c0_5, %c0_6, %c0_7] : memref<1x2x128xbf16, #tpu.memory_space<vmem>>, vector<1x1x128xbf16>
    %6 = vector.shape_cast %5 : vector<1x1x128xbf16> to vector<1x128xbf16>
    %c1 = arith.constant 1 : index
    %c0_8 = arith.constant 0 : index
    %c0_9 = arith.constant 0 : index
    %7 = vector.load %arg7[%c1, %c0_8, %c0_9] : memref<9x128x128xbf16, #tpu.memory_space<vmem>>, vector<1x128x128xbf16>
    %8 = vector.shape_cast %7 : vector<1x128x128xbf16> to vector<128x128xbf16>
    %cst_10 = arith.constant dense<0.000000e+00> : vector<1x128xf32>
    %9 = tpu.matmul %6, %8, %cst_10 {dimension_numbers = #tpu.dot_dimension_numbers<[1], [0], [0], [1], [0, 0, 1, 1], [], []>} : vector<1x128xbf16>, vector<128x128xbf16>, vector<1x128xf32> -> vector<1x128xf32>
    %10 = arith.addf %4, %9 : vector<1x128xf32>
    %c0_11 = arith.constant 0 : index
    %c0_12 = arith.constant 0 : index
    %c0_13 = arith.constant 0 : index
    %11 = vector.load %arg3[%c0_11, %c0_12, %c0_13] : memref<1x2x128xbf16, #tpu.memory_space<vmem>>, vector<1x1x128xbf16>
    %12 = vector.shape_cast %11 : vector<1x1x128xbf16> to vector<1x128xbf16>
    %c2 = arith.constant 2 : index
    %c0_14 = arith.constant 0 : index
    %c0_15 = arith.constant 0 : index
    %13 = vector.load %arg7[%c2, %c0_14, %c0_15] : memref<9x128x128xbf16, #tpu.memory_space<vmem>>, vector<1x128x128xbf16>
    %14 = vector.shape_cast %13 : vector<1x128x128xbf16> to vector<128x128xbf16>
    %cst_16 = arith.constant dense<0.000000e+00> : vector<1x128xf32>
    %15 = tpu.matmul %12, %14, %cst_16 {dimension_numbers = #tpu.dot_dimension_numbers<[1], [0], [0], [1], [0, 0, 1, 1], [], []>} : vector<1x128xbf16>, vector<128x128xbf16>, vector<1x128xf32> -> vector<1x128xf32>
    %16 = arith.addf %10, %15 : vector<1x128xf32>
    %c0_17 = arith.constant 0 : index
    %c0_18 = arith.constant 0 : index
    %c0_19 = arith.constant 0 : index
    %17 = vector.load %arg4[%c0_17, %c0_18, %c0_19] : memref<1x2x128xbf16, #tpu.memory_space<vmem>>, vector<1x1x128xbf16>
    %18 = vector.shape_cast %17 : vector<1x1x128xbf16> to vector<1x128xbf16>
    %c3 = arith.constant 3 : index
    %c0_20 = arith.constant 0 : index
    %c0_21 = arith.constant 0 : index
    %19 = vector.load %arg7[%c3, %c0_20, %c0_21] : memref<9x128x128xbf16, #tpu.memory_space<vmem>>, vector<1x128x128xbf16>
    %20 = vector.shape_cast %19 : vector<1x128x128xbf16> to vector<128x128xbf16>
    %cst_22 = arith.constant dense<0.000000e+00> : vector<1x128xf32>
    %21 = tpu.matmul %18, %20, %cst_22 {dimension_numbers = #tpu.dot_dimension_numbers<[1], [0], [0], [1], [0, 0, 1, 1], [], []>} : vector<1x128xbf16>, vector<128x128xbf16>, vector<1x128xf32> -> vector<1x128xf32>
    %22 = arith.addf %16, %21 : vector<1x128xf32>
    %c0_23 = arith.constant 0 : index
    %c0_24 = arith.constant 0 : index
    %c0_25 = arith.constant 0 : index
    %23 = vector.load %arg5[%c0_23, %c0_24, %c0_25] : memref<1x2x128xbf16, #tpu.memory_space<vmem>>, vector<1x1x128xbf16>
    %24 = vector.shape_cast %23 : vector<1x1x128xbf16> to vector<1x128xbf16>
    %c4 = arith.constant 4 : index
    %c0_26 = arith.constant 0 : index
    %c0_27 = arith.constant 0 : index
    %25 = vector.load %arg7[%c4, %c0_26, %c0_27] : memref<9x128x128xbf16, #tpu.memory_space<vmem>>, vector<1x128x128xbf16>
    %26 = vector.shape_cast %25 : vector<1x128x128xbf16> to vector<128x128xbf16>
    %cst_28 = arith.constant dense<0.000000e+00> : vector<1x128xf32>
    %27 = tpu.matmul %24, %26, %cst_28 {dimension_numbers = #tpu.dot_dimension_numbers<[1], [0], [0], [1], [0, 0, 1, 1], [], []>} : vector<1x128xbf16>, vector<128x128xbf16>, vector<1x128xf32> -> vector<1x128xf32>
    %28 = arith.addf %22, %27 : vector<1x128xf32>
    %c0_29 = arith.constant 0 : index
    %c0_30 = arith.constant 0 : index
    %c0_31 = arith.constant 0 : index
    %29 = vector.load %arg6[%c0_29, %c0_30, %c0_31] : memref<1x2x128xbf16, #tpu.memory_space<vmem>>, vector<1x1x128xbf16>
    %30 = vector.shape_cast %29 : vector<1x1x128xbf16> to vector<1x128xbf16>
    %c5 = arith.constant 5 : index
    %c0_32 = arith.constant 0 : index
    %c0_33 = arith.constant 0 : index
    %31 = vector.load %arg7[%c5, %c0_32, %c0_33] : memref<9x128x128xbf16, #tpu.memory_space<vmem>>, vector<1x128x128xbf16>
    %32 = vector.shape_cast %31 : vector<1x128x128xbf16> to vector<128x128xbf16>
    %cst_34 = arith.constant dense<0.000000e+00> : vector<1x128xf32>
    %33 = tpu.matmul %30, %32, %cst_34 {dimension_numbers = #tpu.dot_dimension_numbers<[1], [0], [0], [1], [0, 0, 1, 1], [], []>} : vector<1x128xbf16>, vector<128x128xbf16>, vector<1x128xf32> -> vector<1x128xf32>
    %34 = arith.addf %28, %33 : vector<1x128xf32>
    %c0_35 = arith.constant 0 : index
    %c1_36 = arith.constant 1 : index
    %c0_37 = arith.constant 0 : index
    %35 = vector.load %arg1[%c0_35, %c1_36, %c0_37] : memref<1x2x128xbf16, #tpu.memory_space<vmem>>, vector<1x1x128xbf16>
    %36 = vector.shape_cast %35 : vector<1x1x128xbf16> to vector<1x128xbf16>
    %c6 = arith.constant 6 : index
    %c0_38 = arith.constant 0 : index
    %c0_39 = arith.constant 0 : index
    %37 = vector.load %arg7[%c6, %c0_38, %c0_39] : memref<9x128x128xbf16, #tpu.memory_space<vmem>>, vector<1x128x128xbf16>
    %38 = vector.shape_cast %37 : vector<1x128x128xbf16> to vector<128x128xbf16>
    %cst_40 = arith.constant dense<0.000000e+00> : vector<1x128xf32>
    %39 = tpu.matmul %36, %38, %cst_40 {dimension_numbers = #tpu.dot_dimension_numbers<[1], [0], [0], [1], [0, 0, 1, 1], [], []>} : vector<1x128xbf16>, vector<128x128xbf16>, vector<1x128xf32> -> vector<1x128xf32>
    %40 = arith.addf %34, %39 : vector<1x128xf32>
    %c0_41 = arith.constant 0 : index
    %c1_42 = arith.constant 1 : index
    %c0_43 = arith.constant 0 : index
    %41 = vector.load %arg2[%c0_41, %c1_42, %c0_43] : memref<1x2x128xbf16, #tpu.memory_space<vmem>>, vector<1x1x128xbf16>
    %42 = vector.shape_cast %41 : vector<1x1x128xbf16> to vector<1x128xbf16>
    %c7 = arith.constant 7 : index
    %c0_44 = arith.constant 0 : index
    %c0_45 = arith.constant 0 : index
    %43 = vector.load %arg7[%c7, %c0_44, %c0_45] : memref<9x128x128xbf16, #tpu.memory_space<vmem>>, vector<1x128x128xbf16>
    %44 = vector.shape_cast %43 : vector<1x128x128xbf16> to vector<128x128xbf16>
    %cst_46 = arith.constant dense<0.000000e+00> : vector<1x128xf32>
    %45 = tpu.matmul %42, %44, %cst_46 {dimension_numbers = #tpu.dot_dimension_numbers<[1], [0], [0], [1], [0, 0, 1, 1], [], []>} : vector<1x128xbf16>, vector<128x128xbf16>, vector<1x128xf32> -> vector<1x128xf32>
    %46 = arith.addf %40, %45 : vector<1x128xf32>
    %c0_47 = arith.constant 0 : index
    %c1_48 = arith.constant 1 : index
    %c0_49 = arith.constant 0 : index
    %47 = vector.load %arg3[%c0_47, %c1_48, %c0_49] : memref<1x2x128xbf16, #tpu.memory_space<vmem>>, vector<1x1x128xbf16>
    %48 = vector.shape_cast %47 : vector<1x1x128xbf16> to vector<1x128xbf16>
    %c8 = arith.constant 8 : index
    %c0_50 = arith.constant 0 : index
    %c0_51 = arith.constant 0 : index
    %49 = vector.load %arg7[%c8, %c0_50, %c0_51] : memref<9x128x128xbf16, #tpu.memory_space<vmem>>, vector<1x128x128xbf16>
    %50 = vector.shape_cast %49 : vector<1x128x128xbf16> to vector<128x128xbf16>
    %cst_52 = arith.constant dense<0.000000e+00> : vector<1x128xf32>
    %51 = tpu.matmul %48, %50, %cst_52 {dimension_numbers = #tpu.dot_dimension_numbers<[1], [0], [0], [1], [0, 0, 1, 1], [], []>} : vector<1x128xbf16>, vector<128x128xbf16>, vector<1x128xf32> -> vector<1x128xf32>
    %52 = arith.addf %46, %51 : vector<1x128xf32>
    %c0_53 = arith.constant 0 : index
    %c0_54 = arith.constant 0 : index
    %53 = vector.load %arg8[%c0_53, %c0_54] : memref<1x128xf32, #tpu.memory_space<vmem>>, vector<1x128xf32>
    %54 = arith.addf %52, %53 : vector<1x128xf32>
    %cst_55 = arith.constant 0.000000e+00 : f32
    %55 = vector.broadcast %cst_55 : f32 to vector<1x128xf32>
    %56 = arith.cmpf oge, %54, %55 : vector<1x128xf32>
    %cst_56 = arith.constant 0.00999999977 : f32
    %57 = vector.broadcast %cst_56 : f32 to vector<1x128xf32>
    %58 = arith.mulf %54, %57 : vector<1x128xf32>
    %59 = arith.select %56, %54, %58 : vector<1x128xi1>, vector<1x128xf32>
    %c0_57 = arith.constant 0 : index
    %c0_58 = arith.constant 0 : index
    %60 = vector.load %arg9[%c0_57, %c0_58] : memref<128x128xf32, #tpu.memory_space<vmem>>, vector<128x128xf32>
    %cst_59 = arith.constant dense<0.000000e+00> : vector<1x128xf32>
    %61 = tpu.matmul %59, %60, %cst_59 {dimension_numbers = #tpu.dot_dimension_numbers<[1], [0], [0], [1], [0, 0, 1, 1], [], []>} : vector<1x128xf32>, vector<128x128xf32>, vector<1x128xf32> -> vector<1x128xf32>
    %c0_60 = arith.constant 0 : index
    %c0_61 = arith.constant 0 : index
    %62 = vector.load %arg10[%c0_60, %c0_61] : memref<1x128xf32, #tpu.memory_space<vmem>>, vector<1x128xf32>
    %63 = arith.addf %61, %62 : vector<1x128xf32>
    %c0_62 = arith.constant 0 : index
    %c0_63 = arith.constant 0 : index
    %c0_64 = arith.constant 0 : index
    %64 = vector.load %arg11[%c0_62, %c0_63, %c0_64] : memref<1x1x128xf32, #tpu.memory_space<vmem>>, vector<1x1x128xf32>
    %65 = vector.shape_cast %64 : vector<1x1x128xf32> to vector<1x128xf32>
    %66 = vector.shape_cast %63 : vector<1x128xf32> to vector<1x1x128xf32>
    tpu.vector_store %arg11[%c0_62, %c0_63, %c0_64], %66 {strides = array<i32>} : memref<1x1x128xf32, #tpu.memory_space<vmem>>, vector<1x1x128xf32>,
    return
  }
  func.func @transform_0(%arg0: i32) -> (i32, i32, i32) {
    %c0_i32 = arith.constant 0 : i32
    %c0_i32_0 = arith.constant 0 : i32
    %c0_i32_1 = arith.constant 0 : i32
    return %arg0, %c0_i32, %c0_i32_0 : i32, i32, i32
  }
  func.func @transform_1(%arg0: i32) -> (i32, i32, i32) {
    %c0_i32 = arith.constant 0 : i32
    %c0_i32_0 = arith.constant 0 : i32
    %c0_i32_1 = arith.constant 0 : i32
    return %arg0, %c0_i32, %c0_i32_0 : i32, i32, i32
  }
  func.func @transform_2(%arg0: i32) -> (i32, i32, i32) {
    %c0_i32 = arith.constant 0 : i32
    %c0_i32_0 = arith.constant 0 : i32
    %c0_i32_1 = arith.constant 0 : i32
    return %arg0, %c0_i32, %c0_i32_0 : i32, i32, i32
  }
  func.func @transform_3(%arg0: i32) -> (i32, i32, i32) {
    %c0_i32 = arith.constant 0 : i32
    %c0_i32_0 = arith.constant 0 : i32
    %c0_i32_1 = arith.constant 0 : i32
    return %arg0, %c0_i32, %c0_i32_0 : i32, i32, i32
  }
  func.func @transform_4(%arg0: i32) -> (i32, i32, i32) {
    %c0_i32 = arith.constant 0 : i32
    %c0_i32_0 = arith.constant 0 : i32
    %c0_i32_1 = arith.constant 0 : i32
    return %arg0, %c0_i32, %c0_i32_0 : i32, i32, i32
  }
  func.func @transform_5(%arg0: i32) -> (i32, i32, i32) {
    %c0_i32 = arith.constant 0 : i32
    %c0_i32_0 = arith.constant 0 : i32
    %c0_i32_1 = arith.constant 0 : i32
    return %arg0, %c0_i32, %c0_i32_0 : i32, i32, i32
  }
  func.func @transform_6(%arg0: i32) -> (i32, i32, i32) {
    %c0_i32 = arith.constant 0 : i32
    %c0_i32_0 = arith.constant 0 : i32
    %c0_i32_1 = arith.constant 0 : i32
    %c0_i32_2 = arith.constant 0 : i32
    return %c0_i32, %c0_i32_0, %c0_i32_1 : i32, i32, i32
  }
  func.func @transform_7(%arg0: i32) -> (i32, i32) {
    %c0_i32 = arith.constant 0 : i32
    %c0_i32_0 = arith.constant 0 : i32
    %c0_i32_1 = arith.constant 0 : i32
    return %c0_i32, %c0_i32_0 : i32, i32
  }
  func.func @transform_8(%arg0: i32) -> (i32, i32) {
    %c0_i32 = arith.constant 0 : i32
    %c0_i32_0 = arith.constant 0 : i32
    %c0_i32_1 = arith.constant 0 : i32
    return %c0_i32, %c0_i32_0 : i32, i32
  }
  func.func @transform_9(%arg0: i32) -> (i32, i32) {
    %c0_i32 = arith.constant 0 : i32
    %c0_i32_0 = arith.constant 0 : i32
    %c0_i32_1 = arith.constant 0 : i32
    return %c0_i32, %c0_i32_0 : i32, i32
  }
  func.func @transform_10(%arg0: i32) -> (i32, i32, i32) {
    %c0_i32 = arith.constant 0 : i32
    %c0_i32_0 = arith.constant 0 : i32
    %c0_i32_1 = arith.constant 0 : i32
    return %arg0, %c0_i32, %c0_i32_0 : i32, i32, i32
  }
}

</mosaic_0001>

<bundles_post_ra>
// kernel: a_call__.4
= control target key start
LH: loop header
LB: loop body
LE: loop exit
PB: predicated region body
PF: predicated region fallthrough
CT: control target
= control target key end

     0   :  { %s4020_s0 = inlined_call_operand.hbm [shape: bf16[2,72,128], index: 0, kind: input, shape index: {}]   ;;  %s4021_s1 = inlined_call_operand.hbm [shape: bf16[2,72,128], index: 1, kind: input, shape index: {}]   ;;  %s4022_s2 = inlined_call_operand.hbm [shape: bf16[2,72,128], index: 2, kind: input, shape index: {}]   ;;  %s4023_s3 = inlined_call_operand.hbm [shape: bf16[2,72,128], index: 3, kind: input, shape index: {}]   ;;  %s4024_s4 = inlined_call_operand.hbm [shape: bf16[2,72,128], index: 4, kind: input, shape index: {}]   ;;  %s4025_s5 = inlined_call_operand.hbm [shape: bf16[2,72,128], index: 5, kind: input, shape index: {}]   ;;  %s4026_s6 = inlined_call_operand.hbm [shape: bf16[9,128,128], index: 6, kind: input, shape index: {}]   ;;  %s4027_s7 = inlined_call_operand.hbm [shape: f32[1,128], index: 7, kind: input, shape index: {}]   ;;  %s4028_s8 = inlined_call_operand.hbm [shape: bf16[2,64,128], index: 8, kind: output, shape index: {}]  }
   0x1   :  { %4054 = sst [smem:[#allocation30_spill]] %s4020_s0 }
   0x2   :  { %4055 = sst [smem:[#allocation31_spill]] %s4021_s1 }
   0x3   :  { %4056 = sst [smem:[#allocation32_spill]] %s4026_s6 }
   0x4   :  { %4057 = sst [smem:[#allocation33_spill]] %s4028_s8 }
   0x5   :  { %13 = vsyncpa [#allocation3], 0 }
   0x6   :  { %15 = vsyncpa [#allocation3 + $0x1], 0 }
   0x7   :  { %16 = vsyncpa [#allocation6], 0 }
   0x8   :  { %18 = vsyncpa [#allocation6 + $0x1], 0 }
   0x9   :  { %19 = vsyncpa [#allocation9], 0 }
   0xa   :  { %21 = vsyncpa [#allocation9 + $0x1], 0 }
   0xb   :  { %22 = vsyncpa [#allocation12], 0 }
   0xc   :  { %24 = vsyncpa [#allocation12 + $0x1], 0 }
   0xd   :  { %25 = vsyncpa [#allocation15], 0 }
   0xe   :  { %26 = vsyncpa [#allocation4], 0 }
   0xf   :  { %28 = vsyncpa [#allocation4 + $0x1], 0  ;;  %s3525_s27 = smov 0   ;;  %s3527_s28 = smov 0  }
  0x10   :  { %s3529_s29 = smov 0   ;;  %s3531_s30 = smov 0  }
  0x11 LB: > { %4058 = sst [smem:[#allocation24_spill]] %s3453_s27  ;;  %s3546_s9 = sadd.s32 4294967295, %s3465_s30   ;;  %s3465_s30 = sphi %s3531_s30, %s4102_s30   ;;  %s3461_s29 = sphi %s3529_s29, %s4106_s29   ;;  %s3457_s28 = sphi %s3527_s28, %s4105_s28   ;;  %s3453_s27 = sphi %s3525_s27, %s4104_s27  }
  0x12   : > { %4059 = sst [smem:[#allocation25_spill]] %s3465_s30  ;;  %s2353_s10 = sadd.s32 4294967294, %s3465_s30  }
  0x13   : > { %s3550_s11 = sadd.s32 1, %s3465_s30   ;;  %s41_s12 = sadd.s32 1, %s3461_s29 }
  0x14   : > { %4060 = sst [smem:[#allocation26_spill]] %s3550_s11  ;;  %s38_s13 = ssub.s32 %s3465_s30, %s3550_s11 }
  0x15   : > { %p48_p0 = scmp.ne.s32.totalorder %s3461_s29, %s3457_s28  ;;  %p39_p1 = scmp.eq.s32.totalorder %s38_s13, 0 }
  0x16   : > { %p49_p2 = scmp.eq.s32.totalorder %s3465_s30, 0  ;;  %p54_p3 = scmp.ne.s32.totalorder %s3457_s28, %s3453_s27 }
  0x17   : > { %p4030_p4 = scmp.eq.s32.totalorder %s3546_s9, 0  ;;  %p250_p7 = scmp.eq.s32.totalorder %s3546_s9, 1 }
  0x18   : > { %s3562_s14 = scalar_select %p39_p1, %s3461_s29, %s41_s12  }
  0x19   : > { %p3564_p5 = por %p49_p2, %p48_p0  ;;  %p3570_p6 = por %p4030_p4, %p54_p3 }
  0x1a   : > { %4061 = sst [smem:[#allocation27_spill]] %s3562_s14  ;;  %p256_p8 = scmp.eq.s32.totalorder %s2353_s10, 1 }
  0x1b   : > { %s4062_s15 = scalar_select %p3564_p5, 1, 0 }
  0x1c   : > { %s4063_s16 = scalar_select %p3570_p6, 1, 0 }
  0x1d   : > { %p2354_p9 = scmp.ge.s32.totalorder %s3465_s30, 1  ;;  %p263_p10 = scmp.lt.s32.totalorder %s3465_s30, 3 }
  0x1e   : > { %p3577_p11 = por %p250_p7, %p48_p0  ;;  %p3581_p12 = por %p256_p8, %p54_p3 }
  0x1f   : > { %p3585_p13 = pnand %p2354_p9, %p263_p10  ;;  %s3467_s20 = smov [#allocation13]  }
  0x20   : > { %s4064_s17 = scalar_select %p3577_p11, 1, 0 }
  0x21   : > { %s4066_s18 = scalar_select %p3581_p12, 1, 0 }
  0x22   : > { %4065 = sst [smem:[#allocation28_spill]] %s4064_s17  ;;  %p2961_p1 = pneg %p3585_p13 }
  0x23   : > { %4067 = sst [smem:[#allocation29_spill]] %s4066_s18  ;;  %s275_s21 = sshll.u32 %s3467_s20, 4  ;;  %s276_s21 = int_to_ptr.vmem [resolvable:$true] %s275_s21 }
  0x24   : > { %s4068_s19 = scalar_select %p3585_p13, 1, 0 }
  0x25   : > { %p3593_p2 = pnand %p2961_p1, %p4030_p4  ;;  %s4029_s23 = sand.u32 1, %s3461_s29  }
  0x26   : > { %s3602_s24 = smul.u32 36, %s4029_s23  ;;  %s4070_s6 = sld [smem:[#allocation32_spill]] }
  0x27   : > { %s4069_s22 = scalar_select %p3593_p2, 1, 0 }
  0x28   : > { %p4041_p8 = pneg %p3593_p2 }
  0x2c   : > { %s3143_s10 = scalar_lea.hbm %s4070_s6, 9216 }
  0x2d   : > { %p3144_p7 = scmp.ne.s32.totalorder %s4070_s6, %s3143_s10  ;;  %p3150_p1 = scmp.lt.u32.totalorder %s3143_s10, %s4070_s6 }
  0x2f   : > { %p3146_p9 = pnand %p4041_p8, %p3144_p7 }
  0x31   : > { %p3147_p10 = pneg %p3146_p9 }
  0x33   : > { %p3152_p0 = pnand %p3150_p1, %p3147_p10 }
  0x35   : > { %3155 = shalt.err (!%p3152_p0)
}
  0x36   : > { %s3156_s23 = scalar_lea.vmem %s276_s21, 9216  ;;  %p3164_p11 = scmp.lt.s32.totalorder %s276_s21, %s276_s21 }
  0x37   : > { %p3157_p4 = scmp.ne.s32.totalorder %s276_s21, %s3156_s23  ;;  %p3165_p6 = scmp.lt.s32.totalorder %s3156_s23, %s3156_s23 }
  0x39   : > { %p3159_p3 = pnand %p3157_p4, %p4041_p8  ;;  %p3166_p13 = por %p3165_p6, %p3164_p11 }
  0x3b   : > { %p3160_p12 = pneg %p3159_p3 }
  0x3d   : > { %p3167_p5 = pnand %p3166_p13, %p3160_p12 }
  0x3f   : > { %3170 = shalt.err (!%p3167_p5)
}
  0x40   : > { %s4037_s25 = smov 64   ;;  %s4039_s14 = smov 4  }
  0x41   : > { %2964 = dma.hbm_to_vmem [thread:$0]  (!%p3593_p2), %s4070_s6, 9216, %s276_s21, [#allocation12], %s4037_s25, %s4037_s25, %s4039_s14  }
  0x42   : > { %p4071_p4 = scmp.ne.s32.totalorder %s4062_s15, 0  ;;  %p4072_p6 = scmp.lt.s32.totalorder %s3465_s30, 2 }
  0x43   : > { %s3638_s12 = smul.u32 576, %s3465_s30  ;;  %s3641_s13 = sand.u32 1, %s3465_s30  }
  0x44   : > { %p3633_p11 = pnand %p4072_p6, %p4071_p4  ;;  %s4074_s1 = sld [smem:[#allocation31_spill]] }
  0x45   : > { %s325_s15 = scalar_lea.vmem [#allocation5], %s3602_s24 }
  0x46   : > { %s4073_s23 = scalar_select %p3633_p11, 1, 0 }
  0x47   : > { %s332_s21 = sshll.u32 %s325_s15, 4  ;;  %p3657_p12 = pneg %p3633_p11  ;;  %s3650_s21 = int_to_ptr.vmem [resolvable:$true] %s332_s21 }
  0x49   : > { %s4075_s25 = scalar_select %p3657_p12, 1, 0 }
  0x4a   : > { %s3647_s18 = scalar_lea.hbm %s4074_s1, %s3638_s12  ;;  %s3176_s14 = scalar_lea.hbm %s4074_s1, 1152 }
  0x4b   : > { %s3171_s10 = scalar_lea.hbm %s3647_s18, 576  ;;  %p3177_p3 = scmp.lt.u32.totalorder %s3647_s18, %s4074_s1 }
  0x4c   : > { %p3172_p5 = scmp.ne.s32.totalorder %s3647_s18, %s3171_s10  ;;  %p3178_p7 = scmp.lt.u32.totalorder %s3176_s14, %s3171_s10 }
  0x4d   : > { %p3180_p10 = scmp.lt.u32.totalorder %s3171_s10, %s3647_s18 }
  0x4e   : > { %p3174_p13 = pnand %p3657_p12, %p3172_p5  ;;  %p3179_p9 = por %p3178_p7, %p3177_p3 }
  0x50   : > { %p3175_p0 = pneg %p3174_p13  ;;  %p3181_p1 = por %p3180_p10, %p3179_p9 }
  0x52   : > { %p3182_p4 = pnand %p3181_p1, %p3175_p0 }
  0x54   : > { %3185 = shalt.err (!%p3182_p4)
}
  0x55   : > { %s3186_s26 = scalar_lea.vmem %s3650_s21, 576  ;;  %s3470_s11 = smov [#allocation5]  }
  0x56   : > { %p3187_p6 = scmp.ne.s32.totalorder %s3650_s21, %s3186_s26  ;;  %s3191_s20 = sshll.u32 %s3470_s11, 4  ;;  %s3192_s20 = int_to_ptr.vmem [resolvable:$false] %s3191_s20 }
  0x57   : > { %s3193_s6 = scalar_lea.vmem %s3192_s20, 1152  ;;  %p3194_p8 = scmp.lt.s32.totalorder %s3650_s21, %s3192_s20 }
  0x58   : > { %p3189_p5 = pnand %p3187_p6, %p3657_p12  ;;  %p3195_p2 = scmp.lt.s32.totalorder %s3193_s6, %s3186_s26 }
  0x5a   : > { %p3190_p13 = pneg %p3189_p5  ;;  %p3196_p3 = por %p3195_p2, %p3194_p8 }
  0x5c   : > { %p3197_p7 = pnand %p3196_p3, %p3190_p13 }
  0x5e   : > { %3200 = shalt.err (!%p3197_p7)
}
  0x5f   : > { %s4076_s14 = smov 4   ;;  %s4077_s10 = smov 64  }
  0x60   : > { %s4078_s15 = scalar_lea.sflag [#allocation6], %s3641_s13  ;;  %s3689_s26 = scalar_lea.hbm %s4023_s3, %s3638_s12 }
  0x61   : > { %2974 = dma.hbm_to_vmem [thread:$0]  (!%p3633_p11), %s3647_s18, 576, %s3650_s21, %s4078_s15, %s4077_s10, %s4077_s10, %s4076_s14  }
  0x62   : > { %s367_s6 = scalar_lea.vmem [#allocation8], %s3602_s24  ;;  %s3471_s30 = smov [#allocation14]  }
  0x63   : > { %s374_s1 = sshll.u32 %s367_s6, 4  ;;  %s3694_s27 = sshll.u32 %s3471_s30, 4  ;;  %s3692_s1 = int_to_ptr.vmem [resolvable:$true] %s374_s1  ;;  %s290_s27 = int_to_ptr.vmem [resolvable:$true] %s3694_s27 }
  0x64   : > { %s4053_s8 = scalar_lea.sflag [#allocation9], %s3641_s13  ;;  %s3201_s17 = scalar_lea.hbm %s3689_s26, 576 }
  0x65   : > { %p3202_p2 = scmp.ne.s32.totalorder %s3689_s26, %s3201_s17  ;;  %s3206_s15 = scalar_lea.hbm %s4023_s3, 1152 }
  0x66   : > { %p3207_p9 = scmp.lt.u32.totalorder %s3689_s26, %s4023_s3  ;;  %p3208_p10 = scmp.lt.u32.totalorder %s3206_s15, %s3201_s17 }
  0x67   : > { %p3204_p8 = pnand %p3202_p2, %p3657_p12  ;;  %p3210_p4 = scmp.lt.u32.totalorder %s3201_s17, %s3689_s26 }
  0x68   : > { %p3209_p1 = por %p3208_p10, %p3207_p9 }
  0x69   : > { %p3205_p0 = pneg %p3204_p8 }
  0x6a   : > { %p3211_p6 = por %p3210_p4, %p3209_p1 }
  0x6c   : > { %p3212_p5 = pnand %p3211_p6, %p3205_p0 }
  0x6e   : > { %3215 = shalt.err (!%p3212_p5)
}
  0x6f   : > { %s3216_s30 = scalar_lea.vmem %s3692_s1, 576  ;;  %s3472_s6 = smov [#allocation8]  }
  0x70   : > { %p3217_p13 = scmp.ne.s32.totalorder %s3692_s1, %s3216_s30  ;;  %s3221_s18 = sshll.u32 %s3472_s6, 4  ;;  %s3222_s18 = int_to_ptr.vmem [resolvable:$false] %s3221_s18 }
  0x71   : > { %s3223_s21 = scalar_lea.vmem %s3222_s18, 1152  ;;  %p3224_p2 = scmp.lt.s32.totalorder %s3692_s1, %s3222_s18 }
  0x72   : > { %p3219_p3 = pnand %p3217_p13, %p3657_p12  ;;  %p3225_p8 = scmp.lt.s32.totalorder %s3223_s21, %s3216_s30 }
  0x74   : > { %p3220_p7 = pneg %p3219_p3  ;;  %p3226_p9 = por %p3225_p8, %p3224_p2 }
  0x76   : > { %p3227_p10 = pnand %p3226_p9, %p3220_p7 }
  0x78   : > { %3230 = shalt.err (!%p3227_p10)
}
  0x79   : > { %2980 = dma.hbm_to_vmem [thread:$0]  (!%p3633_p11), %s3689_s26, 576, %s3692_s1, %s4053_s8, %s4077_s10, %s4077_s10, %s4076_s14  }
  0x7a   : > { %s3231_s11 = scalar_lea.hbm %s4027_s7, 16  ;;  %p4079_p1 = scmp.ne.s32.totalorder %s4069_s22, 0 }
  0x7b   : > { %p3232_p0 = scmp.ne.s32.totalorder %s4027_s7, %s3231_s11  ;;  %p3238_p13 = scmp.lt.u32.totalorder %s3231_s11, %s4027_s7 }
  0x7c   : > { %p4080_p4 = pneg %p4079_p1 }
  0x7e   : > { %p3234_p6 = pnand %p3232_p0, %p4080_p4 }
  0x80   : > { %p3235_p5 = pneg %p3234_p6 }
  0x82   : > { %p3240_p3 = pnand %p3238_p13, %p3235_p5 }
  0x84   : > { %3243 = shalt.err (!%p3240_p3)
}
  0x85   : > { %s3244_s1 = scalar_lea.vmem %s290_s27, 16  ;;  %p4081_p2 = pmov %p4080_p4 }
  0x86   : > { %p3245_p7 = scmp.ne.s32.totalorder %s290_s27, %s3244_s1  ;;  %s3251_s26 = scalar_lea.vmem %s290_s27, 32 }
  0x87   : > { %p3252_p10 = scmp.lt.s32.totalorder %s290_s27, %s290_s27  ;;  %p3253_p11 = scmp.lt.s32.totalorder %s3251_s26, %s3244_s1 }
  0x88   : > { %p3247_p8 = pnand %p3245_p7, %p4081_p2 }
  0x89   : > { %p3254_p12 = por %p3253_p11, %p3252_p10 }
  0x8a   : > { %p3248_p9 = pneg %p3247_p8 }
  0x8c   : > { %p3255_p0 = pnand %p3254_p12, %p3248_p9 }
  0x8e   : > { %3258 = shalt.err (!%p3255_p0)
}
  0x8f   : > { %2967 = dma.hbm_to_vmem [thread:$0]  (!%p4079_p1), %s4027_s7, 16, %s290_s27, [#allocation15]  }
  0x90   : > { %s4082_s0 = sld [smem:[#allocation30_spill]]  ;;  %s304_s30 = scalar_lea.vmem [#allocation2], %s3602_s24 }
  0x91   : > { %s311_s22 = sshll.u32 %s304_s30, 4  ;;  %s3757_s1 = scalar_lea.hbm %s4022_s2, %s3638_s12  ;;  %s3751_s22 = int_to_ptr.vmem [resolvable:$true] %s311_s22 }
  0x92   : > { %s4083_s26 = sand.u32 1, %s3461_s29   ;;  %p4084_p12 = scmp.ne.s32.totalorder %s4075_s25, 0 }
  0x93   : > { %s3761_s27 = scalar_lea.sflag [#allocation3], %s4083_s26 }
  0x96   : > { %s3748_s20 = scalar_lea.hbm %s4082_s0, %s3638_s12  ;;  %s3264_s11 = scalar_lea.hbm %s4082_s0, 1152 }
  0x97   : > { %s3259_s21 = scalar_lea.hbm %s3748_s20, 576  ;;  %p3265_p6 = scmp.lt.u32.totalorder %s3748_s20, %s4082_s0 }
  0x98   : > { %p3260_p11 = scmp.ne.s32.totalorder %s3748_s20, %s3259_s21  ;;  %p3266_p5 = scmp.lt.u32.totalorder %s3264_s11, %s3259_s21 }
  0x99   : > { %p3268_p3 = scmp.lt.u32.totalorder %s3259_s21, %s3748_s20 }
  0x9a   : > { %p3262_p1 = pnand %p3260_p11, %p4084_p12  ;;  %p3267_p13 = por %p3266_p5, %p3265_p6 }
  0x9c   : > { %p3263_p4 = pneg %p3262_p1  ;;  %p3269_p7 = por %p3268_p3, %p3267_p13 }
  0x9e   : > { %p3270_p2 = pnand %p3269_p7, %p3263_p4 }
  0xa0   : > { %3273 = shalt.err (!%p3270_p2)
}
  0xa1   : > { %s3274_s6 = scalar_lea.vmem %s3751_s22, 576  ;;  %s3473_s18 = smov [#allocation2]  }
  0xa2   : > { %p3275_p8 = scmp.ne.s32.totalorder %s3751_s22, %s3274_s6  ;;  %s3279_s26 = sshll.u32 %s3473_s18, 4  ;;  %s3280_s26 = int_to_ptr.vmem [resolvable:$false] %s3279_s26 }
  0xa3   : > { %s3281_s8 = scalar_lea.vmem %s3280_s26, 1152  ;;  %p3282_p0 = scmp.lt.s32.totalorder %s3751_s22, %s3280_s26 }
  0xa4   : > { %p3277_p9 = pnand %p3275_p8, %p4084_p12  ;;  %p3283_p11 = scmp.lt.s32.totalorder %s3281_s8, %s3274_s6 }
  0xa6   : > { %p3278_p10 = pneg %p3277_p9  ;;  %p3284_p1 = por %p3283_p11, %p3282_p0 }
  0xa8   : > { %p3285_p6 = pnand %p3284_p1, %p3278_p10 }
  0xaa   : > { %3288 = shalt.err (!%p3285_p6)
}
  0xab   : > { %p4085_p4 = scmp.ne.s32.totalorder %s4073_s23, 0  ;;  %s346_s21 = scalar_lea.vmem [#allocation7], %s3602_s24 }
  0xac   : > { %s353_s17 = sshll.u32 %s346_s21, 4  ;;  %s3795_s30 = scalar_lea.hbm %s4024_s4, %s3638_s12  ;;  %s3789_s17 = int_to_ptr.vmem [resolvable:$true] %s353_s17 }
  0xad   : > { %2971 = dma.hbm_to_vmem [thread:$0]  (!%p4085_p4), %s3748_s20, 576, %s3751_s22, %s3761_s27, %s4077_s10, %s4077_s10, %s4076_s14  }
  0xae   : > { %s3289_s6 = scalar_lea.hbm %s3757_s1, 576  ;;  %s3294_s8 = scalar_lea.hbm %s4022_s2, 1152 }
  0xaf   : > { %p3290_p5 = scmp.ne.s32.totalorder %s3757_s1, %s3289_s6  ;;  %p3295_p7 = scmp.lt.u32.totalorder %s3757_s1, %s4022_s2 }
  0xb0   : > { %p3296_p2 = scmp.lt.u32.totalorder %s3294_s8, %s3289_s6  ;;  %p3298_p9 = scmp.lt.u32.totalorder %s3289_s6, %s3757_s1 }
  0xb1   : > { %p3292_p13 = pnand %p3290_p5, %p4084_p12 }
  0xb2   : > { %p3297_p8 = por %p3296_p2, %p3295_p7 }
  0xb3   : > { %p3293_p3 = pneg %p3292_p13 }
  0xb4   : > { %p3299_p10 = por %p3298_p9, %p3297_p8 }
  0xb6   : > { %p3300_p0 = pnand %p3299_p10, %p3293_p3 }
  0xb8   : > { %3303 = shalt.err (!%p3300_p0)
}
  0xb9   : > { %s3304_s22 = scalar_lea.vmem %s3789_s17, 576  ;;  %s3474_s27 = smov [#allocation7]  }
  0xba   : > { %p3305_p11 = scmp.ne.s32.totalorder %s3789_s17, %s3304_s22  ;;  %s3309_s21 = sshll.u32 %s3474_s27, 4  ;;  %s3310_s21 = int_to_ptr.vmem [resolvable:$false] %s3309_s21 }
  0xbb   : > { %s3311_s0 = scalar_lea.vmem %s3310_s21, 1152  ;;  %p3312_p5 = scmp.lt.s32.totalorder %s3789_s17, %s3310_s21 }
  0xbc   : > { %p3307_p1 = pnand %p3305_p11, %p4084_p12  ;;  %p3313_p13 = scmp.lt.s32.totalorder %s3311_s0, %s3304_s22 }
  0xbe   : > { %p3308_p6 = pneg %p3307_p1  ;;  %p3314_p7 = por %p3313_p13, %p3312_p5 }
  0xc0   : > { %p3315_p2 = pnand %p3314_p7, %p3308_p6 }
  0xc2   : > { %3318 = shalt.err (!%p3315_p2)
}
  0xc3   : > { %s4086_s15 = scalar_lea.sflag [#allocation6], %s3641_s13  ;;  %s388_s11 = scalar_lea.vmem [#allocation10], %s3602_s24 }
  0xc4   : > { %2977 = dma.hbm_to_vmem [thread:$0]  (!%p4085_p4), %s3757_s1, 576, %s3789_s17, %s4086_s15, %s4077_s10, %s4077_s10, %s4076_s14  }
  0xc5   : > { %s395_s6 = sshll.u32 %s388_s11, 4  ;;  %s3319_s18 = scalar_lea.hbm %s3795_s30, 576  ;;  %s3824_s6 = int_to_ptr.vmem [resolvable:$true] %s395_s6 }
  0xc6   : > { %p3320_p3 = scmp.ne.s32.totalorder %s3795_s30, %s3319_s18  ;;  %s3324_s20 = scalar_lea.hbm %s4024_s4, 1152 }
  0xc7   : > { %p3325_p10 = scmp.lt.u32.totalorder %s3795_s30, %s4024_s4  ;;  %p3326_p0 = scmp.lt.u32.totalorder %s3324_s20, %s3319_s18 }
  0xc8   : > { %p3322_p8 = pnand %p3320_p3, %p4084_p12  ;;  %p3328_p1 = scmp.lt.u32.totalorder %s3319_s18, %s3795_s30 }
  0xc9   : > { %p3327_p11 = por %p3326_p0, %p3325_p10 }
  0xca   : > { %p3323_p9 = pneg %p3322_p8 }
  0xcb   : > { %p3329_p6 = por %p3328_p1, %p3327_p11 }
  0xcd   : > { %p3330_p5 = pnand %p3329_p6, %p3323_p9 }
  0xcf   : > { %3333 = shalt.err (!%p3330_p5)
}
  0xd0   : > { %s3334_s1 = scalar_lea.vmem %s3824_s6, 576  ;;  %s3475_s17 = smov [#allocation10]  }
  0xd1   : > { %p3335_p13 = scmp.ne.s32.totalorder %s3824_s6, %s3334_s1  ;;  %s3339_s21 = sshll.u32 %s3475_s17, 4  ;;  %s3340_s21 = int_to_ptr.vmem [resolvable:$false] %s3339_s21 }
  0xd2   : > { %s3341_s0 = scalar_lea.vmem %s3340_s21, 1152  ;;  %p3342_p3 = scmp.lt.s32.totalorder %s3824_s6, %s3340_s21 }
  0xd3   : > { %p3337_p7 = pnand %p3335_p13, %p4084_p12  ;;  %p3343_p8 = scmp.lt.s32.totalorder %s3341_s0, %s3334_s1 }
  0xd5   : > { %p3338_p2 = pneg %p3337_p7  ;;  %p3344_p10 = por %p3343_p8, %p3342_p3 }
  0xd7   : > { %p3345_p0 = pnand %p3344_p10, %p3338_p2 }
  0xd9   : > { %3348 = shalt.err (!%p3345_p0)
}
  0xda   : > { %s4087_s15 = scalar_lea.sflag [#allocation9], %s3641_s13  ;;  %s3856_s26 = scalar_lea.hbm %s4025_s5, %s3638_s12 }
  0xdb   : > { %2983 = dma.hbm_to_vmem [thread:$0]  (!%p4085_p4), %s3795_s30, 576, %s3824_s6, %s4087_s15, %s4077_s10, %s4077_s10, %s4076_s14  }
  0xdc   : > { %s409_s8 = scalar_lea.vmem [#allocation11], %s3602_s24  ;;  %s406_s22 = scalar_lea.sflag [#allocation12], %s3641_s13 }
  0xdd   : > { %s416_s20 = sshll.u32 %s409_s8, 4  ;;  %s3349_s27 = scalar_lea.hbm %s3856_s26, 576  ;;  %s3859_s20 = int_to_ptr.vmem [resolvable:$true] %s416_s20 }
  0xde   : > { %p3350_p9 = scmp.ne.s32.totalorder %s3856_s26, %s3349_s27  ;;  %s3354_s1 = scalar_lea.hbm %s4025_s5, 1152 }
  0xdf   : > { %p3355_p6 = scmp.lt.u32.totalorder %s3856_s26, %s4025_s5  ;;  %p3356_p5 = scmp.lt.u32.totalorder %s3354_s1, %s3349_s27 }
  0xe0   : > { %p3352_p11 = pnand %p3350_p9, %p4084_p12  ;;  %p3358_p7 = scmp.lt.u32.totalorder %s3349_s27, %s3856_s26 }
  0xe1   : > { %p3357_p13 = por %p3356_p5, %p3355_p6 }
  0xe2   : > { %p3353_p1 = pneg %p3352_p11 }
  0xe3   : > { %p3359_p2 = por %p3358_p7, %p3357_p13 }
  0xe5   : > { %p3360_p3 = pnand %p3359_p2, %p3353_p1 }
  0xe7   : > { %3363 = shalt.err (!%p3360_p3)
}
  0xe8   : > { %s3364_s24 = scalar_lea.vmem %s3859_s20, 576  ;;  %s3476_s21 = smov [#allocation11]  }
  0xe9   : > { %p3365_p8 = scmp.ne.s32.totalorder %s3859_s20, %s3364_s24  ;;  %s3369_s0 = sshll.u32 %s3476_s21, 4  ;;  %s3370_s0 = int_to_ptr.vmem [resolvable:$false] %s3369_s0 }
  0xea   : > { %s3371_s15 = scalar_lea.vmem %s3370_s0, 1152  ;;  %p3372_p9 = scmp.lt.s32.totalorder %s3859_s20, %s3370_s0 }
  0xeb   : > { %p3367_p10 = pnand %p3365_p8, %p4084_p12  ;;  %p3373_p11 = scmp.lt.s32.totalorder %s3371_s15, %s3364_s24 }
  0xed   : > { %p3368_p0 = pneg %p3367_p10  ;;  %p3374_p6 = por %p3373_p11, %p3372_p9 }
  0xef   : > { %p3375_p5 = pnand %p3374_p6, %p3368_p0 }
  0xf1   : > { %3378 = shalt.err (!%p3375_p5)
}
  0xf2   : > { %2986 = dma.hbm_to_vmem [thread:$0]  (!%p4085_p4), %s3856_s26, 576, %s3859_s20, %s406_s22, %s4077_s10, %s4077_s10, %s4076_s14  }
  0xf3   : > { %p4088_p12 = scmp.ne.s32.totalorder %s4068_s19, 0 }
  0xf4   : > { %s3891_s25 = sand.u32 (!%p4088_p12), 1, %s3457_s28   ;;  %p4089_p1 = scmp.ne.s32.totalorder (!%p4088_p12), %s4063_s16, 0 }
  0xf5   : > { %428 = sbr.rel (%p4088_p12) target bundleno = 672 (0x2a0), region = 52  ;;  %s431_s18 = scalar_lea.sflag (!%p4088_p12), [#allocation3], %s3891_s25 }
  0xf6   : > { %s2938_s11 = smul.u32 (!%p4088_p12), 36, %s3891_s25 }
  0xf8   : > { %s3895_s23 = scalar_lea.vmem (!%p4088_p12), [#allocation2], %s2938_s11 }
  0xfc   : > { %3424 = dma.done.wait (%p4089_p1), %s431_s18, 576  }
  0xfd   : > { %3426 = vsyncadd (%p4089_p1), %s431_s18, 4294966720  ;;  %s439_s13 = sand.u32 1, %s3546_s9   ;;  %s3902_s14 = scalar_lea.vmem [#allocation5], %s2938_s11 }
  0xfe   : > { %s440_s19 = scalar_lea.sflag [#allocation6], %s439_s13 }
  0xff   : > { %3428 = dma.done.wait (%p4089_p1), %s440_s19, 1152  }
 0x100   : > { %3430 = vsyncadd (%p4089_p1), %s440_s19, 4294966144  ;;  %s3908_s10 = scalar_lea.vmem [#allocation7], %s2938_s11  ;;  %s458_s26 = scalar_lea.sflag [#allocation9], %s439_s13 }
 0x101   : > { %s3910_s8 = scalar_lea.vmem [#allocation8], %s2938_s11 }
 0x102   : > { %3432 = dma.done.wait (%p4089_p1), %s458_s26, 1152  }
 0x103   : > { %3434 = vsyncadd (%p4089_p1), %s458_s26, 4294966144  ;;  %s3916_s20 = scalar_lea.vmem [#allocation10], %s2938_s11  ;;  %s476_s22 = scalar_lea.sflag [#allocation12], %s439_s13 }
 0x104   : > { %s3918_s27 = scalar_lea.vmem [#allocation11], %s2938_s11 }
 0x105   : > { %3436 = dma.done.wait (%p4089_p1), %s476_s22, 576  }
 0x106   : > { %3438 = vsyncadd (%p4089_p1), %s476_s22, 4294966720  ;;  %p4090_p4 = scmp.eq.s32.totalorder %s3546_s9, 0 }
 0x108   : > { %3440 = dma.done.wait (%p4090_p4), [#allocation12], 9216   ;;  %p4091_p13 = pmov %p4090_p4 }
 0x109   : > { %p4092_p7 = pmov %p4090_p4 }
 0x10a   : > { %3442 = vsyncadd (%p4091_p13), [#allocation12], 4294958080 }
 0x10b   : > { %3444 = dma.done.wait (%p4092_p7), [#allocation15], 16   ;;  %p4093_p2 = pmov %p4090_p4 }
 0x10c   : > { %v3035_v0 = vld [vmem:[#allocation13 + $0x40] sm:$0xff]   ;;  %v3037_v2 = vld [vmem:[#allocation13 + $0x48] sm:$0xff]   ;;  %v3039_v4 = vld [vmem:[#allocation13 + $0x50] sm:$0xff]   ;;  %s2367_s16 = sshll.u32 %s3891_s25, 5  ;;  %s2498_s30 = sshll.u32 %s3546_s9, 9 }
 0x10d   : > { %3446 = vsyncadd (%p4093_p2), [#allocation15], 4294967280  ;;  %v3036_v1 = vld [vmem:[#allocation13 + $0x100] sm:$0xff]   ;;  %2630 = vmatprep.subr.bf16.mxu1 %v3035_v0  ;;  %v3038_v3 = vld [vmem:[#allocation13 + $0x108] sm:$0xff]   ;;  %s544_s6 = scalar_lea.vmem [#allocation16], %s2367_s16  ;;  %s4094_s12 = sld [smem:[#allocation28_spill]] }
 0x10e   : > { %2726 = vmatprep.subr.bf16.mxu0 %v3036_v1  ;;  %2631 = vmatpush3.bf16.msra.mxu1 %v3035_v0  ;;  %v3040_v5 = vld [vmem:[#allocation13 + $0x110] sm:$0xff]   ;;  %v3041_v6 = vld [vmem:[#allocation13 + $0x58] sm:$0xff]   ;;  %v3043_v8 = vld [vmem:[#allocation13 + $0x60] sm:$0xff]   ;;  %s2152_s1 = sshll.u32 %s544_s6, 4  ;;  %s4095_s21 = sld [smem:[#allocation33_spill]]  ;;  %s3976_s1 = int_to_ptr.vmem [resolvable:$true] %s2152_s1 }
 0x10f   : > { %2727 = vmatpush3.bf16.msra.mxu0 %v3036_v1  ;;  %2632 = vmatprep.subr.bf16.mxu1 %v3037_v2  ;;  %v3042_v7 = vld [vmem:[#allocation13 + $0x118] sm:$0xff]   ;;  %v3044_v9 = vld [vmem:[#allocation13 + $0x120] sm:$0xff]   ;;  %v3045_v10 = vld [vmem:[#allocation13 + $0x68] sm:$0xff]   ;;  %s2139_s9 = scalar_lea.sflag [#allocation4], %s3891_s25  ;;  %s3379_s15 = scalar_lea.vmem %s3976_s1, 512 }
 0x110   : > { %2728 = vmatprep.subr.bf16.mxu0 %v3038_v3  ;;  %v3051_v11 = vld [vmem:[%s3902_s14] sm:$0xff]   ;;  %v3046_v12 = vld [vmem:[#allocation13 + $0x128] sm:$0xff]   ;;  %v3053_v13 = vld [vmem:[%s3916_s20] sm:$0xff]   ;;  %p3380_p3 = scmp.ne.s32.totalorder %s3976_s1, %s3379_s15  ;;  %s3477_s11 = smov [#allocation16]  }
 0x111   : > { %2646 = vmatprep.mubr.bf16.mxu1 %v3051_v11  ;;  %v3047_v14 = vld [vmem:[#allocation13 + $0x70] sm:$0xff]   ;;  %2742 = vmatprep.mubr.bf16.mxu0 %v3053_v13  ;;  %v3049_v16 = vld [vmem:[#allocation13 + $0x78] sm:$0xff]   ;;  %v3052_v18 = vld [vmem:[#allocation13] sm:$0xff]   ;;  %s3383_s18 = sshll.u32 %s3477_s11, 4  ;;  %s3384_s18 = int_to_ptr.vmem [resolvable:$false] %s3383_s18 }
 0x112   : > { %2633 = vmatpush3.bf16.msra.mxu1 %v3037_v2  ;;  %v3048_v15 = vld [vmem:[#allocation13 + $0x130] sm:$0xff]   ;;  %v3050_v17 = vld [vmem:[#allocation13 + $0x138] sm:$0xff]   ;;  %v3054_v19 = vld [vmem:[#allocation13 + $0x140] sm:$0xff]   ;;  %p3386_p9 = scmp.lt.s32.totalorder %s3976_s1, %s3384_s18 }
 0x113   : > { %2729 = vmatpush3.bf16.msra.mxu0 %v3038_v3  ;;  %2634 = vmatprep.subr.bf16.mxu1 %v3039_v4  ;;  %v3055_v20 = vld [vmem:[%s3902_s14 + $0x8] sm:$0xff]   ;;  %v3056_v21 = vld [vmem:[%s3916_s20 + $0x8] sm:$0xff]   ;;  %v3067_v24 = vld [vmem:[%s3902_s14 + $0x10] sm:$0xff]   ;;  %p4096_p8 = scmp.ne.s32.totalorder %s4094_s12, 0 }
 0x114   : > { %2730 = vmatprep.subr.bf16.mxu0 %v3040_v5  ;;  %v3057_v22 = vld [vmem:[#allocation13 + $0x8] sm:$0xff]   ;;  %v3059_v26 = vld [vmem:[#allocation13 + $0x10] sm:$0xff]   ;;  %v3061_v28 = vld [vmem:[#allocation13 + $0x18] sm:$0xff]   ;;  %s3974_s0 = scalar_lea.hbm %s4095_s21, %s2498_s30 }
 0x115   : > { %v3058_v23 = vld [vmem:[#allocation13 + $0x148] sm:$0xff]   ;;  %v3060_v27 = vld [vmem:[#allocation13 + $0x150] sm:$0xff]   ;;  %v3062_v31 = vld [vmem:[#allocation13 + $0x158] sm:$0xff]   ;;  %p3381_p10 = pnand %p3380_p3, %p4096_p8 }
 0x116   : > { %2635 = vmatpush3.bf16.msra.mxu1 %v3039_v4  ;;  %v3069_v25 = vld [vmem:[%s3916_s20 + $0x10] sm:$0xff]   ;;  %v3071_v29 = vld [vmem:[%s3902_s14 + $0x18] sm:$0xff]   ;;  %v3072_v30 = vld [vmem:[%s3916_s20 + $0x18] sm:$0xff]  }
 0x117   : > { %2731 = vmatpush3.bf16.msra.mxu0 %v3040_v5  ;;  %2636 = vmatprep.subr.bf16.mxu1 %v3041_v6  ;;  %v3075_v32 = vld [vmem:[%s3895_s23] sm:$0xff]   ;;  %v3077_v33 = vld [vmem:[%s3918_s27] sm:$0xff]   ;;  %v3065_v36 = vld [vmem:[#allocation13 + $0x28] sm:$0xff]   ;;  %p3382_p0 = pneg %p3381_p10 }
 0x118   : > { %2732 = vmatprep.subr.bf16.mxu0 %v3042_v7  ;;  %v3063_v34 = vld [vmem:[#allocation13 + $0x20] sm:$0xff]   ;;  %v3066_v37 = vld [vmem:[#allocation13 + $0x168] sm:$0xff]   ;;  %v3068_v38 = vld [vmem:[#allocation13 + $0x30] sm:$0xff]  }
 0x119   : > { %v3064_v35 = vld [vmem:[#allocation13 + $0x160] sm:$0xff]   ;;  %v3070_v39 = vld [vmem:[#allocation13 + $0x170] sm:$0xff]   ;;  %v3073_v40 = vld [vmem:[#allocation13 + $0x38] sm:$0xff]  }
 0x11a   : > { %2637 = vmatpush3.bf16.msra.mxu1 %v3041_v6  ;;  %v3074_v41 = vld [vmem:[#allocation13 + $0x178] sm:$0xff]   ;;  %v3076_v42 = vld [vmem:[#allocation13 + $0x80] sm:$0xff]   ;;  %v3081_v46 = vld [vmem:[#allocation13 + $0x88] sm:$0xff]  }
 0x11b   : > { %2733 = vmatpush3.bf16.msra.mxu0 %v3042_v7  ;;  %2638 = vmatprep.subr.bf16.mxu1 %v3043_v8  ;;  %v3078_v43 = vld [vmem:[#allocation13 + $0x180] sm:$0xff]   ;;  %v3082_v47 = vld [vmem:[#allocation13 + $0x188] sm:$0xff]   ;;  %v3083_v50 = vld [vmem:[#allocation13 + $0x90] sm:$0xff]  }
 0x11c   : > { %2734 = vmatprep.subr.bf16.mxu0 %v3044_v9  ;;  %v3079_v44 = vld [vmem:[%s3895_s23 + $0x8] sm:$0xff]   ;;  %v3080_v45 = vld [vmem:[%s3918_s27 + $0x8] sm:$0xff]   ;;  %v3093_v49 = vld [vmem:[%s3918_s27 + $0x10] sm:$0xff]  }
 0x11d   : > { %v3091_v48 = vld [vmem:[%s3895_s23 + $0x10] sm:$0xff]   ;;  %v3084_v51 = vld [vmem:[#allocation13 + $0x190] sm:$0xff]   ;;  %v3085_v52 = vld [vmem:[#allocation13 + $0x98] sm:$0xff]  }
 0x11e   : > { %2639 = vmatpush3.bf16.msra.mxu1 %v3043_v8  ;;  %v3095_v53 = vld [vmem:[%s3895_s23 + $0x18] sm:$0xff]   ;;  %v3096_v54 = vld [vmem:[%s3918_s27 + $0x18] sm:$0xff]   ;;  %v3099_v56 = vld [vmem:[%s3908_s10] sm:$0xff]  }
 0x11f   : > { %2735 = vmatpush3.bf16.msra.mxu0 %v3044_v9  ;;  %2640 = vmatprep.subr.bf16.mxu1 %v3045_v10  ;;  %v3086_v55 = vld [vmem:[#allocation13 + $0x198] sm:$0xff]   ;;  %v3087_v58 = vld [vmem:[#allocation13 + $0xa0] sm:$0xff]   ;;  %v3089_v60 = vld [vmem:[#allocation13 + $0xa8] sm:$0xff]  }
 0x120   : > { %2736 = vmatprep.subr.bf16.mxu0 %v3046_v12  ;;  %v3101_v57 = vld [vmem:[%s3895_s23 + $0x4] sm:$0xff]   ;;  %v3088_v59 = vld [vmem:[#allocation13 + $0x1a0] sm:$0xff]   ;;  %v3090_v61 = vld [vmem:[#allocation13 + $0x1a8] sm:$0xff]  }
 0x121   : > { %v3092_v62 = vld [vmem:[#allocation13 + $0xb0] sm:$0xff]   ;;  %v3097_v0 = vld [vmem:[#allocation13 + $0xb8] sm:$0xff]   ;;  %v3100_v2 = vld [vmem:[#allocation13 + $0xc0] sm:$0xff]  }
 0x122   : > { %2641 = vmatpush3.bf16.msra.mxu1 %v3045_v10  ;;  %v3094_v63 = vld [vmem:[#allocation13 + $0x1b0] sm:$0xff]   ;;  %v3098_v1 = vld [vmem:[#allocation13 + $0x1b8] sm:$0xff]   ;;  %v3102_v3 = vld [vmem:[#allocation13 + $0x1c0] sm:$0xff]  }
 0x123   : > { %2737 = vmatpush3.bf16.msra.mxu0 %v3046_v12  ;;  %2642 = vmatprep.subr.bf16.mxu1 %v3047_v14  ;;  %v3103_v4 = vld [vmem:[%s3908_s10 + $0x8] sm:$0xff]   ;;  %v3104_v5 = vld [vmem:[%s3895_s23 + $0xc] sm:$0xff]   ;;  %v3115_v8 = vld [vmem:[%s3908_s10 + $0x10] sm:$0xff]  }
 0x124   : > { %2738 = vmatprep.subr.bf16.mxu0 %v3048_v15  ;;  %v3105_v6 = vld [vmem:[#allocation13 + $0xc8] sm:$0xff]   ;;  %v3107_v10 = vld [vmem:[#allocation13 + $0xd0] sm:$0xff]   ;;  %v3109_v12 = vld [vmem:[#allocation13 + $0xd8] sm:$0xff]  }
 0x125   : > { %v3106_v7 = vld [vmem:[#allocation13 + $0x1c8] sm:$0xff]   ;;  %v3108_v11 = vld [vmem:[#allocation13 + $0x1d0] sm:$0xff]   ;;  %v3117_v13 = vld [vmem:[%s3908_s10 + $0x18] sm:$0xff]  }
 0x126   : > { %2643 = vmatpush3.bf16.msra.mxu1 %v3047_v14  ;;  %v3116_v9 = vld [vmem:[%s3895_s23 + $0x14] sm:$0xff]   ;;  %v3119_v14 = vld [vmem:[%s3895_s23 + $0x1c] sm:$0xff]   ;;  %s3385_s23 = scalar_lea.vmem %s3384_s18, 1024 }
 0x127   : > { %2739 = vmatpush3.bf16.msra.mxu0 %v3048_v15  ;;  %2644 = vmatprep.subr.bf16.mxu1 %v3049_v16  ;;  %v3110_v15 = vld [vmem:[#allocation13 + $0x1d8] sm:$0xff]   ;;  %p3387_p11 = scmp.lt.s32.totalorder %s3385_s23, %s3379_s15 }
 0x128   : > { %2740 = vmatprep.subr.bf16.mxu0 %v3050_v17 }
 0x129   : > { %p3388_p6 = por %p3387_p11, %p3386_p9 }
 0x12a   : > { %2645 = vmatpush3.bf16.msra.mxu1 %v3049_v16  ;;  %v3123_v16 = vld [vmem:[%s3910_s8] sm:$0xff]  }
 0x12b   : > { %2741 = vmatpush3.bf16.msra.mxu0 %v3050_v17  ;;  %2654 = vmatprep.subr.bf16.mxu1 %v3052_v18  ;;  %v3124_v17 = vld [vmem:[%s3902_s14 + $0x4] sm:$0xff]   ;;  %p3389_p5 = pnand %p3388_p6, %p3382_p0 }
 0x12c   : > { %2750 = vmatprep.subr.bf16.mxu0 %v3054_v19 }
 0x12d   : > { %2647 = vmatmul.mubr.bf16.vlgmr.msra.gmra.mrb[0].mxu1 %v3055_v20  ;;  %v3113_v20 = vld [vmem:[#allocation13 + $0xe8] sm:$0xff]  }
 0x12e   : > { %2655 = vmatpush3.bf16.msra.mxu1 %v3052_v18  ;;  %2743 = vmatmul.mubr.bf16.vlgmr.msra.gmra.mrb[0].mxu0 %v3056_v21  ;;  %v3111_v18 = vld [vmem:[#allocation13 + $0xe0] sm:$0xff]   ;;  %v3114_v21 = vld [vmem:[#allocation13 + $0x1e8] sm:$0xff]  }
 0x12f   : > { %2751 = vmatpush3.bf16.msra.mxu0 %v3054_v19  ;;  %2656 = vmatprep.subr.bf16.mxu1 %v3057_v22  ;;  %v3112_v19 = vld [vmem:[#allocation13 + $0x1e0] sm:$0xff]  }
 0x130   : > { %2752 = vmatprep.subr.bf16.mxu0 %v3058_v23  ;;  %2650 = vmatprep.mubr.bf16.mxu1 %v3067_v24  ;;  %v3121_v24 = vld [vmem:[#allocation13 + $0xf8] sm:$0xff]  }
 0x131   : > { %2746 = vmatprep.mubr.bf16.mxu0 %v3069_v25  ;;  %v3122_v25 = vld [vmem:[#allocation13 + $0x1f8] sm:$0xff]  }
 0x132   : > { %2657 = vmatpush3.bf16.msra.mxu1 %v3057_v22  ;;  %v3118_v22 = vld [vmem:[#allocation13 + $0xf0] sm:$0xff]  }
 0x133   : > { %2753 = vmatpush3.bf16.msra.mxu0 %v3058_v23  ;;  %2658 = vmatprep.subr.bf16.mxu1 %v3059_v26  ;;  %v3120_v23 = vld [vmem:[#allocation13 + $0x1f0] sm:$0xff]  }
 0x134   : > { %2754 = vmatprep.subr.bf16.mxu0 %v3060_v27 }
 0x135   : > { %2651 = vmatmul.mubr.bf16.gmra.mrb[4].mxu1 %v3071_v29  ;;  %v3128_v29 = vld [vmem:[#allocation13 + $0x208] sm:$0xff]  }
 0x136   : > { %2659 = vmatpush3.bf16.msra.mxu1 %v3059_v26  ;;  %2747 = vmatmul.mubr.bf16.gmra.mrb[4].mxu0 %v3072_v30  ;;  %v3127_v26 = vld [vmem:[#allocation13 + $0x200] sm:$0xff]  }
 0x137   : > { %2755 = vmatpush3.bf16.msra.mxu0 %v3060_v27  ;;  %2660 = vmatprep.subr.bf16.mxu1 %v3061_v28  ;;  %v3125_v27 = vld [vmem:[%s3910_s8 + $0x8] sm:$0xff]   ;;  %v3129_v30 = vld [vmem:[%s3910_s8 + $0x10] sm:$0xff]  }
 0x138   : > { %2756 = vmatprep.subr.bf16.mxu0 %v3062_v31  ;;  %2670 = vmatprep.mubr.bf16.mxu1 %v3075_v32  ;;  %v3133_v32 = vld [vmem:[#allocation13 + $0x210] sm:$0xff]  }
 0x139   : > { %2766 = vmatprep.mubr.bf16.mxu0 %v3077_v33  ;;  %v3131_v33 = vld [vmem:[%s3910_s8 + $0x18] sm:$0xff]  }
 0x13a   : > { %2661 = vmatpush3.bf16.msra.mxu1 %v3061_v28  ;;  %v3126_v28 = vld [vmem:[%s3902_s14 + $0xc] sm:$0xff]  }
 0x13b   : > { %2757 = vmatpush3.bf16.msra.mxu0 %v3062_v31  ;;  %2662 = vmatprep.subr.bf16.mxu1 %v3063_v34  ;;  %v3130_v31 = vld [vmem:[%s3902_s14 + $0x14] sm:$0xff]  }
 0x13c   : > { %2758 = vmatprep.subr.bf16.mxu0 %v3064_v35 }
 0x13e   : > { %2663 = vmatpush3.bf16.msra.mxu1 %v3063_v34  ;;  %v3132_v34 = vld [vmem:[%s3902_s14 + $0x1c] sm:$0xff]  }
 0x13f   : > { %2759 = vmatpush3.bf16.msra.mxu0 %v3064_v35  ;;  %2664 = vmatprep.subr.bf16.mxu1 %v3065_v36  ;;  %v3134_v35 = vld [vmem:[#allocation13 + $0x218] sm:$0xff]  }
 0x140   : > { %2760 = vmatprep.subr.bf16.mxu0 %v3066_v37 }
 0x142   : > { %2665 = vmatpush3.bf16.msra.mxu1 %v3065_v36  ;;  %v3139_v36 = vld [vmem:[%s3908_s10 + $0x4] sm:$0xff]  }
 0x143   : > { %2761 = vmatpush3.bf16.msra.mxu0 %v3066_v37  ;;  %2666 = vmatprep.subr.bf16.mxu1 %v3068_v38  ;;  %v3140_v37 = vld [vmem:[%s3908_s10 + $0x14] sm:$0xff]  }
 0x144   : > { %2762 = vmatprep.subr.bf16.mxu0 %v3070_v39 }
 0x146   : > { %2667 = vmatpush3.bf16.msra.mxu1 %v3068_v38  ;;  %v3135_v38 = vld [vmem:[#allocation13 + $0x220] sm:$0xff]  }
 0x147   : > { %2763 = vmatpush3.bf16.msra.mxu0 %v3070_v39  ;;  %2668 = vmatprep.subr.bf16.mxu1 %v3073_v40  ;;  %v3136_v39 = vld [vmem:[#allocation13 + $0x228] sm:$0xff]  }
 0x148   : > { %2764 = vmatprep.subr.bf16.mxu0 %v3074_v41 }
 0x14a   : > { %2669 = vmatpush3.bf16.msra.mxu1 %v3073_v40  ;;  %v3137_v40 = vld [vmem:[#allocation13 + $0x230] sm:$0xff]  }
 0x14b   : > { %2765 = vmatpush3.bf16.msra.mxu0 %v3074_v41  ;;  %2678 = vmatprep.subr.bf16.mxu1 %v3076_v42  ;;  %v3138_v41 = vld [vmem:[#allocation13 + $0x238] sm:$0xff]  }
 0x14c   : > { %2774 = vmatprep.subr.bf16.mxu0 %v3078_v43 }
 0x14d   : > { %2671 = vmatmul.mubr.bf16.vlgmr.msra.gmra.mrb[0].mxu1 %v3079_v44 }
 0x14e   : > { %2679 = vmatpush3.bf16.msra.mxu1 %v3076_v42  ;;  %2767 = vmatmul.mubr.bf16.vlgmr.msra.gmra.mrb[0].mxu0 %v3080_v45  ;;  %v3142_v42 = vld [vmem:[%s3908_s10 + $0x1c] sm:$0xff]  }
 0x14f   : > { %2775 = vmatpush3.bf16.msra.mxu0 %v3078_v43  ;;  %2680 = vmatprep.subr.bf16.mxu1 %v3081_v46  ;;  %v3141_v43 = vld [vmem:[%s3908_s10 + $0xc] sm:$0xff]  }
 0x150   : > { %2776 = vmatprep.subr.bf16.mxu0 %v3082_v47  ;;  %2674 = vmatprep.mubr.bf16.mxu1 %v3091_v48 }
 0x151   : > { %2770 = vmatprep.mubr.bf16.mxu0 %v3093_v49 }
 0x152   : > { %2681 = vmatpush3.bf16.msra.mxu1 %v3081_v46 }
 0x153   : > { %2777 = vmatpush3.bf16.msra.mxu0 %v3082_v47  ;;  %2682 = vmatprep.subr.bf16.mxu1 %v3083_v50 }
 0x154   : > { %2778 = vmatprep.subr.bf16.mxu0 %v3084_v51 }
 0x155   : > { %2675 = vmatmul.mubr.bf16.gmra.mrb[4].mxu1 %v3095_v53 }
 0x156   : > { %2683 = vmatpush3.bf16.msra.mxu1 %v3083_v50  ;;  %2771 = vmatmul.mubr.bf16.gmra.mrb[4].mxu0 %v3096_v54 }
 0x157   : > { %2779 = vmatpush3.bf16.msra.mxu0 %v3084_v51  ;;  %2684 = vmatprep.subr.bf16.mxu1 %v3085_v52 }
 0x158   : > { %2780 = vmatprep.subr.bf16.mxu0 %v3086_v55  ;;  %2694 = vmatprep.mubr.bf16.mxu1 %v3099_v56 }
 0x159   : > { %2790 = vmatprep.mubr.bf16.mxu0 %v3101_v57 }
 0x15a   : > { %2685 = vmatpush3.bf16.msra.mxu1 %v3085_v52 }
 0x15b   : > { %2781 = vmatpush3.bf16.msra.mxu0 %v3086_v55  ;;  %2686 = vmatprep.subr.bf16.mxu1 %v3087_v58 }
 0x15c   : > { %2782 = vmatprep.subr.bf16.mxu0 %v3088_v59 }
 0x15e   : > { %2687 = vmatpush3.bf16.msra.mxu1 %v3087_v58 }
 0x15f   : > { %2783 = vmatpush3.bf16.msra.mxu0 %v3088_v59  ;;  %2688 = vmatprep.subr.bf16.mxu1 %v3089_v60 }
 0x160   : > { %2784 = vmatprep.subr.bf16.mxu0 %v3090_v61 }
 0x162   : > { %2689 = vmatpush3.bf16.msra.mxu1 %v3089_v60  ;;  %v2476_v60 = vld [vmem:[#allocation14] ss:$0 sm:$0xff] }
 0x163   : > { %2785 = vmatpush3.bf16.msra.mxu0 %v3090_v61  ;;  %2690 = vmatprep.subr.bf16.mxu1 %v3092_v62 }
 0x164   : > { %2786 = vmatprep.subr.bf16.mxu0 %v3094_v63 }
 0x166   : > { %2691 = vmatpush3.bf16.msra.mxu1 %v3092_v62 }
 0x167   : > { %2787 = vmatpush3.bf16.msra.mxu0 %v3094_v63  ;;  %2692 = vmatprep.subr.bf16.mxu1 %v3097_v0 }
 0x168   : > { %2788 = vmatprep.subr.bf16.mxu0 %v3098_v1 }
 0x16a   : > { %2693 = vmatpush3.bf16.msra.mxu1 %v3097_v0 }
 0x16b   : > { %2789 = vmatpush3.bf16.msra.mxu0 %v3098_v1  ;;  %2702 = vmatprep.subr.bf16.mxu1 %v3100_v2 }
 0x16c   : > { %2798 = vmatprep.subr.bf16.mxu0 %v3102_v3 }
 0x16d   : > { %2695 = vmatmul.mubr.bf16.vlgmr.msra.gmra.mrb[0].mxu1 %v3103_v4 }
 0x16e   : > { %2703 = vmatpush3.bf16.msra.mxu1 %v3100_v2  ;;  %2791 = vmatmul.mubr.bf16.vlgmr.msra.gmra.mrb[0].mxu0 %v3104_v5 }
 0x16f   : > { %2799 = vmatpush3.bf16.msra.mxu0 %v3102_v3  ;;  %2704 = vmatprep.subr.bf16.mxu1 %v3105_v6 }
 0x170   : > { %2800 = vmatprep.subr.bf16.mxu0 %v3106_v7  ;;  %2698 = vmatprep.mubr.bf16.mxu1 %v3115_v8 }
 0x171   : > { %2794 = vmatprep.mubr.bf16.mxu0 %v3116_v9 }
 0x172   : > { %2705 = vmatpush3.bf16.msra.mxu1 %v3105_v6 }
 0x173   : > { %2801 = vmatpush3.bf16.msra.mxu0 %v3106_v7  ;;  %2706 = vmatprep.subr.bf16.mxu1 %v3107_v10 }
 0x174   : > { %2802 = vmatprep.subr.bf16.mxu0 %v3108_v11 }
 0x175   : > { %2699 = vmatmul.mubr.bf16.gmra.mrb[4].mxu1 %v3117_v13 }
 0x176   : > { %2707 = vmatpush3.bf16.msra.mxu1 %v3107_v10  ;;  %2795 = vmatmul.mubr.bf16.gmra.mrb[4].mxu0 %v3119_v14 }
 0x177   : > { %2803 = vmatpush3.bf16.msra.mxu0 %v3108_v11  ;;  %2708 = vmatprep.subr.bf16.mxu1 %v3109_v12 }
 0x178   : > { %2804 = vmatprep.subr.bf16.mxu0 %v3110_v15  ;;  %2718 = vmatprep.mubr.bf16.mxu1 %v3123_v16 }
 0x179   : > { %2814 = vmatprep.mubr.bf16.mxu0 %v3124_v17 }
 0x17a   : > { %2709 = vmatpush3.bf16.msra.mxu1 %v3109_v12 }
 0x17b   : > { %2805 = vmatpush3.bf16.msra.mxu0 %v3110_v15  ;;  %2710 = vmatprep.subr.bf16.mxu1 %v3111_v18 }
 0x17c   : > { %2806 = vmatprep.subr.bf16.mxu0 %v3112_v19 }
 0x17e   : > { %2711 = vmatpush3.bf16.msra.mxu1 %v3111_v18 }
 0x17f   : > { %2807 = vmatpush3.bf16.msra.mxu0 %v3112_v19  ;;  %2712 = vmatprep.subr.bf16.mxu1 %v3113_v20 }
 0x180   : > { %2808 = vmatprep.subr.bf16.mxu0 %v3114_v21 }
 0x182   : > { %2713 = vmatpush3.bf16.msra.mxu1 %v3113_v20 }
 0x183   : > { %2809 = vmatpush3.bf16.msra.mxu0 %v3114_v21  ;;  %2714 = vmatprep.subr.bf16.mxu1 %v3118_v22 }
 0x184   : > { %2810 = vmatprep.subr.bf16.mxu0 %v3120_v23 }
 0x186   : > { %2715 = vmatpush3.bf16.msra.mxu1 %v3118_v22 }
 0x187   : > { %2811 = vmatpush3.bf16.msra.mxu0 %v3120_v23  ;;  %2716 = vmatprep.subr.bf16.mxu1 %v3121_v24 }
 0x188   : > { %2812 = vmatprep.subr.bf16.mxu0 %v3122_v25 }
 0x18a   : > { %2717 = vmatpush3.bf16.msra.mxu1 %v3121_v24 }
 0x18b   : > { %2813 = vmatpush3.bf16.msra.mxu0 %v3122_v25  ;;  %2846 = vmatprep.subr.bf16.mxu1 %v3127_v26 }
 0x18c   : > { %2822 = vmatprep.subr.bf16.mxu0 %v3127_v26 }
 0x18d   : > { %2719 = vmatmul.mubr.bf16.vlgmr.msra.gmra.mrb[0].mxu1 %v3125_v27 }
 0x18e   : > { %2815 = vmatmul.mubr.bf16.vlgmr.msra.gmra.mrb[0].mxu0 %v3126_v28  ;;  %2854 = vmatpush3.bf16.msra.mxu1 %v3127_v26 }
 0x18f   : > { %2823 = vmatpush3.bf16.msra.mxu0 %v3127_v26  ;;  %2847 = vmatprep.subr.bf16.mxu1 %v3128_v29 }
 0x190   : > { %2824 = vmatprep.subr.bf16.mxu0 %v3128_v29  ;;  %2722 = vmatprep.mubr.bf16.mxu1 %v3129_v30 }
 0x191   : > { %2818 = vmatprep.mubr.bf16.mxu0 %v3130_v31 }
 0x192   : > { %2855 = vmatpush3.bf16.msra.mxu1 %v3128_v29 }
 0x193   : > { %2825 = vmatpush3.bf16.msra.mxu0 %v3128_v29  ;;  %2848 = vmatprep.subr.bf16.mxu1 %v3133_v32 }
 0x194   : > { %2826 = vmatprep.subr.bf16.mxu0 %v3133_v32 }
 0x195   : > { %2723 = vmatmul.mubr.bf16.gmra.mrb[4].mxu1 %v3131_v33 }
 0x196   : > { %2819 = vmatmul.mubr.bf16.gmra.mrb[4].mxu0 %v3132_v34  ;;  %2856 = vmatpush3.bf16.msra.mxu1 %v3133_v32 }
 0x197   : > { %2827 = vmatpush3.bf16.msra.mxu0 %v3133_v32  ;;  %2849 = vmatprep.subr.bf16.mxu1 %v3134_v35 }
 0x198   : > { %2828 = vmatprep.subr.bf16.mxu0 %v3134_v35  ;;  %2838 = vmatprep.mubr.bf16.mxu0 %v3139_v36 }
 0x199   : > { %2842 = vmatprep.mubr.bf16.mxu1 %v3140_v37 }
 0x19a   : > { %2857 = vmatpush3.bf16.msra.mxu1 %v3134_v35 }
 0x19b   : > { %2829 = vmatpush3.bf16.msra.mxu0 %v3134_v35  ;;  %2850 = vmatprep.subr.bf16.mxu1 %v3135_v38 }
 0x19c   : > { %2830 = vmatprep.subr.bf16.mxu0 %v3135_v38 }
 0x19e   : > { %2858 = vmatpush3.bf16.msra.mxu1 %v3135_v38 }
 0x19f   : > { %2831 = vmatpush3.bf16.msra.mxu0 %v3135_v38  ;;  %2851 = vmatprep.subr.bf16.mxu1 %v3136_v39 }
 0x1a0   : > { %2832 = vmatprep.subr.bf16.mxu0 %v3136_v39 }
 0x1a2   : > { %2859 = vmatpush3.bf16.msra.mxu1 %v3136_v39 }
 0x1a3   : > { %2833 = vmatpush3.bf16.msra.mxu0 %v3136_v39  ;;  %2852 = vmatprep.subr.bf16.mxu1 %v3137_v40 }
 0x1a4   : > { %2834 = vmatprep.subr.bf16.mxu0 %v3137_v40 }
 0x1a6   : > { %2860 = vmatpush3.bf16.msra.mxu1 %v3137_v40 }
 0x1a7   : > { %2835 = vmatpush3.bf16.msra.mxu0 %v3137_v40  ;;  %2853 = vmatprep.subr.bf16.mxu1 %v3138_v41 }
 0x1a8   : > { %2836 = vmatprep.subr.bf16.mxu0 %v3138_v41 }
 0x1aa   : > { %2861 = vmatpush3.bf16.msra.mxu1 %v3138_v41 }
 0x1ab   : > { %2837 = vmatpush3.bf16.msra.mxu0 %v3138_v41 }
 0x1ad   : > { %2843 = vmatmul.mubr.bf16.vlgmr.msra.gmra.mrb[8].mxu1 %v3142_v42 }
 0x1ae   : > { %2839 = vmatmul.mubr.bf16.vlgmr.msra.gmra.mrb[0].mxu0 %v3141_v43 }
 0x260   : > { %v2720_v44 = vpop.f32.mrb[0].mxu1 }
 0x261   : > { %v1170_v45 = vpop.f32.mrb[1].mxu1 }
 0x262   : > { %v2721_v46 = vpop.f32.mrb[2].mxu1 }
 0x263   : > { %v1173_v47 = vpop.f32.mrb[3].mxu1 }
 0x268   : > { %v2724_v48 = vpop.f32.mrb[4].mxu1 }
 0x269   : > { %v2820_v49 = vpop.f32.mrb[4].mxu0  ;;  %v1186_v50 = vpop.f32.mrb[5].mxu1 }
 0x26a   : > { %v2866_v51 = vadd.f32 %v2820_v49, %v2724_v48  ;;  %v1866_v52 = vpop.f32.mrb[5].mxu0  ;;  %v2725_v53 = vpop.f32.mrb[6].mxu1 }
 0x26b   : > { %v2868_v54 = vadd.f32 %v1866_v52, %v1186_v50  ;;  %v2821_v55 = vpop.f32.mrb[6].mxu0  ;;  %v1189_v56 = vpop.f32.mrb[7].mxu1 }
 0x26c   : > { %v2870_v57 = vadd.f32 %v2821_v55, %v2725_v53  ;;  %v1869_v58 = vpop.f32.mrb[7].mxu0 }
 0x26d   : > { %v2872_v59 = vadd.f32 %v1869_v58, %v1189_v56 }
 0x280   : > { %v2844_v61 = vpop.f32.mrb[8].mxu1 }
 0x281   : > { %v2840_v62 = vpop.f32.mrb[0].mxu0  ;;  %v2867_v63 = vadd.f32 %v2866_v51, %v2844_v61  ;;  %v2036_v0 = vpop.f32.mrb[9].mxu1 }
 0x282   : > { %v2862_v1 = vadd.f32 %v2840_v62, %v2720_v44  ;;  %v2020_v2 = vpop.f32.mrb[1].mxu0  ;;  %v2869_v3 = vadd.f32 %v2868_v54, %v2036_v0  ;;  %v2845_v4 = vpop.f32.mrb[10].mxu1 }
 0x283   : > { %v2072_v5 = vadd.f32 %v2867_v63, %v2476_v60  ;;  %v2863_v6 = vadd.f32 %v2020_v2, %v1170_v45  ;;  %v2841_v7 = vpop.f32.mrb[2].mxu0  ;;  %v2871_v8 = vadd.f32 %v2870_v57, %v2845_v4  ;;  %v2039_v9 = vpop.f32.mrb[11].mxu1 }
 0x284   : > { %v2068_v10 = vadd.f32 %v2862_v1, %v2476_v60  ;;  %v2070_v11 = vadd.f32 %v2869_v3, %v2476_v60  ;;  %v2864_v12 = vadd.f32 %v2841_v7, %v2721_v46  ;;  %v2023_v13 = vpop.f32.mrb[3].mxu0  ;;  %v2873_v14 = vadd.f32 %v2872_v59, %v2039_v9 }
 0x285   : > { %v2073_v15 = vadd.f32 %v2871_v8, %v2476_v60  ;;  %v2088_v16 = vmul.f32 0.01, %v2072_v5  ;;  %v2066_v17 = vadd.f32 %v2863_v6, %v2476_v60  ;;  %vm2080_vm0 = vcmp.ge.f32.partialorder %v2072_v5, 0.0 }
 0x286   : > { %v2084_v18 = vmul.f32 0.01, %v2068_v10  ;;  %v2069_v19 = vadd.f32 %v2864_v12, %v2476_v60  ;;  %vm2076_vm1 = vcmp.ge.f32.partialorder %v2068_v10, 0.0  ;;  %vm2078_vm2 = vcmp.ge.f32.partialorder %v2070_v11, 0.0 }
 0x287   : > { %vm2081_vm3 = vcmp.ge.f32.partialorder %v2073_v15, 0.0  ;;  %v2089_v20 = vmul.f32 0.01, %v2073_v15  ;;  %v2086_v21 = vmul.f32 0.01, %v2070_v11  ;;  %v2865_v23 = vadd.f32 %v2023_v13, %v1173_v47 }
 0x288   : > { %vm2077_vm4 = vcmp.ge.f32.partialorder %v2069_v19, 0.0  ;;  %v2085_v22 = vmul.f32 0.01, %v2069_v19  ;;  %v2096_v24 = vsel %vm2080_vm0, %v2072_v5, %v2088_v16  ;;  %v2082_v25 = vmul.f32 0.01, %v2066_v17 }
 0x289   : > { %v2097_v26 = vsel %vm2081_vm3, %v2073_v15, %v2089_v20  ;;  %v2071_v27 = vadd.f32 %v2873_v14, %v2476_v60  ;;  %v2092_v28 = vsel %vm2076_vm1, %v2068_v10, %v2084_v18  ;;  %v2067_v31 = vadd.f32 %v2865_v23, %v2476_v60 }
 0x28a   : > { %v2093_v29 = vsel %vm2077_vm4, %v2069_v19, %v2085_v22  ;;  %v2517_v30 = vpack.c.bf16 %v2097_v26, %v2096_v24  ;;  %vm2074_vm5 = vcmp.ge.f32.partialorder %v2066_v17, 0.0  ;;  %v2094_v35 = vsel %vm2078_vm2, %v2070_v11, %v2086_v21 }
 0x28b   : > { %v2507_v32 = vpack.c.bf16 %v2093_v29, %v2092_v28  ;;  %vm2079_vm6 = vcmp.ge.f32.partialorder %v2071_v27, 0.0  ;;  %v2087_v33 = vmul.f32 0.01, %v2071_v27  ;;  %vm2075_vm7 = vcmp.ge.f32.partialorder %v2067_v31, 0.0 }
 0x28c   : > { %2521 = vst [vmem:[%s544_s6 + $0x18] sm:$0xff] %v2517_v30   ;;  %v2083_v34 = vmul.f32 0.01, %v2067_v31  ;;  %v2090_v37 = vsel %vm2074_vm5, %v2066_v17, %v2082_v25 }
 0x28d   : > { %2519 = vst [vmem:[%s544_s6 + $0x8] sm:$0xff] %v2507_v32   ;;  %v2095_v36 = vsel %vm2079_vm6, %v2071_v27, %v2087_v33 }
 0x28e   : > { %v2091_v38 = vsel %vm2075_vm7, %v2067_v31, %v2083_v34  ;;  %v2512_v39 = vpack.c.bf16 %v2095_v36, %v2094_v35 }
 0x28f   : > { %v2502_v40 = vpack.c.bf16 %v2091_v38, %v2090_v37 }
 0x290   : > { %2520 = vst [vmem:[%s544_s6 + $0x10] sm:$0xff] %v2512_v39  }
 0x291   : > { %2503 = vst [vmem:[%s544_s6] sm:$0xff] %v2502_v40  }
 0x292   : > { %3392 = shalt.err (!%p3389_p5)
}
 0x293   : > { %s3393_s13 = scalar_lea.hbm %s3974_s0, 512  ;;  %s3397_s10 = scalar_lea.hbm %s4095_s21, 1024 }
 0x294   : > { %p3394_p12 = scmp.ne.s32.totalorder %s3974_s0, %s3393_s13  ;;  %p3398_p13 = scmp.lt.u32.totalorder %s3974_s0, %s4095_s21 }
 0x295   : > { %p3399_p7 = scmp.lt.u32.totalorder %s3397_s10, %s3393_s13  ;;  %p3401_p3 = scmp.lt.u32.totalorder %s3393_s13, %s3974_s0 }
 0x296   : > { %p3395_p1 = pnand %p3394_p12, %p4096_p8 }
 0x297   : > { %p3400_p2 = por %p3399_p7, %p3398_p13 }
 0x298   : > { %p3396_p4 = pneg %p3395_p1 }
 0x299   : > { %p3402_p10 = por %p3401_p3, %p3400_p2 }
 0x29b   : > { %p3403_p0 = pnand %p3402_p10, %p3396_p4 }
 0x29d   : > { %3406 = shalt.err (!%p3403_p0)
}
 0x29e   : > { %s3478_s20 = smov 64   ;;  %s3479_s22 = smov 4  }
 0x29f   : > { %2959 = dma.vmem_to_hbm [thread:$0]  (%p4096_p8), %s3976_s1, 512, %s3974_s0, %s2139_s9, %s3478_s20, %s3478_s20, %s3479_s22  }
 0x2a0 PF: > { %s4097_s27 = sld [smem:[#allocation24_spill]]  ;;  %s4098_s16 = sld [smem:[#allocation29_spill]] }
 0x2a1   : > { %s4099_s30 = sld [smem:[#allocation25_spill]] }
 0x2a6   : > { %s2167_s6 = sand.u32 1, %s4097_s27   ;;  %p4100_p9 = scmp.ne.s32.totalorder %s4098_s16, 0 }
 0x2a7   : > { %p4101_p11 = scmp.ge.s32.totalorder %s4099_s30, 2  ;;  %s2168_s17 = scalar_lea.sflag [#allocation4], %s2167_s6 }
 0x2a9   : > { %p2988_p6 = pnand %p4101_p11, %p4100_p9 }
 0x2ab   : > { %3448 = dma.done.wait (!%p2988_p6), %s2168_s17, 512  }
 0x2ac   : > { %3450 = vsyncadd (!%p2988_p6), %s2168_s17, 4294966784  ;;  %s4102_s30 = sld [smem:[#allocation26_spill]]  ;;  %s4103_s24 = sld [smem:[#allocation27_spill]] }
 0x2ad   : > { %s4104_s27 = smov %s3457_s28  ;;  %s4105_s28 = smov %s3461_s29 }
 0x2b2   : > { %p31_p5 = scmp.ge.s32.totalorder %s4102_s30, 4   ;;  %s4106_s29 = smov %s4103_s24 }
 0x2b4   :  { %33 = sbr.rel (!%p31_p5) target bundleno = 17 (0x11), region = 174 }
 0x2bb   :  { %2173 = vsyncpa [#allocation3], 1 }
 0x2bc   :  { %2175 = vsyncpa [#allocation3 + $0x1], 1 }
 0x2bd   :  { %2176 = vsyncpa [#allocation6], 1 }
 0x2be   :  { %2178 = vsyncpa [#allocation6 + $0x1], 1 }
 0x2bf   :  { %2179 = vsyncpa [#allocation9], 1 }
 0x2c0   :  { %2181 = vsyncpa [#allocation9 + $0x1], 1 }
 0x2c1   :  { %2182 = vsyncpa [#allocation12], 1 }
 0x2c2   :  { %2184 = vsyncpa [#allocation12 + $0x1], 1 }
 0x2c3   :  { %2185 = vsyncpa [#allocation15], 1 }
 0x2c4   :  { %2186 = vsyncpa [#allocation4], 1 }
 0x2c5   :  { %2188 = vsyncpa [#allocation4 + $0x1], 1 }

// kernel: a_call__.5
= control target key start
LH: loop header
LB: loop body
LE: loop exit
PB: predicated region body
PF: predicated region fallthrough
CT: control target
= control target key end

     0   :  { %s3370_s0 = inlined_call_operand.hbm [shape: bf16[2,20,128], index: 0, kind: input, shape index: {}]   ;;  %s3371_s1 = inlined_call_operand.hbm [shape: bf16[2,20,128], index: 1, kind: input, shape index: {}]   ;;  %s3372_s2 = inlined_call_operand.hbm [shape: bf16[2,20,128], index: 2, kind: input, shape index: {}]   ;;  %s3373_s3 = inlined_call_operand.hbm [shape: bf16[2,20,128], index: 3, kind: input, shape index: {}]   ;;  %s3374_s4 = inlined_call_operand.hbm [shape: bf16[2,20,128], index: 4, kind: input, shape index: {}]   ;;  %s3375_s5 = inlined_call_operand.hbm [shape: bf16[2,20,128], index: 5, kind: input, shape index: {}]   ;;  %s3376_s6 = inlined_call_operand.hbm [shape: bf16[9,128,128], index: 6, kind: input, shape index: {}]   ;;  %s3377_s7 = inlined_call_operand.hbm [shape: f32[1,128], index: 7, kind: input, shape index: {}]   ;;  %s3378_s8 = inlined_call_operand.hbm [shape: bf16[2,16,128], index: 8, kind: output, shape index: {}]  }
   0x1   :  { %3404 = sst [smem:[#allocation30_spill]] %s3370_s0 }
   0x2   :  { %3405 = sst [smem:[#allocation31_spill]] %s3371_s1 }
   0x3   :  { %3406 = sst [smem:[#allocation32_spill]] %s3376_s6 }
   0x4   :  { %3407 = sst [smem:[#allocation33_spill]] %s3378_s8 }
   0x5   :  { %13 = vsyncpa [#allocation3], 0 }
   0x6   :  { %15 = vsyncpa [#allocation3 + $0x1], 0 }
   0x7   :  { %16 = vsyncpa [#allocation6], 0 }
   0x8   :  { %18 = vsyncpa [#allocation6 + $0x1], 0 }
   0x9   :  { %19 = vsyncpa [#allocation9], 0 }
   0xa   :  { %21 = vsyncpa [#allocation9 + $0x1], 0 }
   0xb   :  { %22 = vsyncpa [#allocation12], 0 }
   0xc   :  { %24 = vsyncpa [#allocation12 + $0x1], 0 }
   0xd   :  { %25 = vsyncpa [#allocation15], 0 }
   0xe   :  { %26 = vsyncpa [#allocation4], 0 }
   0xf   :  { %28 = vsyncpa [#allocation4 + $0x1], 0  ;;  %s2802_s27 = smov 0   ;;  %s2804_s28 = smov 0  }
  0x10   :  { %s2806_s29 = smov 0   ;;  %s2808_s30 = smov 0  }
  0x11 LB: > { %3408 = sst [smem:[#allocation24_spill]] %s2728_s27  ;;  %s2823_s9 = sadd.s32 4294967295, %s2740_s30   ;;  %s2740_s30 = sphi %s2808_s30, %s3452_s30   ;;  %s2736_s29 = sphi %s2806_s29, %s3456_s29   ;;  %s2732_s28 = sphi %s2804_s28, %s3455_s28   ;;  %s2728_s27 = sphi %s2802_s27, %s3454_s27  }
  0x12   : > { %3409 = sst [smem:[#allocation25_spill]] %s2740_s30  ;;  %s1847_s10 = sadd.s32 4294967294, %s2740_s30  }
  0x13   : > { %s2827_s11 = sadd.s32 1, %s2740_s30   ;;  %s41_s12 = sadd.s32 1, %s2736_s29 }
  0x14   : > { %3410 = sst [smem:[#allocation26_spill]] %s2827_s11  ;;  %s38_s13 = ssub.s32 %s2740_s30, %s2827_s11 }
  0x15   : > { %p48_p0 = scmp.ne.s32.totalorder %s2736_s29, %s2732_s28  ;;  %p39_p1 = scmp.eq.s32.totalorder %s38_s13, 0 }
  0x16   : > { %p49_p2 = scmp.eq.s32.totalorder %s2740_s30, 0  ;;  %p54_p3 = scmp.ne.s32.totalorder %s2732_s28, %s2728_s27 }
  0x17   : > { %p3380_p4 = scmp.eq.s32.totalorder %s2823_s9, 0  ;;  %p250_p7 = scmp.eq.s32.totalorder %s2823_s9, 1 }
  0x18   : > { %s2839_s14 = scalar_select %p39_p1, %s2736_s29, %s41_s12  }
  0x19   : > { %p2841_p5 = por %p49_p2, %p48_p0  ;;  %p2847_p6 = por %p3380_p4, %p54_p3 }
  0x1a   : > { %3411 = sst [smem:[#allocation27_spill]] %s2839_s14  ;;  %p256_p8 = scmp.eq.s32.totalorder %s1847_s10, 1 }
  0x1b   : > { %s3412_s15 = scalar_select %p2841_p5, 1, 0 }
  0x1c   : > { %s3413_s16 = scalar_select %p2847_p6, 1, 0 }
  0x1d   : > { %p1848_p9 = scmp.ge.s32.totalorder %s2740_s30, 1  ;;  %p263_p10 = scmp.lt.s32.totalorder %s2740_s30, 3 }
  0x1e   : > { %p2854_p11 = por %p250_p7, %p48_p0  ;;  %p2858_p12 = por %p256_p8, %p54_p3 }
  0x1f   : > { %p2862_p13 = pnand %p1848_p9, %p263_p10  ;;  %s2742_s20 = smov [#allocation13]  }
  0x20   : > { %s3414_s17 = scalar_select %p2854_p11, 1, 0 }
  0x21   : > { %s3416_s18 = scalar_select %p2858_p12, 1, 0 }
  0x22   : > { %3415 = sst [smem:[#allocation28_spill]] %s3414_s17  ;;  %p2258_p1 = pneg %p2862_p13 }
  0x23   : > { %3417 = sst [smem:[#allocation29_spill]] %s3416_s18  ;;  %s275_s21 = sshll.u32 %s2742_s20, 4  ;;  %s276_s21 = int_to_ptr.vmem [resolvable:$true] %s275_s21 }
  0x24   : > { %s3418_s19 = scalar_select %p2862_p13, 1, 0 }
  0x25   : > { %p2870_p2 = pnand %p2258_p1, %p3380_p4  ;;  %s3379_s23 = sand.u32 1, %s2736_s29  }
  0x26   : > { %s2879_s24 = smul.u32 12, %s3379_s23  ;;  %s3420_s6 = sld [smem:[#allocation32_spill]] }
  0x27   : > { %s3419_s22 = scalar_select %p2870_p2, 1, 0 }
  0x28   : > { %p3391_p8 = pneg %p2870_p2 }
  0x2c   : > { %s2418_s10 = scalar_lea.hbm %s3420_s6, 9216 }
  0x2d   : > { %p2419_p7 = scmp.ne.s32.totalorder %s3420_s6, %s2418_s10  ;;  %p2425_p1 = scmp.lt.u32.totalorder %s2418_s10, %s3420_s6 }
  0x2f   : > { %p2421_p9 = pnand %p3391_p8, %p2419_p7 }
  0x31   : > { %p2422_p10 = pneg %p2421_p9 }
  0x33   : > { %p2427_p0 = pnand %p2425_p1, %p2422_p10 }
  0x35   : > { %2430 = shalt.err (!%p2427_p0)
}
  0x36   : > { %s2431_s23 = scalar_lea.vmem %s276_s21, 9216  ;;  %p2439_p11 = scmp.lt.s32.totalorder %s276_s21, %s276_s21 }
  0x37   : > { %p2432_p4 = scmp.ne.s32.totalorder %s276_s21, %s2431_s23  ;;  %p2440_p6 = scmp.lt.s32.totalorder %s2431_s23, %s2431_s23 }
  0x39   : > { %p2434_p3 = pnand %p2432_p4, %p3391_p8  ;;  %p2441_p13 = por %p2440_p6, %p2439_p11 }
  0x3b   : > { %p2435_p12 = pneg %p2434_p3 }
  0x3d   : > { %p2442_p5 = pnand %p2441_p13, %p2435_p12 }
  0x3f   : > { %2445 = shalt.err (!%p2442_p5)
}
  0x40   : > { %s3387_s25 = smov 64   ;;  %s3389_s14 = smov 4  }
  0x41   : > { %2261 = dma.hbm_to_vmem [thread:$0]  (!%p2870_p2), %s3420_s6, 9216, %s276_s21, [#allocation12], %s3387_s25, %s3387_s25, %s3389_s14  }
  0x42   : > { %p3421_p4 = scmp.ne.s32.totalorder %s3412_s15, 0  ;;  %p3422_p6 = scmp.lt.s32.totalorder %s2740_s30, 2 }
  0x43   : > { %s2915_s12 = smul.u32 192, %s2740_s30  ;;  %s2918_s13 = sand.u32 1, %s2740_s30  }
  0x44   : > { %p2910_p11 = pnand %p3422_p6, %p3421_p4  ;;  %s3424_s1 = sld [smem:[#allocation31_spill]] }
  0x45   : > { %s325_s15 = scalar_lea.vmem [#allocation5], %s2879_s24 }
  0x46   : > { %s3423_s23 = scalar_select %p2910_p11, 1, 0 }
  0x47   : > { %s332_s21 = sshll.u32 %s325_s15, 4  ;;  %p2934_p12 = pneg %p2910_p11  ;;  %s2927_s21 = int_to_ptr.vmem [resolvable:$true] %s332_s21 }
  0x49   : > { %s3425_s25 = scalar_select %p2934_p12, 1, 0 }
  0x4a   : > { %s2924_s18 = scalar_lea.hbm %s3424_s1, %s2915_s12  ;;  %s2451_s14 = scalar_lea.hbm %s3424_s1, 384 }
  0x4b   : > { %s2446_s10 = scalar_lea.hbm %s2924_s18, 192  ;;  %p2452_p3 = scmp.lt.u32.totalorder %s2924_s18, %s3424_s1 }
  0x4c   : > { %p2447_p5 = scmp.ne.s32.totalorder %s2924_s18, %s2446_s10  ;;  %p2453_p7 = scmp.lt.u32.totalorder %s2451_s14, %s2446_s10 }
  0x4d   : > { %p2455_p10 = scmp.lt.u32.totalorder %s2446_s10, %s2924_s18 }
  0x4e   : > { %p2449_p13 = pnand %p2934_p12, %p2447_p5  ;;  %p2454_p9 = por %p2453_p7, %p2452_p3 }
  0x50   : > { %p2450_p0 = pneg %p2449_p13  ;;  %p2456_p1 = por %p2455_p10, %p2454_p9 }
  0x52   : > { %p2457_p4 = pnand %p2456_p1, %p2450_p0 }
  0x54   : > { %2460 = shalt.err (!%p2457_p4)
}
  0x55   : > { %s2461_s26 = scalar_lea.vmem %s2927_s21, 192  ;;  %s2745_s11 = smov [#allocation5]  }
  0x56   : > { %p2462_p6 = scmp.ne.s32.totalorder %s2927_s21, %s2461_s26  ;;  %s2466_s20 = sshll.u32 %s2745_s11, 4  ;;  %s2467_s20 = int_to_ptr.vmem [resolvable:$false] %s2466_s20 }
  0x57   : > { %s2468_s6 = scalar_lea.vmem %s2467_s20, 384  ;;  %p2469_p8 = scmp.lt.s32.totalorder %s2927_s21, %s2467_s20 }
  0x58   : > { %p2464_p5 = pnand %p2462_p6, %p2934_p12  ;;  %p2470_p2 = scmp.lt.s32.totalorder %s2468_s6, %s2461_s26 }
  0x5a   : > { %p2465_p13 = pneg %p2464_p5  ;;  %p2471_p3 = por %p2470_p2, %p2469_p8 }
  0x5c   : > { %p2472_p7 = pnand %p2471_p3, %p2465_p13 }
  0x5e   : > { %2475 = shalt.err (!%p2472_p7)
}
  0x5f   : > { %s3426_s14 = smov 4   ;;  %s3427_s10 = smov 64  }
  0x60   : > { %s3428_s15 = scalar_lea.sflag [#allocation6], %s2918_s13  ;;  %s2966_s26 = scalar_lea.hbm %s3373_s3, %s2915_s12 }
  0x61   : > { %2271 = dma.hbm_to_vmem [thread:$0]  (!%p2910_p11), %s2924_s18, 192, %s2927_s21, %s3428_s15, %s3427_s10, %s3427_s10, %s3426_s14  }
  0x62   : > { %s367_s6 = scalar_lea.vmem [#allocation8], %s2879_s24  ;;  %s2746_s30 = smov [#allocation14]  }
  0x63   : > { %s374_s1 = sshll.u32 %s367_s6, 4  ;;  %s2971_s27 = sshll.u32 %s2746_s30, 4  ;;  %s2969_s1 = int_to_ptr.vmem [resolvable:$true] %s374_s1  ;;  %s290_s27 = int_to_ptr.vmem [resolvable:$true] %s2971_s27 }
  0x64   : > { %s3403_s8 = scalar_lea.sflag [#allocation9], %s2918_s13  ;;  %s2476_s17 = scalar_lea.hbm %s2966_s26, 192 }
  0x65   : > { %p2477_p2 = scmp.ne.s32.totalorder %s2966_s26, %s2476_s17  ;;  %s2481_s15 = scalar_lea.hbm %s3373_s3, 384 }
  0x66   : > { %p2482_p9 = scmp.lt.u32.totalorder %s2966_s26, %s3373_s3  ;;  %p2483_p10 = scmp.lt.u32.totalorder %s2481_s15, %s2476_s17 }
  0x67   : > { %p2479_p8 = pnand %p2477_p2, %p2934_p12  ;;  %p2485_p4 = scmp.lt.u32.totalorder %s2476_s17, %s2966_s26 }
  0x68   : > { %p2484_p1 = por %p2483_p10, %p2482_p9 }
  0x69   : > { %p2480_p0 = pneg %p2479_p8 }
  0x6a   : > { %p2486_p6 = por %p2485_p4, %p2484_p1 }
  0x6c   : > { %p2487_p5 = pnand %p2486_p6, %p2480_p0 }
  0x6e   : > { %2490 = shalt.err (!%p2487_p5)
}
  0x6f   : > { %s2491_s30 = scalar_lea.vmem %s2969_s1, 192  ;;  %s2747_s6 = smov [#allocation8]  }
  0x70   : > { %p2492_p13 = scmp.ne.s32.totalorder %s2969_s1, %s2491_s30  ;;  %s2496_s18 = sshll.u32 %s2747_s6, 4  ;;  %s2497_s18 = int_to_ptr.vmem [resolvable:$false] %s2496_s18 }
  0x71   : > { %s2498_s21 = scalar_lea.vmem %s2497_s18, 384  ;;  %p2499_p2 = scmp.lt.s32.totalorder %s2969_s1, %s2497_s18 }
  0x72   : > { %p2494_p3 = pnand %p2492_p13, %p2934_p12  ;;  %p2500_p8 = scmp.lt.s32.totalorder %s2498_s21, %s2491_s30 }
  0x74   : > { %p2495_p7 = pneg %p2494_p3  ;;  %p2501_p9 = por %p2500_p8, %p2499_p2 }
  0x76   : > { %p2502_p10 = pnand %p2501_p9, %p2495_p7 }
  0x78   : > { %2505 = shalt.err (!%p2502_p10)
}
  0x79   : > { %2277 = dma.hbm_to_vmem [thread:$0]  (!%p2910_p11), %s2966_s26, 192, %s2969_s1, %s3403_s8, %s3427_s10, %s3427_s10, %s3426_s14  }
  0x7a   : > { %s2506_s11 = scalar_lea.hbm %s3377_s7, 16  ;;  %p3429_p1 = scmp.ne.s32.totalorder %s3419_s22, 0 }
  0x7b   : > { %p2507_p0 = scmp.ne.s32.totalorder %s3377_s7, %s2506_s11  ;;  %p2513_p13 = scmp.lt.u32.totalorder %s2506_s11, %s3377_s7 }
  0x7c   : > { %p3430_p4 = pneg %p3429_p1 }
  0x7e   : > { %p2509_p6 = pnand %p2507_p0, %p3430_p4 }
  0x80   : > { %p2510_p5 = pneg %p2509_p6 }
  0x82   : > { %p2515_p3 = pnand %p2513_p13, %p2510_p5 }
  0x84   : > { %2518 = shalt.err (!%p2515_p3)
}
  0x85   : > { %s2519_s1 = scalar_lea.vmem %s290_s27, 16  ;;  %p3431_p2 = pmov %p3430_p4 }
  0x86   : > { %p2520_p7 = scmp.ne.s32.totalorder %s290_s27, %s2519_s1  ;;  %s2526_s26 = scalar_lea.vmem %s290_s27, 32 }
  0x87   : > { %p2527_p10 = scmp.lt.s32.totalorder %s290_s27, %s290_s27  ;;  %p2528_p11 = scmp.lt.s32.totalorder %s2526_s26, %s2519_s1 }
  0x88   : > { %p2522_p8 = pnand %p2520_p7, %p3431_p2 }
  0x89   : > { %p2529_p12 = por %p2528_p11, %p2527_p10 }
  0x8a   : > { %p2523_p9 = pneg %p2522_p8 }
  0x8c   : > { %p2530_p0 = pnand %p2529_p12, %p2523_p9 }
  0x8e   : > { %2533 = shalt.err (!%p2530_p0)
}
  0x8f   : > { %2264 = dma.hbm_to_vmem [thread:$0]  (!%p3429_p1), %s3377_s7, 16, %s290_s27, [#allocation15]  }
  0x90   : > { %s3432_s0 = sld [smem:[#allocation30_spill]]  ;;  %s304_s30 = scalar_lea.vmem [#allocation2], %s2879_s24 }
  0x91   : > { %s311_s22 = sshll.u32 %s304_s30, 4  ;;  %s3034_s1 = scalar_lea.hbm %s3372_s2, %s2915_s12  ;;  %s3028_s22 = int_to_ptr.vmem [resolvable:$true] %s311_s22 }
  0x92   : > { %s3433_s26 = sand.u32 1, %s2736_s29   ;;  %p3434_p12 = scmp.ne.s32.totalorder %s3425_s25, 0 }
  0x93   : > { %s3038_s27 = scalar_lea.sflag [#allocation3], %s3433_s26 }
  0x96   : > { %s3025_s20 = scalar_lea.hbm %s3432_s0, %s2915_s12  ;;  %s2539_s11 = scalar_lea.hbm %s3432_s0, 384 }
  0x97   : > { %s2534_s21 = scalar_lea.hbm %s3025_s20, 192  ;;  %p2540_p6 = scmp.lt.u32.totalorder %s3025_s20, %s3432_s0 }
  0x98   : > { %p2535_p11 = scmp.ne.s32.totalorder %s3025_s20, %s2534_s21  ;;  %p2541_p5 = scmp.lt.u32.totalorder %s2539_s11, %s2534_s21 }
  0x99   : > { %p2543_p3 = scmp.lt.u32.totalorder %s2534_s21, %s3025_s20 }
  0x9a   : > { %p2537_p1 = pnand %p2535_p11, %p3434_p12  ;;  %p2542_p13 = por %p2541_p5, %p2540_p6 }
  0x9c   : > { %p2538_p4 = pneg %p2537_p1  ;;  %p2544_p7 = por %p2543_p3, %p2542_p13 }
  0x9e   : > { %p2545_p2 = pnand %p2544_p7, %p2538_p4 }
  0xa0   : > { %2548 = shalt.err (!%p2545_p2)
}
  0xa1   : > { %s2549_s6 = scalar_lea.vmem %s3028_s22, 192  ;;  %s2748_s18 = smov [#allocation2]  }
  0xa2   : > { %p2550_p8 = scmp.ne.s32.totalorder %s3028_s22, %s2549_s6  ;;  %s2554_s26 = sshll.u32 %s2748_s18, 4  ;;  %s2555_s26 = int_to_ptr.vmem [resolvable:$false] %s2554_s26 }
  0xa3   : > { %s2556_s8 = scalar_lea.vmem %s2555_s26, 384  ;;  %p2557_p0 = scmp.lt.s32.totalorder %s3028_s22, %s2555_s26 }
  0xa4   : > { %p2552_p9 = pnand %p2550_p8, %p3434_p12  ;;  %p2558_p11 = scmp.lt.s32.totalorder %s2556_s8, %s2549_s6 }
  0xa6   : > { %p2553_p10 = pneg %p2552_p9  ;;  %p2559_p1 = por %p2558_p11, %p2557_p0 }
  0xa8   : > { %p2560_p6 = pnand %p2559_p1, %p2553_p10 }
  0xaa   : > { %2563 = shalt.err (!%p2560_p6)
}
  0xab   : > { %p3435_p4 = scmp.ne.s32.totalorder %s3423_s23, 0  ;;  %s346_s21 = scalar_lea.vmem [#allocation7], %s2879_s24 }
  0xac   : > { %s353_s17 = sshll.u32 %s346_s21, 4  ;;  %s3072_s30 = scalar_lea.hbm %s3374_s4, %s2915_s12  ;;  %s3066_s17 = int_to_ptr.vmem [resolvable:$true] %s353_s17 }
  0xad   : > { %2268 = dma.hbm_to_vmem [thread:$0]  (!%p3435_p4), %s3025_s20, 192, %s3028_s22, %s3038_s27, %s3427_s10, %s3427_s10, %s3426_s14  }
  0xae   : > { %s2564_s6 = scalar_lea.hbm %s3034_s1, 192  ;;  %s2569_s8 = scalar_lea.hbm %s3372_s2, 384 }
  0xaf   : > { %p2565_p5 = scmp.ne.s32.totalorder %s3034_s1, %s2564_s6  ;;  %p2570_p7 = scmp.lt.u32.totalorder %s3034_s1, %s3372_s2 }
  0xb0   : > { %p2571_p2 = scmp.lt.u32.totalorder %s2569_s8, %s2564_s6  ;;  %p2573_p9 = scmp.lt.u32.totalorder %s2564_s6, %s3034_s1 }
  0xb1   : > { %p2567_p13 = pnand %p2565_p5, %p3434_p12 }
  0xb2   : > { %p2572_p8 = por %p2571_p2, %p2570_p7 }
  0xb3   : > { %p2568_p3 = pneg %p2567_p13 }
  0xb4   : > { %p2574_p10 = por %p2573_p9, %p2572_p8 }
  0xb6   : > { %p2575_p0 = pnand %p2574_p10, %p2568_p3 }
  0xb8   : > { %2578 = shalt.err (!%p2575_p0)
}
  0xb9   : > { %s2579_s22 = scalar_lea.vmem %s3066_s17, 192  ;;  %s2749_s27 = smov [#allocation7]  }
  0xba   : > { %p2580_p11 = scmp.ne.s32.totalorder %s3066_s17, %s2579_s22  ;;  %s2584_s21 = sshll.u32 %s2749_s27, 4  ;;  %s2585_s21 = int_to_ptr.vmem [resolvable:$false] %s2584_s21 }
  0xbb   : > { %s2586_s0 = scalar_lea.vmem %s2585_s21, 384  ;;  %p2587_p5 = scmp.lt.s32.totalorder %s3066_s17, %s2585_s21 }
  0xbc   : > { %p2582_p1 = pnand %p2580_p11, %p3434_p12  ;;  %p2588_p13 = scmp.lt.s32.totalorder %s2586_s0, %s2579_s22 }
  0xbe   : > { %p2583_p6 = pneg %p2582_p1  ;;  %p2589_p7 = por %p2588_p13, %p2587_p5 }
  0xc0   : > { %p2590_p2 = pnand %p2589_p7, %p2583_p6 }
  0xc2   : > { %2593 = shalt.err (!%p2590_p2)
}
  0xc3   : > { %s3436_s15 = scalar_lea.sflag [#allocation6], %s2918_s13  ;;  %s388_s11 = scalar_lea.vmem [#allocation10], %s2879_s24 }
  0xc4   : > { %2274 = dma.hbm_to_vmem [thread:$0]  (!%p3435_p4), %s3034_s1, 192, %s3066_s17, %s3436_s15, %s3427_s10, %s3427_s10, %s3426_s14  }
  0xc5   : > { %s395_s6 = sshll.u32 %s388_s11, 4  ;;  %s2594_s18 = scalar_lea.hbm %s3072_s30, 192  ;;  %s3101_s6 = int_to_ptr.vmem [resolvable:$true] %s395_s6 }
  0xc6   : > { %p2595_p3 = scmp.ne.s32.totalorder %s3072_s30, %s2594_s18  ;;  %s2599_s20 = scalar_lea.hbm %s3374_s4, 384 }
  0xc7   : > { %p2600_p10 = scmp.lt.u32.totalorder %s3072_s30, %s3374_s4  ;;  %p2601_p0 = scmp.lt.u32.totalorder %s2599_s20, %s2594_s18 }
  0xc8   : > { %p2597_p8 = pnand %p2595_p3, %p3434_p12  ;;  %p2603_p1 = scmp.lt.u32.totalorder %s2594_s18, %s3072_s30 }
  0xc9   : > { %p2602_p11 = por %p2601_p0, %p2600_p10 }
  0xca   : > { %p2598_p9 = pneg %p2597_p8 }
  0xcb   : > { %p2604_p6 = por %p2603_p1, %p2602_p11 }
  0xcd   : > { %p2605_p5 = pnand %p2604_p6, %p2598_p9 }
  0xcf   : > { %2608 = shalt.err (!%p2605_p5)
}
  0xd0   : > { %s2609_s1 = scalar_lea.vmem %s3101_s6, 192  ;;  %s2750_s17 = smov [#allocation10]  }
  0xd1   : > { %p2610_p13 = scmp.ne.s32.totalorder %s3101_s6, %s2609_s1  ;;  %s2614_s21 = sshll.u32 %s2750_s17, 4  ;;  %s2615_s21 = int_to_ptr.vmem [resolvable:$false] %s2614_s21 }
  0xd2   : > { %s2616_s0 = scalar_lea.vmem %s2615_s21, 384  ;;  %p2617_p3 = scmp.lt.s32.totalorder %s3101_s6, %s2615_s21 }
  0xd3   : > { %p2612_p7 = pnand %p2610_p13, %p3434_p12  ;;  %p2618_p8 = scmp.lt.s32.totalorder %s2616_s0, %s2609_s1 }
  0xd5   : > { %p2613_p2 = pneg %p2612_p7  ;;  %p2619_p10 = por %p2618_p8, %p2617_p3 }
  0xd7   : > { %p2620_p0 = pnand %p2619_p10, %p2613_p2 }
  0xd9   : > { %2623 = shalt.err (!%p2620_p0)
}
  0xda   : > { %s3437_s15 = scalar_lea.sflag [#allocation9], %s2918_s13  ;;  %s3133_s26 = scalar_lea.hbm %s3375_s5, %s2915_s12 }
  0xdb   : > { %2280 = dma.hbm_to_vmem [thread:$0]  (!%p3435_p4), %s3072_s30, 192, %s3101_s6, %s3437_s15, %s3427_s10, %s3427_s10, %s3426_s14  }
  0xdc   : > { %s409_s8 = scalar_lea.vmem [#allocation11], %s2879_s24  ;;  %s406_s22 = scalar_lea.sflag [#allocation12], %s2918_s13 }
  0xdd   : > { %s416_s20 = sshll.u32 %s409_s8, 4  ;;  %s2624_s27 = scalar_lea.hbm %s3133_s26, 192  ;;  %s3136_s20 = int_to_ptr.vmem [resolvable:$true] %s416_s20 }
  0xde   : > { %p2625_p9 = scmp.ne.s32.totalorder %s3133_s26, %s2624_s27  ;;  %s2629_s1 = scalar_lea.hbm %s3375_s5, 384 }
  0xdf   : > { %p2630_p6 = scmp.lt.u32.totalorder %s3133_s26, %s3375_s5  ;;  %p2631_p5 = scmp.lt.u32.totalorder %s2629_s1, %s2624_s27 }
  0xe0   : > { %p2627_p11 = pnand %p2625_p9, %p3434_p12  ;;  %p2633_p7 = scmp.lt.u32.totalorder %s2624_s27, %s3133_s26 }
  0xe1   : > { %p2632_p13 = por %p2631_p5, %p2630_p6 }
  0xe2   : > { %p2628_p1 = pneg %p2627_p11 }
  0xe3   : > { %p2634_p2 = por %p2633_p7, %p2632_p13 }
  0xe5   : > { %p2635_p3 = pnand %p2634_p2, %p2628_p1 }
  0xe7   : > { %2638 = shalt.err (!%p2635_p3)
}
  0xe8   : > { %s2639_s24 = scalar_lea.vmem %s3136_s20, 192  ;;  %s2751_s21 = smov [#allocation11]  }
  0xe9   : > { %p2640_p8 = scmp.ne.s32.totalorder %s3136_s20, %s2639_s24  ;;  %s2644_s0 = sshll.u32 %s2751_s21, 4  ;;  %s2645_s0 = int_to_ptr.vmem [resolvable:$false] %s2644_s0 }
  0xea   : > { %s2646_s15 = scalar_lea.vmem %s2645_s0, 384  ;;  %p2647_p9 = scmp.lt.s32.totalorder %s3136_s20, %s2645_s0 }
  0xeb   : > { %p2642_p10 = pnand %p2640_p8, %p3434_p12  ;;  %p2648_p11 = scmp.lt.s32.totalorder %s2646_s15, %s2639_s24 }
  0xed   : > { %p2643_p0 = pneg %p2642_p10  ;;  %p2649_p6 = por %p2648_p11, %p2647_p9 }
  0xef   : > { %p2650_p5 = pnand %p2649_p6, %p2643_p0 }
  0xf1   : > { %2653 = shalt.err (!%p2650_p5)
}
  0xf2   : > { %2283 = dma.hbm_to_vmem [thread:$0]  (!%p3435_p4), %s3133_s26, 192, %s3136_s20, %s406_s22, %s3427_s10, %s3427_s10, %s3426_s14  }
  0xf3   : > { %p3438_p12 = scmp.ne.s32.totalorder %s3418_s19, 0 }
  0xf4   : > { %s3168_s25 = sand.u32 (!%p3438_p12), 1, %s2732_s28   ;;  %p3439_p1 = scmp.ne.s32.totalorder (!%p3438_p12), %s3413_s16, 0 }
  0xf5   : > { %428 = sbr.rel (%p3438_p12) target bundleno = 668 (0x29c), region = 52  ;;  %s431_s23 = scalar_lea.sflag (!%p3438_p12), [#allocation3], %s3168_s25 }
  0xf6   : > { %s3171_s11 = smul.u32 (!%p3438_p12), 12, %s3168_s25 }
  0xf8   : > { %s3175_s18 = scalar_lea.vmem (!%p3438_p12), [#allocation2], %s3171_s11 }
  0xfc   : > { %2699 = dma.done.wait (%p3439_p1), %s431_s23, 192  }
  0xfd   : > { %2701 = vsyncadd (%p3439_p1), %s431_s23, 4294967104  ;;  %s439_s19 = sand.u32 1, %s2823_s9   ;;  %s3183_s14 = scalar_lea.vmem [#allocation5], %s3171_s11 }
  0xfe   : > { %s440_s13 = scalar_lea.sflag [#allocation6], %s439_s19 }
  0xff   : > { %2703 = dma.done.wait (%p3439_p1), %s440_s13, 384  }
 0x100   : > { %2705 = vsyncadd (%p3439_p1), %s440_s13, 4294966912  ;;  %s3190_s10 = scalar_lea.vmem [#allocation7], %s3171_s11  ;;  %s458_s26 = scalar_lea.sflag [#allocation9], %s439_s19 }
 0x101   : > { %s461_s8 = scalar_lea.vmem [#allocation8], %s3171_s11 }
 0x102   : > { %2707 = dma.done.wait (%p3439_p1), %s458_s26, 384  }
 0x103   : > { %2709 = vsyncadd (%p3439_p1), %s458_s26, 4294966912  ;;  %s470_s20 = scalar_lea.vmem [#allocation10], %s3171_s11  ;;  %s476_s22 = scalar_lea.sflag [#allocation12], %s439_s19 }
 0x104   : > { %s479_s27 = scalar_lea.vmem [#allocation11], %s3171_s11 }
 0x105   : > { %2711 = dma.done.wait (%p3439_p1), %s476_s22, 192  }
 0x106   : > { %2713 = vsyncadd (%p3439_p1), %s476_s22, 4294967104  ;;  %p3440_p4 = scmp.eq.s32.totalorder %s2823_s9, 0 }
 0x108   : > { %2715 = dma.done.wait (%p3440_p4), [#allocation12], 9216   ;;  %p3441_p13 = pmov %p3440_p4 }
 0x109   : > { %p3442_p7 = pmov %p3440_p4 }
 0x10a   : > { %2717 = vsyncadd (%p3441_p13), [#allocation12], 4294958080 }
 0x10b   : > { %2719 = dma.done.wait (%p3442_p7), [#allocation15], 16   ;;  %p3443_p2 = pmov %p3440_p4 }
 0x10c   : > { %v2752_v0 = vmov 0.0   ;;  %vm2753_vm0 = vmmov 0   ;;  %v2334_v1 = vld [vmem:[#allocation13 + $0x40] sm:$0xff]   ;;  %v2336_v3 = vld [vmem:[#allocation13 + $0x48] sm:$0xff]   ;;  %v2338_v5 = vld [vmem:[#allocation13 + $0x50] sm:$0xff]   ;;  %vm1265_vm1 = vcmask 1045504  }
 0x10d   : > { %2721 = vsyncadd (%p3443_p2), [#allocation15], 4294967280  ;;  %2043 = vmatprep.subr.bf16.mxu0 %v2752_v0  ;;  %2063 = vmatprep.subr.bf16.mxu1 %v2752_v0  ;;  %v2335_v2 = vld [vmem:[#allocation13] sm:$0xff]   ;;  %v2337_v4 = vld [vmem:[#allocation13 + $0x8] sm:$0xff]   ;;  %s1861_s16 = sshll.u32 %s3168_s25, 3  ;;  %s3444_s30 = sld [smem:[#allocation28_spill]] }
 0x10e   : > { %2059 = vmatprep.mubr.msk.bf16.mxu0 %vm2753_vm0, %v2752_v0  ;;  %2079 = vmatprep.mubr.msk.bf16.mxu1 %vm2753_vm0, %v2752_v0  ;;  %v2339_v6 = vld [vmem:[#allocation13 + $0x10] sm:$0xff]   ;;  %v2340_v7 = vld [vmem:[#allocation13 + $0x58] sm:$0xff]   ;;  %v2342_v9 = vld [vmem:[#allocation13 + $0x60] sm:$0xff]   ;;  %s1956_s6 = sshll.u32 %s2823_s9, 7  ;;  %s544_s1 = scalar_lea.vmem [#allocation16], %s1861_s16 }
 0x10f   : > { %2044 = vmatpush3.bf16.msra.mxu0 %v2334_v1  ;;  %2064 = vmatpush3.bf16.msra.mxu1 %v2335_v2  ;;  %v2341_v8 = vld [vmem:[#allocation13 + $0x18] sm:$0xff]   ;;  %v2343_v10 = vld [vmem:[#allocation13 + $0x20] sm:$0xff]   ;;  %v2344_v11 = vld [vmem:[#allocation13 + $0x68] sm:$0xff]   ;;  %s1646_s12 = sshll.u32 %s544_s1, 4  ;;  %s3445_s21 = sld [smem:[#allocation33_spill]]  ;;  %s3326_s12 = int_to_ptr.vmem [resolvable:$true] %s1646_s12 }
 0x110   : > { %2045 = vmatprep.subr.bf16.mxu0 %v2752_v0  ;;  %2065 = vmatprep.subr.bf16.mxu1 %v2752_v0  ;;  %v2345_v12 = vld [vmem:[#allocation13 + $0x28] sm:$0xff]   ;;  %v2346_v13 = vld [vmem:[#allocation13 + $0x70] sm:$0xff]   ;;  %v2348_v15 = vld [vmem:[#allocation13 + $0x78] sm:$0xff]   ;;  %s1633_s15 = scalar_lea.sflag [#allocation4], %s3168_s25  ;;  %s2654_s9 = scalar_lea.vmem %s3326_s12, 128 }
 0x111   : > { %v2347_v14 = vld [vmem:[#allocation13 + $0x30] sm:$0xff]   ;;  %v2349_v16 = vld [vmem:[#allocation13 + $0x38] sm:$0xff]   ;;  %v2352_v19 = vld [vmem:[#allocation13 + $0x80] sm:$0xff]   ;;  %p2655_p3 = scmp.ne.s32.totalorder %s3326_s12, %s2654_s9  ;;  %s2754_s11 = smov [#allocation16]  }
 0x112   : > { %v2350_v17 = vld [vmem:[%s3183_s14] sm:$0xff]   ;;  %v2351_v18 = vld [vmem:[%s3175_s18] sm:$0xff]   ;;  %v2368_v35 = vld [vmem:[%s3190_s10] sm:$0xff]   ;;  %s2658_s23 = sshll.u32 %s2754_s11, 4  ;;  %s2659_s23 = int_to_ptr.vmem [resolvable:$false] %s2658_s23 }
 0x113   : > { %2046 = vmatpush3.bf16.msra.mxu0 %v2336_v3  ;;  %2066 = vmatpush3.bf16.msra.mxu1 %v2337_v4  ;;  %v2353_v20 = vld [vmem:[#allocation13 + $0xc0] sm:$0xff]   ;;  %v2354_v21 = vld [vmem:[#allocation13 + $0x88] sm:$0xff]   ;;  %v2356_v23 = vld [vmem:[#allocation13 + $0x90] sm:$0xff]   ;;  %p3446_p8 = scmp.ne.s32.totalorder %s3444_s30, 0  ;;  %p2661_p9 = scmp.lt.s32.totalorder %s3326_s12, %s2659_s23 }
 0x114   : > { %2047 = vmatprep.subr.bf16.mxu0 %v2752_v0  ;;  %2067 = vmatprep.subr.bf16.mxu1 %v2752_v0  ;;  %v2355_v22 = vld [vmem:[#allocation13 + $0xc8] sm:$0xff]   ;;  %v2357_v24 = vld [vmem:[#allocation13 + $0xd0] sm:$0xff]   ;;  %v2358_v25 = vld [vmem:[#allocation13 + $0x98] sm:$0xff]  }
 0x115   : > { %v2359_v26 = vld [vmem:[#allocation13 + $0xd8] sm:$0xff]   ;;  %v2360_v27 = vld [vmem:[#allocation13 + $0xa0] sm:$0xff]   ;;  %v2362_v29 = vld [vmem:[#allocation13 + $0xa8] sm:$0xff]   ;;  %s3324_s0 = scalar_lea.hbm %s3445_s21, %s1956_s6  ;;  %p2656_p10 = pnand %p2655_p3, %p3446_p8 }
 0x116   : > { %v2361_v28 = vld [vmem:[#allocation13 + $0xe0] sm:$0xff]   ;;  %v2363_v30 = vld [vmem:[#allocation13 + $0xe8] sm:$0xff]   ;;  %v2364_v31 = vld [vmem:[#allocation13 + $0xb0] sm:$0xff]  }
 0x117   : > { %2048 = vmatpush3.bf16.msra.mxu0 %v2338_v5  ;;  %2068 = vmatpush3.bf16.msra.mxu1 %v2339_v6  ;;  %v2365_v32 = vld [vmem:[#allocation13 + $0xf0] sm:$0xff]   ;;  %v2366_v33 = vld [vmem:[#allocation13 + $0xb8] sm:$0xff]   ;;  %v2369_v36 = vld [vmem:[#allocation13 + $0x100] sm:$0xff]   ;;  %p2657_p0 = pneg %p2656_p10 }
 0x118   : > { %2049 = vmatprep.subr.bf16.mxu0 %v2752_v0  ;;  %2069 = vmatprep.subr.bf16.mxu1 %v2752_v0  ;;  %v2367_v34 = vld [vmem:[#allocation13 + $0xf8] sm:$0xff]   ;;  %v2371_v38 = vld [vmem:[#allocation13 + $0x140] sm:$0xff]   ;;  %v2372_v39 = vld [vmem:[#allocation13 + $0x108] sm:$0xff]  }
 0x119   : > { %v2370_v37 = vld [vmem:[%s461_s8] sm:$0xff]   ;;  %v2374_v41 = vld [vmem:[#allocation13 + $0x110] sm:$0xff]  }
 0x11a   : > { %v2373_v40 = vld [vmem:[#allocation13 + $0x148] sm:$0xff]   ;;  %v2375_v42 = vld [vmem:[#allocation13 + $0x150] sm:$0xff]   ;;  %v2376_v43 = vld [vmem:[#allocation13 + $0x118] sm:$0xff]  }
 0x11b   : > { %2050 = vmatpush3.bf16.msra.mxu0 %v2340_v7  ;;  %2070 = vmatpush3.bf16.msra.mxu1 %v2341_v8  ;;  %v2377_v44 = vld [vmem:[#allocation13 + $0x158] sm:$0xff]   ;;  %v2378_v45 = vld [vmem:[#allocation13 + $0x120] sm:$0xff]   ;;  %v2380_v47 = vld [vmem:[#allocation13 + $0x128] sm:$0xff]  }
 0x11c   : > { %2051 = vmatprep.subr.bf16.mxu0 %v2752_v0  ;;  %2071 = vmatprep.subr.bf16.mxu1 %v2752_v0  ;;  %v2379_v46 = vld [vmem:[#allocation13 + $0x160] sm:$0xff]   ;;  %v2381_v48 = vld [vmem:[#allocation13 + $0x168] sm:$0xff]   ;;  %v2382_v49 = vld [vmem:[#allocation13 + $0x130] sm:$0xff]  }
 0x11d   : > { %v2383_v50 = vld [vmem:[#allocation13 + $0x170] sm:$0xff]   ;;  %v2384_v51 = vld [vmem:[#allocation13 + $0x138] sm:$0xff]   ;;  %v2387_v54 = vld [vmem:[#allocation13 + $0x180] sm:$0xff]  }
 0x11e   : > { %v2385_v52 = vld [vmem:[#allocation13 + $0x178] sm:$0xff]   ;;  %v2389_v56 = vld [vmem:[#allocation13 + $0x1c0] sm:$0xff]   ;;  %v2390_v57 = vld [vmem:[#allocation13 + $0x188] sm:$0xff]  }
 0x11f   : > { %2052 = vmatpush3.bf16.msra.mxu0 %v2342_v9  ;;  %2072 = vmatpush3.bf16.msra.mxu1 %v2343_v10  ;;  %v2386_v53 = vld [vmem:[%s470_s20] sm:$0xff]   ;;  %v2388_v55 = vld [vmem:[%s479_s27] sm:$0xff]   ;;  %v2405_v6 = vld [vmem:[%s3175_s18 + $0x8] ss:$0 sps:$4 sm:$0x33]  }
 0x120   : > { %2053 = vmatprep.subr.bf16.mxu0 %v2752_v0  ;;  %2073 = vmatprep.subr.bf16.mxu1 %v2752_v0  ;;  %v2391_v58 = vld [vmem:[#allocation13 + $0x1c8] sm:$0xff]   ;;  %v2392_v59 = vld [vmem:[#allocation13 + $0x190] sm:$0xff]   ;;  %v2394_v61 = vld [vmem:[#allocation13 + $0x198] sm:$0xff]  }
 0x121   : > { %v2393_v60 = vld [vmem:[#allocation13 + $0x1d0] sm:$0xff]   ;;  %v2395_v62 = vld [vmem:[#allocation13 + $0x1d8] sm:$0xff]   ;;  %v2396_v63 = vld [vmem:[#allocation13 + $0x1a0] sm:$0xff]  }
 0x122   : > { %v2397_v1 = vld [vmem:[#allocation13 + $0x1e0] sm:$0xff]   ;;  %v2398_v2 = vld [vmem:[#allocation13 + $0x1a8] sm:$0xff]   ;;  %v2400_v4 = vld [vmem:[#allocation13 + $0x1b0] sm:$0xff]  }
 0x123   : > { %2054 = vmatpush3.bf16.msra.mxu0 %v2344_v11  ;;  %2074 = vmatpush3.bf16.msra.mxu1 %v2345_v12  ;;  %v2399_v3 = vld [vmem:[#allocation13 + $0x1e8] sm:$0xff]   ;;  %v2404_v5 = vld [vmem:[%s3175_s18] sm:$0xfc]   ;;  %v2408_v9 = vld [vmem:[%s3183_s14 + $0x8] ss:$0 sps:$4 sm:$0x33]  }
 0x124   : > { %2055 = vmatprep.subr.bf16.mxu0 %v2752_v0  ;;  %2075 = vmatprep.subr.bf16.mxu1 %v2752_v0  ;;  %v2401_v7 = vld [vmem:[#allocation13 + $0x1f0] sm:$0xff]   ;;  %v2402_v10 = vld [vmem:[#allocation13 + $0x1b8] sm:$0xff]   ;;  %v1266_v11 = vrot.slane %v2404_v5, 2  ;;  %v1267_v12 = vrot.slane %v2405_v6, 2  ;;  %s2660_s18 = scalar_lea.vmem %s2659_s23, 256 }
 0x125   : > { %v2407_v8 = vld [vmem:[%s3183_s14] sm:$0xfc]   ;;  %p2662_p11 = scmp.lt.s32.totalorder %s2660_s18, %s2654_s9 }
 0x127   : > { %2056 = vmatpush3.bf16.msra.mxu0 %v2346_v13  ;;  %2076 = vmatpush3.bf16.msra.mxu1 %v2347_v14  ;;  %v2403_v13 = vld [vmem:[#allocation13 + $0x1f8] sm:$0xff]   ;;  %v1389_v14 = vrot.slane %v2407_v8, 2  ;;  %p2663_p6 = por %p2662_p11, %p2661_p9 }
 0x128   : > { %2057 = vmatprep.subr.bf16.mxu0 %v2752_v0  ;;  %2077 = vmatprep.subr.bf16.mxu1 %v2752_v0 }
 0x129   : > { %p2664_p5 = pnand %p2663_p6, %p2657_p0 }
 0x12b   : > { %2058 = vmatpush3.bf16.msra.mxu0 %v2348_v15  ;;  %2078 = vmatpush3.bf16.msra.mxu1 %v2349_v16  ;;  %v1390_v15 = vrot.slane %v2408_v9, 2  ;;  %v1268_v16 = vsel %vm1265_vm1, %v1266_v11, %v1267_v12 }
 0x12c   : > { %2083 = vmatprep.subr.bf16.mxu0 %v2752_v0  ;;  %2103 = vmatprep.subr.bf16.mxu1 %v2752_v0 }
 0x12e   : > { %2060 = vmatmul.mubr.bf16.vlgmr.msra.gmra.mrb[0].mxu0 %v2350_v17  ;;  %2080 = vmatmul.mubr.bf16.vlgmr.msra.gmra.mrb[0].mxu1 %v2351_v18  ;;  %v2406_v17 = vld [vmem:[#allocation13 + $0x200] sm:$0xff]   ;;  %v1391_v18 = vsel %vm1265_vm1, %v1389_v14, %v1390_v15 }
 0x12f   : > { %2084 = vmatpush3.bf16.msra.mxu0 %v2352_v19  ;;  %2104 = vmatpush3.bf16.msra.mxu1 %v2353_v20  ;;  %v2409_v19 = vld [vmem:[#allocation13 + $0x208] sm:$0xff]   ;;  %v2410_v20 = vld [vmem:[#allocation13 + $0x210] sm:$0xff]   ;;  %v1946_v14 = vld [vmem:[#allocation14] ss:$0 sm:$0xff] }
 0x130   : > { %2085 = vmatprep.subr.bf16.mxu0 %v2752_v0  ;;  %2105 = vmatprep.subr.bf16.mxu1 %v2752_v0 }
 0x131   : > { %2099 = vmatprep.mubr.msk.bf16.mxu0 %vm2753_vm0, %v2752_v0  ;;  %2119 = vmatprep.mubr.msk.bf16.mxu1 %vm2753_vm0, %v2752_v0 }
 0x133   : > { %2086 = vmatpush3.bf16.msra.mxu0 %v2354_v21  ;;  %2106 = vmatpush3.bf16.msra.mxu1 %v2355_v22  ;;  %v2411_v21 = vld [vmem:[#allocation13 + $0x218] sm:$0xff]   ;;  %v2412_v22 = vld [vmem:[#allocation13 + $0x220] sm:$0xff]  }
 0x134   : > { %2087 = vmatprep.subr.bf16.mxu0 %v2752_v0  ;;  %2107 = vmatprep.subr.bf16.mxu1 %v2752_v0 }
 0x137   : > { %2088 = vmatpush3.bf16.msra.mxu0 %v2356_v23  ;;  %2108 = vmatpush3.bf16.msra.mxu1 %v2357_v24  ;;  %v2413_v23 = vld [vmem:[#allocation13 + $0x228] sm:$0xff]   ;;  %v2414_v24 = vld [vmem:[#allocation13 + $0x230] sm:$0xff]  }
 0x138   : > { %2089 = vmatprep.subr.bf16.mxu0 %v2752_v0  ;;  %2109 = vmatprep.subr.bf16.mxu1 %v2752_v0 }
 0x13b   : > { %2090 = vmatpush3.bf16.msra.mxu0 %v2358_v25  ;;  %2110 = vmatpush3.bf16.msra.mxu1 %v2359_v26  ;;  %v2416_v25 = vld [vmem:[%s3190_s10] sm:$0xfc]   ;;  %v2417_v26 = vld [vmem:[%s3190_s10 + $0x8] ss:$0 sps:$4 sm:$0x33]  }
 0x13c   : > { %2091 = vmatprep.subr.bf16.mxu0 %v2752_v0  ;;  %2111 = vmatprep.subr.bf16.mxu1 %v2752_v0 }
 0x13f   : > { %2092 = vmatpush3.bf16.msra.mxu0 %v2360_v27  ;;  %2112 = vmatpush3.bf16.msra.mxu1 %v2361_v28  ;;  %v2415_v27 = vld [vmem:[#allocation13 + $0x238] sm:$0xff]   ;;  %v1512_v28 = vrot.slane %v2416_v25, 2 }
 0x140   : > { %2093 = vmatprep.subr.bf16.mxu0 %v2752_v0  ;;  %2113 = vmatprep.subr.bf16.mxu1 %v2752_v0 }
 0x143   : > { %2094 = vmatpush3.bf16.msra.mxu0 %v2362_v29  ;;  %2114 = vmatpush3.bf16.msra.mxu1 %v2363_v30  ;;  %v1513_v29 = vrot.slane %v2417_v26, 2 }
 0x144   : > { %2095 = vmatprep.subr.bf16.mxu0 %v2752_v0  ;;  %2115 = vmatprep.subr.bf16.mxu1 %v2752_v0 }
 0x145   : > { %v1514_v30 = vsel %vm1265_vm1, %v1512_v28, %v1513_v29 }
 0x147   : > { %2096 = vmatpush3.bf16.msra.mxu0 %v2364_v31  ;;  %2116 = vmatpush3.bf16.msra.mxu1 %v2365_v32 }
 0x148   : > { %2097 = vmatprep.subr.bf16.mxu0 %v2752_v0  ;;  %2117 = vmatprep.subr.bf16.mxu1 %v2752_v0 }
 0x14b   : > { %2098 = vmatpush3.bf16.msra.mxu0 %v2366_v33  ;;  %2118 = vmatpush3.bf16.msra.mxu1 %v2367_v34 }
 0x14c   : > { %2123 = vmatprep.subr.bf16.mxu0 %v2752_v0  ;;  %2143 = vmatprep.subr.bf16.mxu1 %v2752_v0 }
 0x14e   : > { %2100 = vmatmul.mubr.bf16.vlgmr.msra.gmra.mrb[4].mxu0 %v2368_v35  ;;  %2120 = vmatmul.mubr.bf16.vlgmr.msra.gmra.mrb[4].mxu1 %v2370_v37 }
 0x14f   : > { %2124 = vmatpush3.bf16.msra.mxu0 %v2369_v36  ;;  %2144 = vmatpush3.bf16.msra.mxu1 %v2371_v38 }
 0x150   : > { %2125 = vmatprep.subr.bf16.mxu0 %v2752_v0  ;;  %2145 = vmatprep.subr.bf16.mxu1 %v2752_v0 }
 0x151   : > { %2139 = vmatprep.mubr.msk.bf16.mxu0 %vm2753_vm0, %v2752_v0  ;;  %2159 = vmatprep.mubr.msk.bf16.mxu1 %vm2753_vm0, %v2752_v0 }
 0x153   : > { %2126 = vmatpush3.bf16.msra.mxu0 %v2372_v39  ;;  %2146 = vmatpush3.bf16.msra.mxu1 %v2373_v40 }
 0x154   : > { %2127 = vmatprep.subr.bf16.mxu0 %v2752_v0  ;;  %2147 = vmatprep.subr.bf16.mxu1 %v2752_v0 }
 0x157   : > { %2128 = vmatpush3.bf16.msra.mxu0 %v2374_v41  ;;  %2148 = vmatpush3.bf16.msra.mxu1 %v2375_v42 }
 0x158   : > { %2129 = vmatprep.subr.bf16.mxu0 %v2752_v0  ;;  %2149 = vmatprep.subr.bf16.mxu1 %v2752_v0 }
 0x15b   : > { %2130 = vmatpush3.bf16.msra.mxu0 %v2376_v43  ;;  %2150 = vmatpush3.bf16.msra.mxu1 %v2377_v44 }
 0x15c   : > { %2131 = vmatprep.subr.bf16.mxu0 %v2752_v0  ;;  %2151 = vmatprep.subr.bf16.mxu1 %v2752_v0 }
 0x15f   : > { %2132 = vmatpush3.bf16.msra.mxu0 %v2378_v45  ;;  %2152 = vmatpush3.bf16.msra.mxu1 %v2379_v46 }
 0x160   : > { %2133 = vmatprep.subr.bf16.mxu0 %v2752_v0  ;;  %2153 = vmatprep.subr.bf16.mxu1 %v2752_v0 }
 0x163   : > { %2134 = vmatpush3.bf16.msra.mxu0 %v2380_v47  ;;  %2154 = vmatpush3.bf16.msra.mxu1 %v2381_v48 }
 0x164   : > { %2135 = vmatprep.subr.bf16.mxu0 %v2752_v0  ;;  %2155 = vmatprep.subr.bf16.mxu1 %v2752_v0 }
 0x167   : > { %2136 = vmatpush3.bf16.msra.mxu0 %v2382_v49  ;;  %2156 = vmatpush3.bf16.msra.mxu1 %v2383_v50 }
 0x168   : > { %2137 = vmatprep.subr.bf16.mxu0 %v2752_v0  ;;  %2157 = vmatprep.subr.bf16.mxu1 %v2752_v0 }
 0x16b   : > { %2138 = vmatpush3.bf16.msra.mxu0 %v2384_v51  ;;  %2158 = vmatpush3.bf16.msra.mxu1 %v2385_v52 }
 0x16c   : > { %2163 = vmatprep.subr.bf16.mxu0 %v2752_v0  ;;  %2183 = vmatprep.subr.bf16.mxu1 %v2752_v0 }
 0x16e   : > { %2140 = vmatmul.mubr.bf16.vlgmr.msra.gmra.mrb[8].mxu0 %v2386_v53  ;;  %2160 = vmatmul.mubr.bf16.vlgmr.msra.gmra.mrb[8].mxu1 %v2388_v55 }
 0x16f   : > { %2164 = vmatpush3.bf16.msra.mxu0 %v2387_v54  ;;  %2184 = vmatpush3.bf16.msra.mxu1 %v2389_v56 }
 0x170   : > { %2165 = vmatprep.subr.bf16.mxu0 %v2752_v0  ;;  %2185 = vmatprep.subr.bf16.mxu1 %v2752_v0 }
 0x171   : > { %2179 = vmatprep.mubr.msk.bf16.mxu0 %vm2753_vm0, %v2752_v0  ;;  %2199 = vmatprep.mubr.msk.bf16.mxu1 %vm2753_vm0, %v2752_v0 }
 0x173   : > { %2166 = vmatpush3.bf16.msra.mxu0 %v2390_v57  ;;  %2186 = vmatpush3.bf16.msra.mxu1 %v2391_v58 }
 0x174   : > { %2167 = vmatprep.subr.bf16.mxu0 %v2752_v0  ;;  %2187 = vmatprep.subr.bf16.mxu1 %v2752_v0 }
 0x177   : > { %2168 = vmatpush3.bf16.msra.mxu0 %v2392_v59  ;;  %2188 = vmatpush3.bf16.msra.mxu1 %v2393_v60 }
 0x178   : > { %2169 = vmatprep.subr.bf16.mxu0 %v2752_v0  ;;  %2189 = vmatprep.subr.bf16.mxu1 %v2752_v0 }
 0x17b   : > { %2170 = vmatpush3.bf16.msra.mxu0 %v2394_v61  ;;  %2190 = vmatpush3.bf16.msra.mxu1 %v2395_v62 }
 0x17c   : > { %2171 = vmatprep.subr.bf16.mxu0 %v2752_v0  ;;  %2191 = vmatprep.subr.bf16.mxu1 %v2752_v0 }
 0x17f   : > { %2172 = vmatpush3.bf16.msra.mxu0 %v2396_v63  ;;  %2192 = vmatpush3.bf16.msra.mxu1 %v2397_v1 }
 0x180   : > { %2173 = vmatprep.subr.bf16.mxu0 %v2752_v0  ;;  %2193 = vmatprep.subr.bf16.mxu1 %v2752_v0 }
 0x183   : > { %2174 = vmatpush3.bf16.msra.mxu0 %v2398_v2  ;;  %2194 = vmatpush3.bf16.msra.mxu1 %v2399_v3 }
 0x184   : > { %2175 = vmatprep.subr.bf16.mxu0 %v2752_v0  ;;  %2195 = vmatprep.subr.bf16.mxu1 %v2752_v0 }
 0x187   : > { %2176 = vmatpush3.bf16.msra.mxu0 %v2400_v4  ;;  %2196 = vmatpush3.bf16.msra.mxu1 %v2401_v7 }
 0x188   : > { %2177 = vmatprep.subr.bf16.mxu0 %v2752_v0  ;;  %2197 = vmatprep.subr.bf16.mxu1 %v2752_v0 }
 0x18b   : > { %2178 = vmatpush3.bf16.msra.mxu0 %v2402_v10  ;;  %2198 = vmatpush3.bf16.msra.mxu1 %v2403_v13 }
 0x18c   : > { %2203 = vmatprep.subr.bf16.mxu0 %v2752_v0 }
 0x18e   : > { %2180 = vmatmul.mubr.bf16.vlgmr.msra.gmra.mrb[12].mxu0 %v1268_v16  ;;  %2200 = vmatmul.mubr.bf16.vlgmr.msra.gmra.mrb[12].mxu1 %v1391_v18 }
 0x18f   : > { %2204 = vmatpush3.bf16.msra.mxu0 %v2406_v17  ;;  %2219 = vmatprep.mubr.msk.bf16.mxu0 %vm2753_vm0, %v2752_v0 }
 0x190   : > { %2205 = vmatprep.subr.bf16.mxu0 %v2752_v0 }
 0x193   : > { %2206 = vmatpush3.bf16.msra.mxu0 %v2409_v19 }
 0x194   : > { %2207 = vmatprep.subr.bf16.mxu0 %v2752_v0 }
 0x197   : > { %2208 = vmatpush3.bf16.msra.mxu0 %v2410_v20 }
 0x198   : > { %2209 = vmatprep.subr.bf16.mxu0 %v2752_v0 }
 0x19b   : > { %2210 = vmatpush3.bf16.msra.mxu0 %v2411_v21 }
 0x19c   : > { %2211 = vmatprep.subr.bf16.mxu0 %v2752_v0 }
 0x19f   : > { %2212 = vmatpush3.bf16.msra.mxu0 %v2412_v22 }
 0x1a0   : > { %2213 = vmatprep.subr.bf16.mxu0 %v2752_v0 }
 0x1a3   : > { %2214 = vmatpush3.bf16.msra.mxu0 %v2413_v23 }
 0x1a4   : > { %2215 = vmatprep.subr.bf16.mxu0 %v2752_v0 }
 0x1a7   : > { %2216 = vmatpush3.bf16.msra.mxu0 %v2414_v24 }
 0x1a8   : > { %2217 = vmatprep.subr.bf16.mxu0 %v2752_v0 }
 0x1ab   : > { %2218 = vmatpush3.bf16.msra.mxu0 %v2415_v27 }
 0x1ae   : > { %2220 = vmatmul.mubr.bf16.vlgmr.msra.gmra.mrb[16].mxu0 %v1514_v30 }
 0x201   : > { %v671_v31 = vpop.f32.mrb[0].mxu0  ;;  %v766_v32 = vpop.f32.mrb[0].mxu1 }
 0x202   : > { %v2061_v33 = vpop.f32.mrb[1].mxu0  ;;  %v767_v34 = vadd.f32 %v766_v32, %v671_v31  ;;  %v2081_v35 = vpop.f32.mrb[1].mxu1 }
 0x203   : > { %v674_v36 = vpop.f32.mrb[2].mxu0  ;;  %v769_v37 = vpop.f32.mrb[2].mxu1 }
 0x204   : > { %v2062_v38 = vpop.f32.mrb[3].mxu0  ;;  %v770_v39 = vadd.f32 %v769_v37, %v674_v36  ;;  %v2082_v40 = vpop.f32.mrb[3].mxu1 }
 0x221   : > { %v880_v41 = vpop.f32.mrb[4].mxu0  ;;  %v996_v44 = vpop.f32.mrb[4].mxu1 }
 0x222   : > { %v887_v42 = vadd.f32 %v880_v41, %v767_v34  ;;  %v2101_v43 = vpop.f32.mrb[5].mxu0  ;;  %v2121_v0 = vpop.f32.mrb[5].mxu1 }
 0x223   : > { %v883_v45 = vpop.f32.mrb[6].mxu0  ;;  %v999_v49 = vpop.f32.mrb[6].mxu1 }
 0x224   : > { %v888_v46 = vadd.f32 %v883_v45, %v770_v39  ;;  %v1003_v47 = vadd.f32 %v996_v44, %v887_v42  ;;  %v2102_v48 = vpop.f32.mrb[7].mxu0  ;;  %v2122_v50 = vpop.f32.mrb[7].mxu1 }
 0x226   : > { %v1004_v51 = vadd.f32 %v999_v49, %v888_v46 }
 0x241   : > { %v1112_v52 = vpop.f32.mrb[8].mxu0  ;;  %v1228_v55 = vpop.f32.mrb[8].mxu1 }
 0x242   : > { %v1119_v53 = vadd.f32 %v1112_v52, %v1003_v47  ;;  %v2141_v54 = vpop.f32.mrb[9].mxu0  ;;  %v2161_v57 = vpop.f32.mrb[9].mxu1 }
 0x243   : > { %v1115_v56 = vpop.f32.mrb[10].mxu0  ;;  %v1231_v61 = vpop.f32.mrb[10].mxu1 }
 0x244   : > { %v1120_v58 = vadd.f32 %v1115_v56, %v1004_v51  ;;  %v1235_v59 = vadd.f32 %v1228_v55, %v1119_v53  ;;  %v2142_v60 = vpop.f32.mrb[11].mxu0  ;;  %v2162_v62 = vpop.f32.mrb[11].mxu1 }
 0x246   : > { %v1236_v63 = vadd.f32 %v1231_v61, %v1120_v58 }
 0x261   : > { %v1352_v1 = vpop.f32.mrb[12].mxu0  ;;  %v1475_v4 = vpop.f32.mrb[12].mxu1 }
 0x262   : > { %v1359_v2 = vadd.f32 %v1352_v1, %v1235_v59  ;;  %v2181_v3 = vpop.f32.mrb[13].mxu0  ;;  %v2201_v6 = vpop.f32.mrb[13].mxu1 }
 0x263   : > { %v1355_v5 = vpop.f32.mrb[14].mxu0  ;;  %v1478_v10 = vpop.f32.mrb[14].mxu1 }
 0x264   : > { %v1360_v7 = vadd.f32 %v1355_v5, %v1236_v63  ;;  %v1482_v8 = vadd.f32 %v1475_v4, %v1359_v2  ;;  %v2182_v9 = vpop.f32.mrb[15].mxu0  ;;  %v2202_v11 = vpop.f32.mrb[15].mxu1 }
 0x266   : > { %v1483_v12 = vadd.f32 %v1478_v10, %v1360_v7 }
 0x281   : > { %v1598_v13 = vpop.f32.mrb[16].mxu0 }
 0x282   : > { %v1605_v15 = vadd.f32 %v1598_v13, %v1482_v8  ;;  %v2221_v16 = vpop.f32.mrb[17].mxu0 }
 0x283   : > { %v1601_v17 = vpop.f32.mrb[18].mxu0 }
 0x284   : > { %v1614_v18 = vadd.f32 %v1946_v14, %v1605_v15  ;;  %v1606_v19 = vadd.f32 %v1601_v17, %v1483_v12  ;;  %v2222_v20 = vpop.f32.mrb[19].mxu0 }
 0x286   : > { %v1618_v21 = vmul.f32 0.01, %v1614_v18  ;;  %v1615_v22 = vadd.f32 %v1946_v14, %v1606_v19  ;;  %vm1616_vm2 = vcmp.ge.f32.partialorder %v1614_v18, 0.0 }
 0x288   : > { %vm1617_vm3 = vcmp.ge.f32.partialorder %v1615_v22, 0.0  ;;  %v1619_v23 = vmul.f32 0.01, %v1615_v22  ;;  %v1620_v24 = vsel %vm1616_vm2, %v1614_v18, %v1618_v21 }
 0x28a   : > { %v1621_v25 = vsel %vm1617_vm3, %v1615_v22, %v1619_v23 }
 0x28b   : > { %v1960_v26 = vpack.c.bf16 %v1621_v25, %v1620_v24 }
 0x28d   : > { %1961 = vst [vmem:[%s544_s1] sm:$0xff] %v1960_v26  }
 0x28e   : > { %2667 = shalt.err (!%p2664_p5)
}
 0x28f   : > { %s2668_s19 = scalar_lea.hbm %s3324_s0, 128  ;;  %s2672_s10 = scalar_lea.hbm %s3445_s21, 256 }
 0x290   : > { %p2669_p12 = scmp.ne.s32.totalorder %s3324_s0, %s2668_s19  ;;  %p2673_p13 = scmp.lt.u32.totalorder %s3324_s0, %s3445_s21 }
 0x291   : > { %p2674_p7 = scmp.lt.u32.totalorder %s2672_s10, %s2668_s19  ;;  %p2676_p3 = scmp.lt.u32.totalorder %s2668_s19, %s3324_s0 }
 0x292   : > { %p2670_p1 = pnand %p2669_p12, %p3446_p8 }
 0x293   : > { %p2675_p2 = por %p2674_p7, %p2673_p13 }
 0x294   : > { %p2671_p4 = pneg %p2670_p1 }
 0x295   : > { %p2677_p10 = por %p2676_p3, %p2675_p2 }
 0x297   : > { %p2678_p0 = pnand %p2677_p10, %p2671_p4 }
 0x299   : > { %2681 = shalt.err (!%p2678_p0)
}
 0x29a   : > { %s2755_s20 = smov 64   ;;  %s2756_s22 = smov 4  }
 0x29b   : > { %2256 = dma.vmem_to_hbm [thread:$0]  (%p3446_p8), %s3326_s12, 128, %s3324_s0, %s1633_s15, %s2755_s20, %s2755_s20, %s2756_s22  }
 0x29c PF: > { %s3447_s27 = sld [smem:[#allocation24_spill]]  ;;  %s3448_s16 = sld [smem:[#allocation29_spill]] }
 0x29d   : > { %s3449_s6 = sld [smem:[#allocation25_spill]] }
 0x2a2   : > { %s1661_s1 = sand.u32 1, %s3447_s27   ;;  %p3450_p9 = scmp.ne.s32.totalorder %s3448_s16, 0 }
 0x2a3   : > { %p3451_p11 = scmp.ge.s32.totalorder %s3449_s6, 2  ;;  %s1662_s17 = scalar_lea.sflag [#allocation4], %s1661_s1 }
 0x2a5   : > { %p2285_p6 = pnand %p3451_p11, %p3450_p9 }
 0x2a7   : > { %2723 = dma.done.wait (!%p2285_p6), %s1662_s17, 128  }
 0x2a8   : > { %2725 = vsyncadd (!%p2285_p6), %s1662_s17, 4294967168  ;;  %s3452_s30 = sld [smem:[#allocation26_spill]]  ;;  %s3453_s24 = sld [smem:[#allocation27_spill]] }
 0x2a9   : > { %s3454_s27 = smov %s2732_s28  ;;  %s3455_s28 = smov %s2736_s29 }
 0x2ae   : > { %p31_p5 = scmp.ge.s32.totalorder %s3452_s30, 4   ;;  %s3456_s29 = smov %s3453_s24 }
 0x2b0   :  { %33 = sbr.rel (!%p31_p5) target bundleno = 17 (0x11), region = 174 }
 0x2b7   :  { %1667 = vsyncpa [#allocation3], 1 }
 0x2b8   :  { %1669 = vsyncpa [#allocation3 + $0x1], 1 }
 0x2b9   :  { %1670 = vsyncpa [#allocation6], 1 }
 0x2ba   :  { %1672 = vsyncpa [#allocation6 + $0x1], 1 }
 0x2bb   :  { %1673 = vsyncpa [#allocation9], 1 }
 0x2bc   :  { %1675 = vsyncpa [#allocation9 + $0x1], 1 }
 0x2bd   :  { %1676 = vsyncpa [#allocation12], 1 }
 0x2be   :  { %1678 = vsyncpa [#allocation12 + $0x1], 1 }
 0x2bf   :  { %1679 = vsyncpa [#allocation15], 1 }
 0x2c0   :  { %1680 = vsyncpa [#allocation4], 1 }
 0x2c1   :  { %1682 = vsyncpa [#allocation4 + $0x1], 1 }

// kernel: a_call__.6
= control target key start
LH: loop header
LB: loop body
LE: loop exit
PB: predicated region body
PF: predicated region fallthrough
CT: control target
= control target key end

     0   :  { %s3165_s0 = inlined_call_operand.hbm [shape: bf16[2,6,128], index: 0, kind: input, shape index: {}]   ;;  %s3166_s1 = inlined_call_operand.hbm [shape: bf16[2,6,128], index: 1, kind: input, shape index: {}]   ;;  %s3167_s2 = inlined_call_operand.hbm [shape: bf16[2,6,128], index: 2, kind: input, shape index: {}]   ;;  %s3168_s3 = inlined_call_operand.hbm [shape: bf16[2,6,128], index: 3, kind: input, shape index: {}]   ;;  %s3169_s4 = inlined_call_operand.hbm [shape: bf16[2,6,128], index: 4, kind: input, shape index: {}]   ;;  %s3170_s5 = inlined_call_operand.hbm [shape: bf16[2,6,128], index: 5, kind: input, shape index: {}]   ;;  %s3171_s6 = inlined_call_operand.hbm [shape: bf16[9,128,128], index: 6, kind: input, shape index: {}]   ;;  %s3172_s7 = inlined_call_operand.hbm [shape: f32[1,128], index: 7, kind: input, shape index: {}]   ;;  %s3173_s8 = inlined_call_operand.hbm [shape: bf16[2,4,128], index: 8, kind: output, shape index: {}]  }
   0x1   :  { %3192 = sst [smem:[#allocation29_spill]] %s3165_s0 }
   0x2   :  { %3193 = sst [smem:[#allocation30_spill]] %s3166_s1 }
   0x3   :  { %3194 = sst [smem:[#allocation31_spill]] %s3168_s3 }
   0x4   :  { %3195 = sst [smem:[#allocation32_spill]] %s3171_s6 }
   0x5   :  { %13 = vsyncpa [#allocation3], 0 }
   0x6   :  { %15 = vsyncpa [#allocation3 + $0x1], 0 }
   0x7   :  { %16 = vsyncpa [#allocation6], 0 }
   0x8   :  { %18 = vsyncpa [#allocation6 + $0x1], 0 }
   0x9   :  { %19 = vsyncpa [#allocation9], 0 }
   0xa   :  { %21 = vsyncpa [#allocation9 + $0x1], 0 }
   0xb   :  { %22 = vsyncpa [#allocation12], 0 }
   0xc   :  { %24 = vsyncpa [#allocation12 + $0x1], 0 }
   0xd   :  { %25 = vsyncpa [#allocation15], 0 }
   0xe   :  { %26 = vsyncpa [#allocation4], 0 }
   0xf   :  { %28 = vsyncpa [#allocation4 + $0x1], 0  ;;  %s2649_s27 = smov 0   ;;  %s2651_s28 = smov 0  }
  0x10   :  { %s2653_s29 = smov 0   ;;  %s2655_s30 = smov 0  }
  0x11 LB: > { %3196 = sst [smem:[#allocation24_spill]] %s2577_s27  ;;  %s2670_s9 = sadd.s32 4294967295, %s2589_s30   ;;  %s2589_s30 = sphi %s2655_s30, %s3239_s30   ;;  %s2585_s29 = sphi %s2653_s29, %s3243_s29   ;;  %s2581_s28 = sphi %s2651_s28, %s3242_s28   ;;  %s2577_s27 = sphi %s2649_s27, %s3241_s27  }
  0x12   : > { %3197 = sst [smem:[#allocation25_spill]] %s2589_s30  ;;  %s1728_s10 = sadd.s32 4294967294, %s2589_s30  }
  0x13   : > { %s2674_s11 = sadd.s32 1, %s2589_s30   ;;  %s41_s12 = sadd.s32 1, %s2585_s29 }
  0x14   : > { %3198 = sst [smem:[#allocation26_spill]] %s2674_s11  ;;  %s38_s13 = ssub.s32 %s2589_s30, %s2674_s11 }
  0x15   : > { %p48_p0 = scmp.ne.s32.totalorder %s2585_s29, %s2581_s28  ;;  %p39_p1 = scmp.eq.s32.totalorder %s38_s13, 0 }
  0x16   : > { %p49_p2 = scmp.eq.s32.totalorder %s2589_s30, 0  ;;  %p54_p3 = scmp.ne.s32.totalorder %s2581_s28, %s2577_s27 }
  0x17   : > { %p3175_p4 = scmp.eq.s32.totalorder %s2670_s9, 0  ;;  %p250_p7 = scmp.eq.s32.totalorder %s2670_s9, 1 }
  0x18   : > { %s2686_s14 = scalar_select %p39_p1, %s2585_s29, %s41_s12  }
  0x19   : > { %p2688_p5 = por %p49_p2, %p48_p0  ;;  %p2694_p6 = por %p3175_p4, %p54_p3 }
  0x1a   : > { %3199 = sst [smem:[#allocation27_spill]] %s2686_s14  ;;  %p256_p8 = scmp.eq.s32.totalorder %s1728_s10, 1 }
  0x1b   : > { %s3200_s15 = scalar_select %p2688_p5, 1, 0 }
  0x1c   : > { %s3201_s16 = scalar_select %p2694_p6, 1, 0 }
  0x1d   : > { %p1729_p9 = scmp.ge.s32.totalorder %s2589_s30, 1  ;;  %p263_p10 = scmp.lt.s32.totalorder %s2589_s30, 3 }
  0x1e   : > { %p2701_p11 = por %p250_p7, %p48_p0  ;;  %p2705_p12 = por %p256_p8, %p54_p3 }
  0x1f   : > { %p2709_p13 = pnand %p1729_p9, %p263_p10  ;;  %s2591_s20 = smov [#allocation13]  }
  0x20   : > { %s3202_s17 = scalar_select %p2701_p11, 1, 0 }
  0x21   : > { %s3203_s18 = scalar_select %p2705_p12, 1, 0 }
  0x22   : > { %s3205_s19 = scalar_select %p2709_p13, 1, 0 }
  0x23   : > { %3204 = sst [smem:[#allocation28_spill]] %s3203_s18  ;;  %p2118_p1 = pneg %p2709_p13 }
  0x24   : > { %s275_s21 = sshll.u32 %s2591_s20, 4  ;;  %s3174_s23 = sand.u32 1, %s2585_s29   ;;  %s276_s21 = int_to_ptr.vmem [resolvable:$true] %s275_s21 }
  0x25   : > { %p2717_p2 = pnand %p2118_p1, %p3175_p4  ;;  %s2726_s24 = sshll.u32 %s3174_s23, 2 }
  0x26   : > { %s3207_s6 = sld [smem:[#allocation32_spill]] }
  0x27   : > { %s3206_s22 = scalar_select %p2717_p2, 1, 0 }
  0x28   : > { %p3182_p8 = pneg %p2717_p2 }
  0x2c   : > { %s2267_s10 = scalar_lea.hbm %s3207_s6, 9216 }
  0x2d   : > { %p2268_p7 = scmp.ne.s32.totalorder %s3207_s6, %s2267_s10  ;;  %p2274_p1 = scmp.lt.u32.totalorder %s2267_s10, %s3207_s6 }
  0x2f   : > { %p2270_p9 = pnand %p3182_p8, %p2268_p7 }
  0x31   : > { %p2271_p10 = pneg %p2270_p9 }
  0x33   : > { %p2276_p0 = pnand %p2274_p1, %p2271_p10 }
  0x35   : > { %2279 = shalt.err (!%p2276_p0)
}
  0x36   : > { %s2280_s23 = scalar_lea.vmem %s276_s21, 9216  ;;  %p2288_p11 = scmp.lt.s32.totalorder %s276_s21, %s276_s21 }
  0x37   : > { %p2281_p4 = scmp.ne.s32.totalorder %s276_s21, %s2280_s23  ;;  %p2289_p6 = scmp.lt.s32.totalorder %s2280_s23, %s2280_s23 }
  0x39   : > { %p2283_p3 = pnand %p2281_p4, %p3182_p8  ;;  %p2290_p13 = por %p2289_p6, %p2288_p11 }
  0x3b   : > { %p2284_p12 = pneg %p2283_p3 }
  0x3d   : > { %p2291_p5 = pnand %p2290_p13, %p2284_p12 }
  0x3f   : > { %2294 = shalt.err (!%p2291_p5)
}
  0x40   : > { %s2592_s25 = smov 64   ;;  %s2593_s14 = smov 4  }
  0x41   : > { %2121 = dma.hbm_to_vmem [thread:$0]  (!%p2717_p2), %s3207_s6, 9216, %s276_s21, [#allocation12], %s2592_s25, %s2592_s25, %s2593_s14  }
  0x42   : > { %p3208_p4 = scmp.ne.s32.totalorder %s3200_s15, 0  ;;  %p3209_p0 = scmp.lt.s32.totalorder %s2589_s30, 2 }
  0x43   : > { %s2759_s12 = sshll.u32 %s2589_s30, 6  ;;  %s2762_s13 = sand.u32 1, %s2589_s30  }
  0x44   : > { %p2754_p3 = pnand %p3209_p0, %p3208_p4  ;;  %s3211_s1 = sld [smem:[#allocation30_spill]] }
  0x45   : > { %s322_s15 = scalar_lea.vmem [#allocation5], %s2726_s24 }
  0x46   : > { %s3210_s23 = scalar_select %p2754_p3, 1, 0 }
  0x47   : > { %s329_s21 = sshll.u32 %s322_s15, 4  ;;  %p2778_p6 = pneg %p2754_p3  ;;  %s2771_s21 = int_to_ptr.vmem [resolvable:$true] %s329_s21 }
  0x49   : > { %s3212_s26 = scalar_select %p2778_p6, 1, 0 }
  0x4a   : > { %s2768_s18 = scalar_lea.hbm %s3211_s1, %s2759_s12  ;;  %s2300_s20 = scalar_lea.hbm %s3211_s1, 128 }
  0x4b   : > { %s2295_s14 = scalar_lea.hbm %s2768_s18, 64  ;;  %p2301_p13 = scmp.lt.u32.totalorder %s2768_s18, %s3211_s1 }
  0x4c   : > { %p2296_p5 = scmp.ne.s32.totalorder %s2768_s18, %s2295_s14  ;;  %p2302_p7 = scmp.lt.u32.totalorder %s2300_s20, %s2295_s14 }
  0x4d   : > { %p2304_p10 = scmp.lt.u32.totalorder %s2295_s14, %s2768_s18 }
  0x4e   : > { %p2298_p11 = pnand %p2778_p6, %p2296_p5  ;;  %p2303_p9 = por %p2302_p7, %p2301_p13 }
  0x50   : > { %p2299_p12 = pneg %p2298_p11  ;;  %p2305_p1 = por %p2304_p10, %p2303_p9 }
  0x52   : > { %p2306_p4 = pnand %p2305_p1, %p2299_p12 }
  0x54   : > { %2309 = shalt.err (!%p2306_p4)
}
  0x55   : > { %s2310_s25 = scalar_lea.vmem %s2771_s21, 64  ;;  %s2594_s11 = smov [#allocation5]  }
  0x56   : > { %p2311_p0 = scmp.ne.s32.totalorder %s2771_s21, %s2310_s25  ;;  %s2315_s10 = sshll.u32 %s2594_s11, 4  ;;  %s2316_s10 = int_to_ptr.vmem [resolvable:$false] %s2315_s10 }
  0x57   : > { %s2317_s6 = scalar_lea.vmem %s2316_s10, 128  ;;  %p2318_p8 = scmp.lt.s32.totalorder %s2771_s21, %s2316_s10 }
  0x58   : > { %p2313_p5 = pnand %p2311_p0, %p2778_p6  ;;  %p2319_p2 = scmp.lt.s32.totalorder %s2317_s6, %s2310_s25 }
  0x5a   : > { %p2314_p11 = pneg %p2313_p5  ;;  %p2320_p13 = por %p2319_p2, %p2318_p8 }
  0x5c   : > { %p2321_p7 = pnand %p2320_p13, %p2314_p11 }
  0x5e   : > { %2324 = shalt.err (!%p2321_p7)
}
  0x5f   : > { %s3213_s14 = scalar_lea.sflag [#allocation6], %s2762_s13  ;;  %s3214_s3 = sld [smem:[#allocation31_spill]] }
  0x60   : > { %2131 = dma.hbm_to_vmem [thread:$0]  (!%p2754_p3), %s2768_s18, 64, %s2771_s21, %s3213_s14  }
  0x61   : > { %s358_s25 = scalar_lea.vmem [#allocation8], %s2726_s24  ;;  %s2595_s6 = smov [#allocation14]  }
  0x62   : > { %s365_s10 = sshll.u32 %s358_s25, 4  ;;  %s2812_s1 = sshll.u32 %s2595_s6, 4  ;;  %s2810_s10 = int_to_ptr.vmem [resolvable:$true] %s365_s10  ;;  %s290_s1 = int_to_ptr.vmem [resolvable:$true] %s2812_s1 }
  0x63   : > { %s3191_s30 = scalar_lea.sflag [#allocation9], %s2762_s13 }
  0x65   : > { %s2807_s11 = scalar_lea.hbm %s3214_s3, %s2759_s12  ;;  %s2330_s14 = scalar_lea.hbm %s3214_s3, 128 }
  0x66   : > { %s2325_s27 = scalar_lea.hbm %s2807_s11, 64  ;;  %p2331_p9 = scmp.lt.u32.totalorder %s2807_s11, %s3214_s3 }
  0x67   : > { %p2326_p2 = scmp.ne.s32.totalorder %s2807_s11, %s2325_s27  ;;  %p2332_p10 = scmp.lt.u32.totalorder %s2330_s14, %s2325_s27 }
  0x68   : > { %p2334_p4 = scmp.lt.u32.totalorder %s2325_s27, %s2807_s11 }
  0x69   : > { %p2328_p8 = pnand %p2326_p2, %p2778_p6  ;;  %p2333_p1 = por %p2332_p10, %p2331_p9 }
  0x6b   : > { %p2329_p12 = pneg %p2328_p8  ;;  %p2335_p0 = por %p2334_p4, %p2333_p1 }
  0x6d   : > { %p2336_p5 = pnand %p2335_p0, %p2329_p12 }
  0x6f   : > { %2339 = shalt.err (!%p2336_p5)
}
  0x70   : > { %s2340_s25 = scalar_lea.vmem %s2810_s10, 64  ;;  %s2596_s6 = smov [#allocation8]  }
  0x71   : > { %p2341_p11 = scmp.ne.s32.totalorder %s2810_s10, %s2340_s25  ;;  %s2345_s18 = sshll.u32 %s2596_s6, 4  ;;  %s2346_s18 = int_to_ptr.vmem [resolvable:$false] %s2345_s18 }
  0x72   : > { %s2347_s21 = scalar_lea.vmem %s2346_s18, 128  ;;  %p2348_p2 = scmp.lt.s32.totalorder %s2810_s10, %s2346_s18 }
  0x73   : > { %p2343_p13 = pnand %p2341_p11, %p2778_p6  ;;  %p2349_p8 = scmp.lt.s32.totalorder %s2347_s21, %s2340_s25 }
  0x75   : > { %p2344_p7 = pneg %p2343_p13  ;;  %p2350_p9 = por %p2349_p8, %p2348_p2 }
  0x77   : > { %p2351_p10 = pnand %p2350_p9, %p2344_p7 }
  0x79   : > { %2354 = shalt.err (!%p2351_p10)
}
  0x7a   : > { %2137 = dma.hbm_to_vmem [thread:$0]  (!%p2754_p3), %s2807_s11, 64, %s2810_s10, %s3191_s30  }
  0x7b   : > { %s2355_s20 = scalar_lea.hbm %s3172_s7, 16  ;;  %p3215_p1 = scmp.ne.s32.totalorder %s3206_s22, 0 }
  0x7c   : > { %p2356_p12 = scmp.ne.s32.totalorder %s3172_s7, %s2355_s20  ;;  %p2362_p11 = scmp.lt.u32.totalorder %s2355_s20, %s3172_s7 }
  0x7d   : > { %p3216_p4 = pneg %p3215_p1 }
  0x7f   : > { %p2358_p0 = pnand %p2356_p12, %p3216_p4 }
  0x81   : > { %p2359_p5 = pneg %p2358_p0 }
  0x83   : > { %p2364_p13 = pnand %p2362_p11, %p2359_p5 }
  0x85   : > { %2367 = shalt.err (!%p2364_p13)
}
  0x86   : > { %s2368_s11 = scalar_lea.vmem %s290_s1, 16  ;;  %p3217_p2 = pmov %p3216_p4 }
  0x87   : > { %p2369_p7 = scmp.ne.s32.totalorder %s290_s1, %s2368_s11  ;;  %s2375_s10 = scalar_lea.vmem %s290_s1, 32 }
  0x88   : > { %p2376_p10 = scmp.lt.s32.totalorder %s290_s1, %s290_s1  ;;  %p2377_p3 = scmp.lt.s32.totalorder %s2375_s10, %s2368_s11 }
  0x89   : > { %p2371_p8 = pnand %p2369_p7, %p3217_p2 }
  0x8a   : > { %p2378_p6 = por %p2377_p3, %p2376_p10 }
  0x8b   : > { %p2372_p9 = pneg %p2371_p8 }
  0x8d   : > { %p2379_p4 = pnand %p2378_p6, %p2372_p9 }
  0x8f   : > { %2382 = shalt.err (!%p2379_p4)
}
  0x90   : > { %2124 = dma.hbm_to_vmem [thread:$0]  (!%p3215_p1), %s3172_s7, 16, %s290_s1, [#allocation15]  }
  0x91   : > { %s3218_s0 = sld [smem:[#allocation29_spill]]  ;;  %s304_s6 = scalar_lea.vmem [#allocation2], %s2726_s24 }
  0x92   : > { %s311_s22 = sshll.u32 %s304_s6, 4  ;;  %s2872_s11 = scalar_lea.hbm %s3167_s2, %s2759_s12  ;;  %s2866_s22 = int_to_ptr.vmem [resolvable:$true] %s311_s22 }
  0x93   : > { %s3219_s10 = sand.u32 1, %s2585_s29   ;;  %p3220_p6 = scmp.ne.s32.totalorder %s3212_s26, 0 }
  0x94   : > { %s301_s1 = scalar_lea.sflag [#allocation3], %s3219_s10 }
  0x97   : > { %s2863_s15 = scalar_lea.hbm %s3218_s0, %s2759_s12  ;;  %s2388_s20 = scalar_lea.hbm %s3218_s0, 128 }
  0x98   : > { %s2383_s21 = scalar_lea.hbm %s2863_s15, 64  ;;  %p2389_p0 = scmp.lt.u32.totalorder %s2863_s15, %s3218_s0 }
  0x99   : > { %p2384_p3 = scmp.ne.s32.totalorder %s2863_s15, %s2383_s21  ;;  %p2390_p5 = scmp.lt.u32.totalorder %s2388_s20, %s2383_s21 }
  0x9a   : > { %p2392_p13 = scmp.lt.u32.totalorder %s2383_s21, %s2863_s15 }
  0x9b   : > { %p2386_p12 = pnand %p2384_p3, %p3220_p6  ;;  %p2391_p11 = por %p2390_p5, %p2389_p0 }
  0x9d   : > { %p2387_p1 = pneg %p2386_p12  ;;  %p2393_p7 = por %p2392_p13, %p2391_p11 }
  0x9f   : > { %p2394_p2 = pnand %p2393_p7, %p2387_p1 }
  0xa1   : > { %2397 = shalt.err (!%p2394_p2)
}
  0xa2   : > { %s2398_s25 = scalar_lea.vmem %s2866_s22, 64  ;;  %s2597_s18 = smov [#allocation2]  }
  0xa3   : > { %p2399_p8 = scmp.ne.s32.totalorder %s2866_s22, %s2398_s25  ;;  %s2403_s10 = sshll.u32 %s2597_s18, 4  ;;  %s2404_s10 = int_to_ptr.vmem [resolvable:$false] %s2403_s10 }
  0xa4   : > { %s2405_s30 = scalar_lea.vmem %s2404_s10, 128  ;;  %p2406_p4 = scmp.lt.s32.totalorder %s2866_s22, %s2404_s10 }
  0xa5   : > { %p2401_p9 = pnand %p2399_p8, %p3220_p6  ;;  %p2407_p3 = scmp.lt.s32.totalorder %s2405_s30, %s2398_s25 }
  0xa7   : > { %p2402_p10 = pneg %p2401_p9  ;;  %p2408_p12 = por %p2407_p3, %p2406_p4 }
  0xa9   : > { %p2409_p0 = pnand %p2408_p12, %p2402_p10 }
  0xab   : > { %2412 = shalt.err (!%p2409_p0)
}
  0xac   : > { %p3221_p1 = scmp.ne.s32.totalorder %s3210_s23, 0  ;;  %s340_s21 = scalar_lea.vmem [#allocation7], %s2726_s24 }
  0xad   : > { %s347_s27 = sshll.u32 %s340_s21, 4  ;;  %s2902_s6 = scalar_lea.hbm %s3169_s4, %s2759_s12  ;;  %s348_s27 = int_to_ptr.vmem [resolvable:$true] %s347_s27 }
  0xae   : > { %2128 = dma.hbm_to_vmem [thread:$0]  (!%p3221_p1), %s2863_s15, 64, %s2866_s22, %s301_s1  }
  0xaf   : > { %s2413_s25 = scalar_lea.hbm %s2872_s11, 64  ;;  %s2418_s30 = scalar_lea.hbm %s3167_s2, 128 }
  0xb0   : > { %p2414_p5 = scmp.ne.s32.totalorder %s2872_s11, %s2413_s25  ;;  %p2419_p7 = scmp.lt.u32.totalorder %s2872_s11, %s3167_s2 }
  0xb1   : > { %p2420_p2 = scmp.lt.u32.totalorder %s2418_s30, %s2413_s25  ;;  %p2422_p9 = scmp.lt.u32.totalorder %s2413_s25, %s2872_s11 }
  0xb2   : > { %p2416_p11 = pnand %p2414_p5, %p3220_p6 }
  0xb3   : > { %p2421_p8 = por %p2420_p2, %p2419_p7 }
  0xb4   : > { %p2417_p13 = pneg %p2416_p11 }
  0xb5   : > { %p2423_p10 = por %p2422_p9, %p2421_p8 }
  0xb7   : > { %p2424_p4 = pnand %p2423_p10, %p2417_p13 }
  0xb9   : > { %2427 = shalt.err (!%p2424_p4)
}
  0xba   : > { %s2428_s15 = scalar_lea.vmem %s348_s27, 64  ;;  %s2598_s22 = smov [#allocation7]  }
  0xbb   : > { %p2429_p3 = scmp.ne.s32.totalorder %s348_s27, %s2428_s15  ;;  %s2433_s1 = sshll.u32 %s2598_s22, 4  ;;  %s2434_s1 = int_to_ptr.vmem [resolvable:$false] %s2433_s1 }
  0xbc   : > { %s2435_s21 = scalar_lea.vmem %s2434_s1, 128  ;;  %p2436_p5 = scmp.lt.s32.totalorder %s348_s27, %s2434_s1 }
  0xbd   : > { %p2431_p12 = pnand %p2429_p3, %p3220_p6  ;;  %p2437_p11 = scmp.lt.s32.totalorder %s2435_s21, %s2428_s15 }
  0xbf   : > { %p2432_p0 = pneg %p2431_p12  ;;  %p2438_p1 = por %p2437_p11, %p2436_p5 }
  0xc1   : > { %p2439_p2 = pnand %p2438_p1, %p2432_p0 }
  0xc3   : > { %2442 = shalt.err (!%p2439_p2)
}
  0xc4   : > { %p3222_p7 = scmp.ne.s32.totalorder %s3210_s23, 0  ;;  %s3223_s0 = scalar_lea.sflag [#allocation6], %s2762_s13 }
  0xc5   : > { %s376_s3 = scalar_lea.vmem [#allocation10], %s2726_s24  ;;  %s2443_s20 = scalar_lea.hbm %s2902_s6, 64 }
  0xc6   : > { %2134 = dma.hbm_to_vmem [thread:$0]  (!%p3222_p7), %s2872_s11, 64, %s348_s27, %s3223_s0  }
  0xc7   : > { %s383_s14 = sshll.u32 %s376_s3, 4  ;;  %p2444_p13 = scmp.ne.s32.totalorder %s2902_s6, %s2443_s20  ;;  %s384_s14 = int_to_ptr.vmem [resolvable:$true] %s383_s14 }
  0xc8   : > { %s2448_s10 = scalar_lea.hbm %s3169_s4, 128  ;;  %p2449_p9 = scmp.lt.u32.totalorder %s2902_s6, %s3169_s4 }
  0xc9   : > { %p2446_p1 = pnand %p2444_p13, %p3220_p6  ;;  %p2450_p10 = scmp.lt.u32.totalorder %s2448_s10, %s2443_s20 }
  0xca   : > { %p2452_p3 = scmp.lt.u32.totalorder %s2443_s20, %s2902_s6 }
  0xcb   : > { %p2447_p8 = pneg %p2446_p1  ;;  %p2451_p4 = por %p2450_p10, %p2449_p9 }
  0xcd   : > { %p2453_p12 = por %p2452_p3, %p2451_p4 }
  0xcf   : > { %p2454_p0 = pnand %p2453_p12, %p2447_p8 }
  0xd1   : > { %2457 = shalt.err (!%p2454_p0)
}
  0xd2   : > { %s2458_s11 = scalar_lea.vmem %s384_s14, 64  ;;  %s2599_s27 = smov [#allocation10]  }
  0xd3   : > { %p2459_p5 = scmp.ne.s32.totalorder %s384_s14, %s2458_s11  ;;  %s2463_s22 = sshll.u32 %s2599_s27, 4  ;;  %s2464_s22 = int_to_ptr.vmem [resolvable:$false] %s2463_s22 }
  0xd4   : > { %s2465_s1 = scalar_lea.vmem %s2464_s22, 128  ;;  %p2466_p13 = scmp.lt.s32.totalorder %s384_s14, %s2464_s22 }
  0xd5   : > { %p2461_p11 = pnand %p2459_p5, %p3220_p6  ;;  %p2467_p1 = scmp.lt.s32.totalorder %s2465_s1, %s2458_s11 }
  0xd7   : > { %p2462_p2 = pneg %p2461_p11  ;;  %p2468_p7 = por %p2467_p1, %p2466_p13 }
  0xd9   : > { %p2469_p9 = pnand %p2468_p7, %p2462_p2 }
  0xdb   : > { %2472 = shalt.err (!%p2469_p9)
}
  0xdc   : > { %p3224_p10 = scmp.ne.s32.totalorder %s3210_s23, 0  ;;  %s3225_s21 = scalar_lea.sflag [#allocation9], %s2762_s13 }
  0xdd   : > { %s2947_s20 = scalar_lea.hbm %s3170_s5, %s2759_s12  ;;  %s394_s25 = scalar_lea.vmem [#allocation11], %s2726_s24 }
  0xde   : > { %2140 = dma.hbm_to_vmem [thread:$0]  (!%p3224_p10), %s2902_s6, 64, %s384_s14, %s3225_s21  }
  0xdf   : > { %s401_s18 = sshll.u32 %s394_s25, 4  ;;  %s391_s10 = scalar_lea.sflag [#allocation12], %s2762_s13  ;;  %s402_s18 = int_to_ptr.vmem [resolvable:$true] %s401_s18 }
  0xe0   : > { %s2473_s30 = scalar_lea.hbm %s2947_s20, 64  ;;  %s2478_s14 = scalar_lea.hbm %s3170_s5, 128 }
  0xe1   : > { %p2474_p7 = scmp.ne.s32.totalorder %s2947_s20, %s2473_s30  ;;  %p2479_p3 = scmp.lt.u32.totalorder %s2947_s20, %s3170_s5 }
  0xe2   : > { %p2480_p12 = scmp.lt.u32.totalorder %s2478_s14, %s2473_s30  ;;  %p2482_p5 = scmp.lt.u32.totalorder %s2473_s30, %s2947_s20 }
  0xe3   : > { %p2476_p8 = pnand %p2474_p7, %p3220_p6 }
  0xe4   : > { %p2481_p0 = por %p2480_p12, %p2479_p3 }
  0xe5   : > { %p2477_p4 = pneg %p2476_p8 }
  0xe6   : > { %p2483_p11 = por %p2482_p5, %p2481_p0 }
  0xe8   : > { %p2484_p2 = pnand %p2483_p11, %p2477_p4 }
  0xea   : > { %2487 = shalt.err (!%p2484_p2)
}
  0xeb   : > { %s2488_s24 = scalar_lea.vmem %s402_s18, 64  ;;  %s2600_s13 = smov [#allocation11]  }
  0xec   : > { %p2489_p13 = scmp.ne.s32.totalorder %s402_s18, %s2488_s24  ;;  %s2493_s27 = sshll.u32 %s2600_s13, 4  ;;  %s2494_s27 = int_to_ptr.vmem [resolvable:$false] %s2493_s27 }
  0xed   : > { %s2495_s22 = scalar_lea.vmem %s2494_s27, 128  ;;  %p2496_p7 = scmp.lt.s32.totalorder %s402_s18, %s2494_s27 }
  0xee   : > { %p2491_p1 = pnand %p2489_p13, %p3220_p6  ;;  %p2497_p8 = scmp.lt.s32.totalorder %s2495_s22, %s2488_s24 }
  0xf0   : > { %p2492_p9 = pneg %p2491_p1  ;;  %p2498_p10 = por %p2497_p8, %p2496_p7 }
  0xf2   : > { %p2499_p3 = pnand %p2498_p10, %p2492_p9 }
  0xf4   : > { %2502 = shalt.err (!%p2499_p3)
}
  0xf5   : > { %p3226_p12 = scmp.ne.s32.totalorder %s3210_s23, 0  ;;  %p3227_p4 = scmp.ne.s32.totalorder %s3205_s19, 0 }
  0xf6   : > { %s2971_s26 = sand.u32 (!%p3227_p4), 1, %s2581_s28   ;;  %p3228_p6 = scmp.ne.s32.totalorder (!%p3227_p4), %s3201_s16, 0 }
  0xf7   : > { %2143 = dma.hbm_to_vmem [thread:$0]  (!%p3226_p12), %s2947_s20, 64, %s402_s18, %s391_s10  }
  0xf8   : > { %410 = sbr.rel (%p3227_p4) target bundleno = 669 (0x29d), region = 52  ;;  %s2974_s1 = sshll.u32 (!%p3227_p4), %s2971_s26, 2 }
  0xf9   : > { %s413_s21 = scalar_lea.sflag (!%p3227_p4), [#allocation3], %s2971_s26  ;;  %s416_s0 = scalar_lea.vmem (!%p3227_p4), [#allocation2], %s2974_s1 }
  0xff   : > { %2548 = dma.done.wait (%p3228_p6), %s413_s21, 64  }
 0x100   : > { %2550 = vsyncadd (%p3228_p6), %s413_s21, 4294967232  ;;  %s421_s19 = sand.u32 1, %s2670_s9   ;;  %s425_s3 = scalar_lea.vmem [#allocation5], %s2974_s1 }
 0x101   : > { %s422_s23 = scalar_lea.sflag [#allocation6], %s421_s19 }
 0x102   : > { %2552 = dma.done.wait (%p3228_p6), %s422_s23, 128  }
 0x103   : > { %2554 = vsyncadd (%p3228_p6), %s422_s23, 4294967168  ;;  %s434_s20 = scalar_lea.vmem [#allocation7], %s2974_s1  ;;  %s440_s25 = scalar_lea.sflag [#allocation9], %s421_s19 }
 0x104   : > { %s443_s18 = scalar_lea.vmem [#allocation8], %s2974_s1 }
 0x105   : > { %2556 = dma.done.wait (%p3228_p6), %s440_s25, 128  }
 0x106   : > { %2558 = vsyncadd (%p3228_p6), %s440_s25, 4294967168  ;;  %s452_s10 = scalar_lea.vmem [#allocation10], %s2974_s1  ;;  %s458_s30 = scalar_lea.sflag [#allocation12], %s421_s19 }
 0x107   : > { %s461_s15 = scalar_lea.vmem [#allocation11], %s2974_s1 }
 0x108   : > { %2560 = dma.done.wait (%p3228_p6), %s458_s30, 64  }
 0x109   : > { %2562 = vsyncadd (%p3228_p6), %s458_s30, 4294967232  ;;  %p3229_p10 = scmp.eq.s32.totalorder %s2670_s9, 0 }
 0x10b   : > { %2564 = dma.done.wait (%p3229_p10), [#allocation12], 9216   ;;  %p3230_p0 = pmov %p3229_p10 }
 0x10d   : > { %2566 = vsyncadd (%p3230_p0), [#allocation12], 4294958080  ;;  %p3231_p5 = pmov %p3230_p0 }
 0x10e   : > { %p3232_p11 = pmov %p3230_p0 }
 0x10f   : > { %2568 = dma.done.wait (%p3231_p5), [#allocation15], 16  }
 0x110   : > { %2570 = vsyncadd (%p3232_p11), [#allocation15], 4294967280  ;;  %v2601_v0 = vmov 0.0   ;;  %vm2602_vm0 = vmmov 0   ;;  %v2192_v1 = vld [vmem:[#allocation13 + $0x40] sm:$0xff]   ;;  %v2194_v3 = vld [vmem:[#allocation13 + $0x48] sm:$0xff]  }
 0x111   : > { %1916 = vmatprep.subr.bf16.mxu0 %v2601_v0  ;;  %1936 = vmatprep.subr.bf16.mxu1 %v2601_v0  ;;  %v2193_v2 = vld [vmem:[#allocation13] sm:$0xff]   ;;  %v2195_v4 = vld [vmem:[#allocation13 + $0x8] sm:$0xff]   ;;  %v2196_v5 = vld [vmem:[#allocation13 + $0x50] sm:$0xff]   ;;  %s1754_s16 = sshll.u32 %s2971_s26, 1  ;;  %s1832_s6 = sshll.u32 %s2670_s9, 5 }
 0x112   : > { %1932 = vmatprep.mubr.msk.bf16.mxu0 %vm2602_vm0, %v2601_v0  ;;  %1952 = vmatprep.mubr.msk.bf16.mxu1 %vm2602_vm0, %v2601_v0  ;;  %v2197_v6 = vld [vmem:[#allocation13 + $0x10] sm:$0xff]   ;;  %v2198_v7 = vld [vmem:[#allocation13 + $0x58] sm:$0xff]   ;;  %v2200_v9 = vld [vmem:[#allocation13 + $0x60] sm:$0xff]   ;;  %s526_s14 = scalar_lea.vmem [#allocation16], %s1754_s16  ;;  %s3121_s13 = scalar_lea.hbm %s3173_s8, %s1832_s6 }
 0x113   : > { %1917 = vmatpush3.bf16.msra.mxu0 %v2192_v1  ;;  %1937 = vmatpush3.bf16.msra.mxu1 %v2193_v2  ;;  %v2199_v8 = vld [vmem:[#allocation13 + $0x18] sm:$0xff]   ;;  %v2201_v10 = vld [vmem:[#allocation13 + $0x20] sm:$0xff]   ;;  %v2202_v11 = vld [vmem:[#allocation13 + $0x68] sm:$0xff]   ;;  %s1530_s11 = sshll.u32 %s526_s14, 4  ;;  %s1517_s27 = scalar_lea.sflag [#allocation4], %s2971_s26  ;;  %s3123_s11 = int_to_ptr.vmem [resolvable:$true] %s1530_s11 }
 0x114   : > { %1918 = vmatprep.subr.bf16.mxu0 %v2601_v0  ;;  %1938 = vmatprep.subr.bf16.mxu1 %v2601_v0  ;;  %v2203_v12 = vld [vmem:[#allocation13 + $0x28] sm:$0xff]   ;;  %v2204_v13 = vld [vmem:[#allocation13 + $0x70] sm:$0xff]   ;;  %v2206_v15 = vld [vmem:[#allocation13 + $0x78] sm:$0xff]   ;;  %s2503_s22 = scalar_lea.vmem %s3123_s11, 32  ;;  %p3233_p13 = scmp.ne.s32.totalorder %s3202_s17, 0 }
 0x115   : > { %v2205_v14 = vld [vmem:[#allocation13 + $0x30] sm:$0xff]   ;;  %v2207_v16 = vld [vmem:[#allocation13 + $0x38] sm:$0xff]   ;;  %v2208_v19 = vld [vmem:[#allocation13 + $0x80] sm:$0xff]   ;;  %p2504_p2 = scmp.ne.s32.totalorder %s3123_s11, %s2503_s22  ;;  %s2603_s9 = smov [#allocation16]  }
 0x116   : > { %v545_v17 = vld [vmem:[%s425_s3] sm:$0x3]  ;;  %v528_v18 = vld [vmem:[%s416_s0] sm:$0x3]  ;;  %v2209_v20 = vld [vmem:[#allocation13 + $0xc0] sm:$0xff]   ;;  %s2507_s1 = sshll.u32 %s2603_s9, 4  ;;  %s2508_s1 = int_to_ptr.vmem [resolvable:$false] %s2507_s1 }
 0x117   : > { %1919 = vmatpush3.bf16.msra.mxu0 %v2194_v3  ;;  %1939 = vmatpush3.bf16.msra.mxu1 %v2195_v4  ;;  %v2210_v21 = vld [vmem:[#allocation13 + $0x88] sm:$0xff]   ;;  %v2212_v23 = vld [vmem:[#allocation13 + $0x90] sm:$0xff]   ;;  %v2214_v25 = vld [vmem:[#allocation13 + $0x98] sm:$0xff]   ;;  %p2505_p1 = pnand %p2504_p2, %p3233_p13  ;;  %s2509_s21 = scalar_lea.vmem %s2508_s1, 64 }
 0x118   : > { %1920 = vmatprep.subr.bf16.mxu0 %v2601_v0  ;;  %1940 = vmatprep.subr.bf16.mxu1 %v2601_v0  ;;  %v2211_v22 = vld [vmem:[#allocation13 + $0xc8] sm:$0xff]   ;;  %v2213_v24 = vld [vmem:[#allocation13 + $0xd0] sm:$0xff]   ;;  %v2215_v26 = vld [vmem:[#allocation13 + $0xd8] sm:$0xff]   ;;  %p2510_p7 = scmp.lt.s32.totalorder %s3123_s11, %s2508_s1  ;;  %p2511_p8 = scmp.lt.s32.totalorder %s2509_s21, %s2503_s22 }
 0x119   : > { %v2216_v27 = vld [vmem:[#allocation13 + $0xa0] sm:$0xff]   ;;  %v2218_v29 = vld [vmem:[#allocation13 + $0xa8] sm:$0xff]   ;;  %v2220_v31 = vld [vmem:[#allocation13 + $0xb0] sm:$0xff]   ;;  %p2506_p9 = pneg %p2505_p1 }
 0x11a   : > { %v2217_v28 = vld [vmem:[#allocation13 + $0xe0] sm:$0xff]   ;;  %v2219_v30 = vld [vmem:[#allocation13 + $0xe8] sm:$0xff]   ;;  %v2221_v32 = vld [vmem:[#allocation13 + $0xf0] sm:$0xff]   ;;  %p2512_p3 = por %p2511_p8, %p2510_p7 }
 0x11b   : > { %1921 = vmatpush3.bf16.msra.mxu0 %v2196_v5  ;;  %1941 = vmatpush3.bf16.msra.mxu1 %v2197_v6  ;;  %v2222_v33 = vld [vmem:[#allocation13 + $0xb8] sm:$0xff]   ;;  %v739_v35 = vld [vmem:[%s434_s20] sm:$0x3]  ;;  %v846_v37 = vld [vmem:[%s443_s18] sm:$0x3] }
 0x11c   : > { %1922 = vmatprep.subr.bf16.mxu0 %v2601_v0  ;;  %1942 = vmatprep.subr.bf16.mxu1 %v2601_v0  ;;  %v2223_v34 = vld [vmem:[#allocation13 + $0xf8] sm:$0xff]   ;;  %v2224_v36 = vld [vmem:[#allocation13 + $0x100] sm:$0xff]   ;;  %v2226_v39 = vld [vmem:[#allocation13 + $0x108] sm:$0xff]   ;;  %p2513_p12 = pnand %p2512_p3, %p2506_p9 }
 0x11d   : > { %v2225_v38 = vld [vmem:[#allocation13 + $0x140] sm:$0xff]   ;;  %v2227_v40 = vld [vmem:[#allocation13 + $0x148] sm:$0xff]   ;;  %v2228_v41 = vld [vmem:[#allocation13 + $0x110] sm:$0xff]  }
 0x11e   : > { %v2229_v42 = vld [vmem:[#allocation13 + $0x150] sm:$0xff]   ;;  %v2230_v43 = vld [vmem:[#allocation13 + $0x118] sm:$0xff]   ;;  %v2232_v45 = vld [vmem:[#allocation13 + $0x120] sm:$0xff]  }
 0x11f   : > { %1923 = vmatpush3.bf16.msra.mxu0 %v2198_v7  ;;  %1943 = vmatpush3.bf16.msra.mxu1 %v2199_v8  ;;  %v2231_v44 = vld [vmem:[#allocation13 + $0x158] sm:$0xff]   ;;  %v2233_v46 = vld [vmem:[#allocation13 + $0x160] sm:$0xff]   ;;  %v2234_v47 = vld [vmem:[#allocation13 + $0x128] sm:$0xff]  }
 0x120   : > { %1924 = vmatprep.subr.bf16.mxu0 %v2601_v0  ;;  %1944 = vmatprep.subr.bf16.mxu1 %v2601_v0  ;;  %v2235_v48 = vld [vmem:[#allocation13 + $0x168] sm:$0xff]   ;;  %v2236_v49 = vld [vmem:[#allocation13 + $0x130] sm:$0xff]   ;;  %v2238_v51 = vld [vmem:[#allocation13 + $0x138] sm:$0xff]  }
 0x121   : > { %v2237_v50 = vld [vmem:[#allocation13 + $0x170] sm:$0xff]   ;;  %v2239_v52 = vld [vmem:[#allocation13 + $0x178] sm:$0xff]   ;;  %v2240_v54 = vld [vmem:[#allocation13 + $0x180] sm:$0xff]  }
 0x122   : > { %v953_v53 = vld [vmem:[%s452_s10] sm:$0x3]  ;;  %v1060_v55 = vld [vmem:[%s461_s15] sm:$0x3]  ;;  %v2241_v56 = vld [vmem:[#allocation13 + $0x1c0] sm:$0xff]  }
 0x123   : > { %1925 = vmatpush3.bf16.msra.mxu0 %v2200_v9  ;;  %1945 = vmatpush3.bf16.msra.mxu1 %v2201_v10  ;;  %v2242_v57 = vld [vmem:[#allocation13 + $0x188] sm:$0xff]   ;;  %v2244_v59 = vld [vmem:[#allocation13 + $0x190] sm:$0xff]   ;;  %v2246_v61 = vld [vmem:[#allocation13 + $0x198] sm:$0xff]  }
 0x124   : > { %1926 = vmatprep.subr.bf16.mxu0 %v2601_v0  ;;  %1946 = vmatprep.subr.bf16.mxu1 %v2601_v0  ;;  %v2243_v58 = vld [vmem:[#allocation13 + $0x1c8] sm:$0xff]   ;;  %v2245_v60 = vld [vmem:[#allocation13 + $0x1d0] sm:$0xff]   ;;  %v2247_v62 = vld [vmem:[#allocation13 + $0x1d8] sm:$0xff]  }
 0x125   : > { %v2248_v63 = vld [vmem:[#allocation13 + $0x1a0] sm:$0xff]   ;;  %v2250_v2 = vld [vmem:[#allocation13 + $0x1a8] sm:$0xff]   ;;  %v2252_v4 = vld [vmem:[#allocation13 + $0x1b0] sm:$0xff]  }
 0x126   : > { %v2249_v1 = vld [vmem:[#allocation13 + $0x1e0] sm:$0xff]   ;;  %v2251_v3 = vld [vmem:[#allocation13 + $0x1e8] sm:$0xff]   ;;  %v2253_v5 = vld [vmem:[#allocation13 + $0x1f0] sm:$0xff]  }
 0x127   : > { %1927 = vmatpush3.bf16.msra.mxu0 %v2202_v11  ;;  %1947 = vmatpush3.bf16.msra.mxu1 %v2203_v12  ;;  %v2256_v6 = vld [vmem:[%s416_s0] ss:$0 sps:$4 sm:$0x66]   ;;  %v2254_v7 = vld [vmem:[#allocation13 + $0x1b8] sm:$0xff]   ;;  %v2257_v11 = vld [vmem:[#allocation13 + $0x200] sm:$0xff]  }
 0x128   : > { %1928 = vmatprep.subr.bf16.mxu0 %v2601_v0  ;;  %1948 = vmatprep.subr.bf16.mxu1 %v2601_v0  ;;  %v2258_v8 = vld [vmem:[%s425_s3] ss:$0 sps:$4 sm:$0x66]   ;;  %v1188_v10 = vrot.slane %v2256_v6, 1 }
 0x129   : > { %v2255_v9 = vld [vmem:[#allocation13 + $0x1f8] sm:$0xff]   ;;  %v1300_v12 = vrot.slane %v2258_v8, 1 }
 0x12b   : > { %1929 = vmatpush3.bf16.msra.mxu0 %v2204_v13  ;;  %1949 = vmatpush3.bf16.msra.mxu1 %v2205_v14  ;;  %v2259_v13 = vld [vmem:[#allocation13 + $0x208] sm:$0xff]   ;;  %v2260_v14 = vld [vmem:[#allocation13 + $0x210] sm:$0xff]  }
 0x12c   : > { %1930 = vmatprep.subr.bf16.mxu0 %v2601_v0  ;;  %1950 = vmatprep.subr.bf16.mxu1 %v2601_v0 }
 0x12f   : > { %1931 = vmatpush3.bf16.msra.mxu0 %v2206_v15  ;;  %1951 = vmatpush3.bf16.msra.mxu1 %v2207_v16  ;;  %v2261_v15 = vld [vmem:[#allocation13 + $0x218] sm:$0xff]   ;;  %v2262_v16 = vld [vmem:[#allocation13 + $0x220] sm:$0xff]  }
 0x130   : > { %1956 = vmatprep.subr.bf16.mxu0 %v2601_v0  ;;  %1976 = vmatprep.subr.bf16.mxu1 %v2601_v0 }
 0x132   : > { %1933 = vmatmul.mubr.bf16.vlgmr.msra.gmra.mrb[0].mxu0 %v545_v17  ;;  %1953 = vmatmul.mubr.bf16.vlgmr.msra.gmra.mrb[0].mxu1 %v528_v18  ;;  %v2263_v17 = vld [vmem:[#allocation13 + $0x228] sm:$0xff]   ;;  %v2264_v18 = vld [vmem:[#allocation13 + $0x230] sm:$0xff]  }
 0x133   : > { %1957 = vmatpush3.bf16.msra.mxu0 %v2208_v19  ;;  %1977 = vmatpush3.bf16.msra.mxu1 %v2209_v20  ;;  %v2266_v19 = vld [vmem:[%s434_s20] ss:$0 sps:$4 sm:$0x66]   ;;  %v2265_v20 = vld [vmem:[#allocation13 + $0x238] sm:$0xff]  }
 0x134   : > { %1958 = vmatprep.subr.bf16.mxu0 %v2601_v0  ;;  %1978 = vmatprep.subr.bf16.mxu1 %v2601_v0 }
 0x135   : > { %1972 = vmatprep.mubr.msk.bf16.mxu0 %vm2602_vm0, %v2601_v0  ;;  %1992 = vmatprep.mubr.msk.bf16.mxu1 %vm2602_vm0, %v2601_v0 }
 0x137   : > { %1959 = vmatpush3.bf16.msra.mxu0 %v2210_v21  ;;  %1979 = vmatpush3.bf16.msra.mxu1 %v2211_v22  ;;  %v1412_v21 = vrot.slane %v2266_v19, 1 }
 0x138   : > { %1960 = vmatprep.subr.bf16.mxu0 %v2601_v0  ;;  %1980 = vmatprep.subr.bf16.mxu1 %v2601_v0 }
 0x13b   : > { %1961 = vmatpush3.bf16.msra.mxu0 %v2212_v23  ;;  %1981 = vmatpush3.bf16.msra.mxu1 %v2213_v24 }
 0x13c   : > { %1962 = vmatprep.subr.bf16.mxu0 %v2601_v0  ;;  %1982 = vmatprep.subr.bf16.mxu1 %v2601_v0 }
 0x13f   : > { %1963 = vmatpush3.bf16.msra.mxu0 %v2214_v25  ;;  %1983 = vmatpush3.bf16.msra.mxu1 %v2215_v26 }
 0x140   : > { %1964 = vmatprep.subr.bf16.mxu0 %v2601_v0  ;;  %1984 = vmatprep.subr.bf16.mxu1 %v2601_v0 }
 0x143   : > { %1965 = vmatpush3.bf16.msra.mxu0 %v2216_v27  ;;  %1985 = vmatpush3.bf16.msra.mxu1 %v2217_v28 }
 0x144   : > { %1966 = vmatprep.subr.bf16.mxu0 %v2601_v0  ;;  %1986 = vmatprep.subr.bf16.mxu1 %v2601_v0 }
 0x147   : > { %1967 = vmatpush3.bf16.msra.mxu0 %v2218_v29  ;;  %1987 = vmatpush3.bf16.msra.mxu1 %v2219_v30 }
 0x148   : > { %1968 = vmatprep.subr.bf16.mxu0 %v2601_v0  ;;  %1988 = vmatprep.subr.bf16.mxu1 %v2601_v0 }
 0x14b   : > { %1969 = vmatpush3.bf16.msra.mxu0 %v2220_v31  ;;  %1989 = vmatpush3.bf16.msra.mxu1 %v2221_v32 }
 0x14c   : > { %1970 = vmatprep.subr.bf16.mxu0 %v2601_v0  ;;  %1990 = vmatprep.subr.bf16.mxu1 %v2601_v0 }
 0x14f   : > { %1971 = vmatpush3.bf16.msra.mxu0 %v2222_v33  ;;  %1991 = vmatpush3.bf16.msra.mxu1 %v2223_v34 }
 0x150   : > { %1996 = vmatprep.subr.bf16.mxu0 %v2601_v0  ;;  %2016 = vmatprep.subr.bf16.mxu1 %v2601_v0 }
 0x152   : > { %1973 = vmatmul.mubr.bf16.vlgmr.msra.gmra.mrb[4].mxu0 %v739_v35  ;;  %1993 = vmatmul.mubr.bf16.vlgmr.msra.gmra.mrb[4].mxu1 %v846_v37 }
 0x153   : > { %1997 = vmatpush3.bf16.msra.mxu0 %v2224_v36  ;;  %2017 = vmatpush3.bf16.msra.mxu1 %v2225_v38 }
 0x154   : > { %1998 = vmatprep.subr.bf16.mxu0 %v2601_v0  ;;  %2018 = vmatprep.subr.bf16.mxu1 %v2601_v0 }
 0x155   : > { %2012 = vmatprep.mubr.msk.bf16.mxu0 %vm2602_vm0, %v2601_v0  ;;  %2032 = vmatprep.mubr.msk.bf16.mxu1 %vm2602_vm0, %v2601_v0 }
 0x157   : > { %1999 = vmatpush3.bf16.msra.mxu0 %v2226_v39  ;;  %2019 = vmatpush3.bf16.msra.mxu1 %v2227_v40 }
 0x158   : > { %2000 = vmatprep.subr.bf16.mxu0 %v2601_v0  ;;  %2020 = vmatprep.subr.bf16.mxu1 %v2601_v0 }
 0x15b   : > { %2001 = vmatpush3.bf16.msra.mxu0 %v2228_v41  ;;  %2021 = vmatpush3.bf16.msra.mxu1 %v2229_v42 }
 0x15c   : > { %2002 = vmatprep.subr.bf16.mxu0 %v2601_v0  ;;  %2022 = vmatprep.subr.bf16.mxu1 %v2601_v0 }
 0x15f   : > { %2003 = vmatpush3.bf16.msra.mxu0 %v2230_v43  ;;  %2023 = vmatpush3.bf16.msra.mxu1 %v2231_v44 }
 0x160   : > { %2004 = vmatprep.subr.bf16.mxu0 %v2601_v0  ;;  %2024 = vmatprep.subr.bf16.mxu1 %v2601_v0 }
 0x163   : > { %2005 = vmatpush3.bf16.msra.mxu0 %v2232_v45  ;;  %2025 = vmatpush3.bf16.msra.mxu1 %v2233_v46 }
 0x164   : > { %2006 = vmatprep.subr.bf16.mxu0 %v2601_v0  ;;  %2026 = vmatprep.subr.bf16.mxu1 %v2601_v0 }
 0x167   : > { %2007 = vmatpush3.bf16.msra.mxu0 %v2234_v47  ;;  %2027 = vmatpush3.bf16.msra.mxu1 %v2235_v48 }
 0x168   : > { %2008 = vmatprep.subr.bf16.mxu0 %v2601_v0  ;;  %2028 = vmatprep.subr.bf16.mxu1 %v2601_v0 }
 0x16b   : > { %2009 = vmatpush3.bf16.msra.mxu0 %v2236_v49  ;;  %2029 = vmatpush3.bf16.msra.mxu1 %v2237_v50 }
 0x16c   : > { %2010 = vmatprep.subr.bf16.mxu0 %v2601_v0  ;;  %2030 = vmatprep.subr.bf16.mxu1 %v2601_v0 }
 0x16f   : > { %2011 = vmatpush3.bf16.msra.mxu0 %v2238_v51  ;;  %2031 = vmatpush3.bf16.msra.mxu1 %v2239_v52 }
 0x170   : > { %2036 = vmatprep.subr.bf16.mxu0 %v2601_v0  ;;  %2056 = vmatprep.subr.bf16.mxu1 %v2601_v0 }
 0x172   : > { %2013 = vmatmul.mubr.bf16.vlgmr.msra.gmra.mrb[8].mxu0 %v953_v53  ;;  %2033 = vmatmul.mubr.bf16.vlgmr.msra.gmra.mrb[8].mxu1 %v1060_v55 }
 0x173   : > { %2037 = vmatpush3.bf16.msra.mxu0 %v2240_v54  ;;  %2057 = vmatpush3.bf16.msra.mxu1 %v2241_v56 }
 0x174   : > { %2038 = vmatprep.subr.bf16.mxu0 %v2601_v0  ;;  %2058 = vmatprep.subr.bf16.mxu1 %v2601_v0 }
 0x175   : > { %2052 = vmatprep.mubr.msk.bf16.mxu0 %vm2602_vm0, %v2601_v0  ;;  %2072 = vmatprep.mubr.msk.bf16.mxu1 %vm2602_vm0, %v2601_v0 }
 0x177   : > { %2039 = vmatpush3.bf16.msra.mxu0 %v2242_v57  ;;  %2059 = vmatpush3.bf16.msra.mxu1 %v2243_v58 }
 0x178   : > { %2040 = vmatprep.subr.bf16.mxu0 %v2601_v0  ;;  %2060 = vmatprep.subr.bf16.mxu1 %v2601_v0 }
 0x17b   : > { %2041 = vmatpush3.bf16.msra.mxu0 %v2244_v59  ;;  %2061 = vmatpush3.bf16.msra.mxu1 %v2245_v60 }
 0x17c   : > { %2042 = vmatprep.subr.bf16.mxu0 %v2601_v0  ;;  %2062 = vmatprep.subr.bf16.mxu1 %v2601_v0 }
 0x17f   : > { %2043 = vmatpush3.bf16.msra.mxu0 %v2246_v61  ;;  %2063 = vmatpush3.bf16.msra.mxu1 %v2247_v62  ;;  %v1830_v61 = vld [vmem:[#allocation14] ss:$0 sm:$0xff] }
 0x180   : > { %2044 = vmatprep.subr.bf16.mxu0 %v2601_v0  ;;  %2064 = vmatprep.subr.bf16.mxu1 %v2601_v0 }
 0x183   : > { %2045 = vmatpush3.bf16.msra.mxu0 %v2248_v63  ;;  %2065 = vmatpush3.bf16.msra.mxu1 %v2249_v1 }
 0x184   : > { %2046 = vmatprep.subr.bf16.mxu0 %v2601_v0  ;;  %2066 = vmatprep.subr.bf16.mxu1 %v2601_v0 }
 0x187   : > { %2047 = vmatpush3.bf16.msra.mxu0 %v2250_v2  ;;  %2067 = vmatpush3.bf16.msra.mxu1 %v2251_v3 }
 0x188   : > { %2048 = vmatprep.subr.bf16.mxu0 %v2601_v0  ;;  %2068 = vmatprep.subr.bf16.mxu1 %v2601_v0 }
 0x18b   : > { %2049 = vmatpush3.bf16.msra.mxu0 %v2252_v4  ;;  %2069 = vmatpush3.bf16.msra.mxu1 %v2253_v5 }
 0x18c   : > { %2050 = vmatprep.subr.bf16.mxu0 %v2601_v0  ;;  %2070 = vmatprep.subr.bf16.mxu1 %v2601_v0 }
 0x18f   : > { %2051 = vmatpush3.bf16.msra.mxu0 %v2254_v7  ;;  %2071 = vmatpush3.bf16.msra.mxu1 %v2255_v9 }
 0x190   : > { %2076 = vmatprep.subr.bf16.mxu0 %v2601_v0 }
 0x192   : > { %2053 = vmatmul.mubr.bf16.vlgmr.msra.gmra.mrb[12].mxu0 %v1188_v10  ;;  %2073 = vmatmul.mubr.bf16.vlgmr.msra.gmra.mrb[12].mxu1 %v1300_v12 }
 0x193   : > { %2077 = vmatpush3.bf16.msra.mxu0 %v2257_v11  ;;  %2092 = vmatprep.mubr.msk.bf16.mxu0 %vm2602_vm0, %v2601_v0 }
 0x194   : > { %2078 = vmatprep.subr.bf16.mxu0 %v2601_v0 }
 0x197   : > { %2079 = vmatpush3.bf16.msra.mxu0 %v2259_v13 }
 0x198   : > { %2080 = vmatprep.subr.bf16.mxu0 %v2601_v0 }
 0x19b   : > { %2081 = vmatpush3.bf16.msra.mxu0 %v2260_v14 }
 0x19c   : > { %2082 = vmatprep.subr.bf16.mxu0 %v2601_v0 }
 0x19f   : > { %2083 = vmatpush3.bf16.msra.mxu0 %v2261_v15 }
 0x1a0   : > { %2084 = vmatprep.subr.bf16.mxu0 %v2601_v0 }
 0x1a3   : > { %2085 = vmatpush3.bf16.msra.mxu0 %v2262_v16 }
 0x1a4   : > { %2086 = vmatprep.subr.bf16.mxu0 %v2601_v0 }
 0x1a7   : > { %2087 = vmatpush3.bf16.msra.mxu0 %v2263_v17 }
 0x1a8   : > { %2088 = vmatprep.subr.bf16.mxu0 %v2601_v0 }
 0x1ab   : > { %2089 = vmatpush3.bf16.msra.mxu0 %v2264_v18 }
 0x1ac   : > { %2090 = vmatprep.subr.bf16.mxu0 %v2601_v0 }
 0x1af   : > { %2091 = vmatpush3.bf16.msra.mxu0 %v2265_v20 }
 0x1b2   : > { %2093 = vmatmul.mubr.bf16.vlgmr.msra.gmra.mrb[16].mxu0 %v1412_v21 }
 0x205   : > { %v645_v22 = vpop.f32.mrb[0].mxu0  ;;  %v733_v24 = vpop.f32.mrb[0].mxu1 }
 0x206   : > { %v1934_v23 = vpop.f32.mrb[1].mxu0  ;;  %v734_v25 = vadd.f32 %v733_v24, %v645_v22  ;;  %v1954_v27 = vpop.f32.mrb[1].mxu1 }
 0x207   : > { %v648_v26 = vpop.f32.mrb[2].mxu0  ;;  %v736_v29 = vpop.f32.mrb[2].mxu1 }
 0x208   : > { %v1935_v28 = vpop.f32.mrb[3].mxu0  ;;  %v1955_v30 = vpop.f32.mrb[3].mxu1 }
 0x225   : > { %v839_v31 = vpop.f32.mrb[4].mxu0  ;;  %v946_v34 = vpop.f32.mrb[4].mxu1 }
 0x226   : > { %v845_v32 = vadd.f32 %v839_v31, %v734_v25  ;;  %v1974_v33 = vpop.f32.mrb[5].mxu0  ;;  %v1994_v36 = vpop.f32.mrb[5].mxu1 }
 0x227   : > { %v842_v35 = vpop.f32.mrb[6].mxu0  ;;  %v949_v38 = vpop.f32.mrb[6].mxu1 }
 0x228   : > { %v952_v37 = vadd.f32 %v946_v34, %v845_v32  ;;  %v1975_v0 = vpop.f32.mrb[7].mxu0  ;;  %v1995_v39 = vpop.f32.mrb[7].mxu1 }
 0x245   : > { %v1053_v40 = vpop.f32.mrb[8].mxu0  ;;  %v1160_v43 = vpop.f32.mrb[8].mxu1 }
 0x246   : > { %v1059_v41 = vadd.f32 %v1053_v40, %v952_v37  ;;  %v2014_v42 = vpop.f32.mrb[9].mxu0  ;;  %v2034_v45 = vpop.f32.mrb[9].mxu1 }
 0x247   : > { %v1056_v44 = vpop.f32.mrb[10].mxu0  ;;  %v1163_v48 = vpop.f32.mrb[10].mxu1 }
 0x248   : > { %v1166_v46 = vadd.f32 %v1160_v43, %v1059_v41  ;;  %v2015_v47 = vpop.f32.mrb[11].mxu0  ;;  %v2035_v49 = vpop.f32.mrb[11].mxu1 }
 0x265   : > { %v1272_v50 = vpop.f32.mrb[12].mxu0  ;;  %v1384_v53 = vpop.f32.mrb[12].mxu1 }
 0x266   : > { %v1278_v51 = vadd.f32 %v1272_v50, %v1166_v46  ;;  %v2054_v52 = vpop.f32.mrb[13].mxu0  ;;  %v2074_v55 = vpop.f32.mrb[13].mxu1 }
 0x267   : > { %v1275_v54 = vpop.f32.mrb[14].mxu0  ;;  %v1387_v58 = vpop.f32.mrb[14].mxu1 }
 0x268   : > { %v1390_v56 = vadd.f32 %v1384_v53, %v1278_v51  ;;  %v2055_v57 = vpop.f32.mrb[15].mxu0  ;;  %v2075_v59 = vpop.f32.mrb[15].mxu1 }
 0x285   : > { %v1496_v60 = vpop.f32.mrb[16].mxu0 }
 0x286   : > { %v1502_v62 = vadd.f32 %v1496_v60, %v1390_v56  ;;  %v2094_v63 = vpop.f32.mrb[17].mxu0 }
 0x287   : > { %v1499_v1 = vpop.f32.mrb[18].mxu0 }
 0x288   : > { %v1510_v2 = vadd.f32 %v1830_v61, %v1502_v62  ;;  %v2095_v3 = vpop.f32.mrb[19].mxu0 }
 0x28a   : > { %vm1511_vm1 = vcmp.ge.f32.partialorder %v1510_v2, 0.0  ;;  %v1512_v4 = vmul.f32 0.01, %v1510_v2 }
 0x28c   : > { %v1513_v5 = vsel %vm1511_vm1, %v1510_v2, %v1512_v4 }
 0x28d   : > { %v1514_v6 = vpack.c.bf16 %v1513_v5, %v1513_v5 }
 0x28f   : > { %1515 = vst [vmem:[%s526_s14] sm:$0x3] %v1514_v6 }
 0x290   : > { %2516 = shalt.err (!%p2513_p12)
}
 0x291   : > { %s2517_s26 = scalar_lea.hbm %s3121_s13, 32  ;;  %s2521_s23 = scalar_lea.hbm %s3173_s8, 64 }
 0x292   : > { %p2518_p4 = scmp.ne.s32.totalorder %s3121_s13, %s2517_s26  ;;  %p2522_p0 = scmp.lt.u32.totalorder %s3121_s13, %s3173_s8 }
 0x293   : > { %p2523_p5 = scmp.lt.u32.totalorder %s2521_s23, %s2517_s26  ;;  %p2525_p2 = scmp.lt.u32.totalorder %s2517_s26, %s3121_s13 }
 0x294   : > { %p2519_p6 = pnand %p2518_p4, %p3233_p13 }
 0x295   : > { %p2524_p11 = por %p2523_p5, %p2522_p0 }
 0x296   : > { %p2520_p10 = pneg %p2519_p6 }
 0x297   : > { %p2526_p1 = por %p2525_p2, %p2524_p11 }
 0x299   : > { %p2527_p9 = pnand %p2526_p1, %p2520_p10 }
 0x29b   : > { %2530 = shalt.err (!%p2527_p9)
}
 0x29c   : > { %2116 = dma.vmem_to_hbm [thread:$0]  (%p3233_p13), %s3123_s11, 32, %s3121_s13, %s1517_s27  }
 0x29d PF: > { %s3234_s25 = sld [smem:[#allocation24_spill]]  ;;  %s3235_s18 = sld [smem:[#allocation28_spill]] }
 0x29e   : > { %s3236_s10 = sld [smem:[#allocation25_spill]] }
 0x2a3   : > { %s1542_s30 = sand.u32 1, %s3234_s25   ;;  %p3237_p7 = scmp.ne.s32.totalorder %s3235_s18, 0 }
 0x2a4   : > { %p3238_p8 = scmp.ge.s32.totalorder %s3236_s10, 2  ;;  %s1543_s15 = scalar_lea.sflag [#allocation4], %s1542_s30 }
 0x2a6   : > { %p2145_p3 = pnand %p3238_p8, %p3237_p7 }
 0x2a8   : > { %2572 = dma.done.wait (!%p2145_p3), %s1543_s15, 32  }
 0x2a9   : > { %2574 = vsyncadd (!%p2145_p3), %s1543_s15, 4294967264  ;;  %s3239_s30 = sld [smem:[#allocation26_spill]]  ;;  %s3240_s16 = sld [smem:[#allocation27_spill]] }
 0x2aa   : > { %s3241_s27 = smov %s2581_s28  ;;  %s3242_s28 = smov %s2585_s29 }
 0x2af   : > { %p31_p12 = scmp.ge.s32.totalorder %s3239_s30, 4   ;;  %s3243_s29 = smov %s3240_s16 }
 0x2b1   :  { %33 = sbr.rel (!%p31_p12) target bundleno = 17 (0x11), region = 174 }
 0x2b8   :  { %1548 = vsyncpa [#allocation3], 1 }
 0x2b9   :  { %1550 = vsyncpa [#allocation3 + $0x1], 1 }
 0x2ba   :  { %1551 = vsyncpa [#allocation6], 1 }
 0x2bb   :  { %1553 = vsyncpa [#allocation6 + $0x1], 1 }
 0x2bc   :  { %1554 = vsyncpa [#allocation9], 1 }
 0x2bd   :  { %1556 = vsyncpa [#allocation9 + $0x1], 1 }
 0x2be   :  { %1557 = vsyncpa [#allocation12], 1 }
 0x2bf   :  { %1559 = vsyncpa [#allocation12 + $0x1], 1 }
 0x2c0   :  { %1560 = vsyncpa [#allocation15], 1 }
 0x2c1   :  { %1561 = vsyncpa [#allocation4], 1 }
 0x2c2   :  { %1563 = vsyncpa [#allocation4 + $0x1], 1 }

// kernel: a_call__.7
= control target key start
LH: loop header
LB: loop body
LE: loop exit
PB: predicated region body
PF: predicated region fallthrough
CT: control target
= control target key end

     0   :  { %s3537_s0 = inlined_call_operand.hbm [shape: bf16[2,2,128], index: 0, kind: input, shape index: {}, may-alias: {0,3}]   ;;  %s3538_s1 = inlined_call_operand.hbm [shape: bf16[2,2,128], index: 1, kind: input, shape index: {}]   ;;  %s3539_s2 = inlined_call_operand.hbm [shape: bf16[2,2,128], index: 2, kind: input, shape index: {}]   ;;  %s3540_s3 = inlined_call_operand.hbm [shape: bf16[2,2,128], index: 3, kind: input, shape index: {}, may-alias: {0,3}]   ;;  %s3541_s4 = inlined_call_operand.hbm [shape: bf16[2,2,128], index: 4, kind: input, shape index: {}]   ;;  %s3542_s5 = inlined_call_operand.hbm [shape: bf16[2,2,128], index: 5, kind: input, shape index: {}]   ;;  %s3543_s6 = inlined_call_operand.hbm [shape: bf16[9,128,128], index: 6, kind: input, shape index: {}]   ;;  %s3544_s7 = inlined_call_operand.hbm [shape: f32[1,128], index: 7, kind: input, shape index: {}]   ;;  %s3545_s8 = inlined_call_operand.hbm [shape: f32[128,128], index: 8, kind: input, shape index: {}]   ;;  %s3546_s9 = inlined_call_operand.hbm [shape: f32[1,128], index: 9, kind: input, shape index: {}]   ;;  %s3547_s10 = inlined_call_operand.hbm [shape: f32[2,1,128], index: 10, kind: output, shape index: {}]  }
   0x1   :  { %3573 = sst [smem:[#allocation35_spill]] %s3538_s1 }
   0x2   :  { %3574 = sst [smem:[#allocation36_spill]] %s3540_s3 }
   0x3   :  { %3575 = sst [smem:[#allocation37_spill]] %s3543_s6 }
   0x4   :  { %3576 = sst [smem:[#allocation38_spill]] %s3544_s7 }
   0x5   :  { %3577 = sst [smem:[#allocation39_spill]] %s3547_s10 }
   0x6   :  { %15 = vsyncpa [#allocation3], 0 }
   0x7   :  { %17 = vsyncpa [#allocation3 + $0x1], 0 }
   0x8   :  { %18 = vsyncpa [#allocation6], 0 }
   0x9   :  { %20 = vsyncpa [#allocation6 + $0x1], 0 }
   0xa   :  { %21 = vsyncpa [#allocation9], 0 }
   0xb   :  { %23 = vsyncpa [#allocation9 + $0x1], 0 }
   0xc   :  { %24 = vsyncpa [#allocation12], 0 }
   0xd   :  { %26 = vsyncpa [#allocation12 + $0x1], 0 }
   0xe   :  { %27 = vsyncpa [#allocation15], 0 }
   0xf   :  { %28 = vsyncpa [#allocation18], 0 }
  0x10   :  { %29 = vsyncpa [#allocation4], 0 }
  0x11   :  { %31 = vsyncpa [#allocation4 + $0x1], 0  ;;  %s2989_s13 = smov 0   ;;  %s2991_s14 = smov 0  }
  0x12   :  { %s2993_s15 = smov 0   ;;  %s2995_s16 = smov 0  }
  0x13 LB: > { %3578 = sst [smem:[#allocation28_spill]] %s2901_s13  ;;  %s3010_s17 = sadd.s32 4294967295, %s2913_s16   ;;  %s2913_s16 = sphi %s2995_s16, %s3626_s16   ;;  %s2909_s15 = sphi %s2993_s15, %s3630_s15   ;;  %s2905_s14 = sphi %s2991_s14, %s3629_s14   ;;  %s2901_s13 = sphi %s2989_s13, %s3628_s13  }
  0x14   : > { %3579 = sst [smem:[#allocation29_spill]] %s3010_s17  ;;  %s1907_s18 = sadd.s32 4294967294, %s2913_s16  }
  0x15   : > { %s3014_s19 = sadd.s32 1, %s2913_s16   ;;  %s44_s20 = sadd.s32 1, %s2909_s15 }
  0x16   : > { %3580 = sst [smem:[#allocation30_spill]] %s3014_s19  ;;  %s41_s21 = ssub.s32 %s2913_s16, %s3014_s19 }
  0x17   : > { %p51_p0 = scmp.ne.s32.totalorder %s2909_s15, %s2905_s14  ;;  %p42_p1 = scmp.eq.s32.totalorder %s41_s21, 0 }
  0x18   : > { %p52_p2 = scmp.eq.s32.totalorder %s2913_s16, 0  ;;  %p57_p3 = scmp.ne.s32.totalorder %s2905_s14, %s2901_s13 }
  0x19   : > { %p3552_p4 = scmp.eq.s32.totalorder %s3010_s17, 0  ;;  %p295_p7 = scmp.eq.s32.totalorder %s3010_s17, 1 }
  0x1a   : > { %s3026_s22 = scalar_select %p42_p1, %s2909_s15, %s44_s20  }
  0x1b   : > { %p3028_p5 = por %p52_p2, %p51_p0  ;;  %p3034_p6 = por %p3552_p4, %p57_p3 }
  0x1c   : > { %3581 = sst [smem:[#allocation31_spill]] %s3026_s22  ;;  %p301_p8 = scmp.eq.s32.totalorder %s1907_s18, 1 }
  0x1d   : > { %s3582_s23 = scalar_select %p3028_p5, 1, 0 }
  0x1e   : > { %s3583_s24 = scalar_select %p3034_p6, 1, 0 }
  0x1f   : > { %p1908_p9 = scmp.ge.s32.totalorder %s2913_s16, 1  ;;  %p308_p10 = scmp.lt.s32.totalorder %s2913_s16, 3 }
  0x20   : > { %3584 = sst [smem:[#allocation32_spill]] %s3583_s24  ;;  %p3041_p11 = por %p295_p7, %p51_p0 }
  0x21   : > { %p3045_p12 = por %p301_p8, %p57_p3  ;;  %p3049_p13 = pnand %p1908_p9, %p308_p10 }
  0x22   : > { %s3585_s25 = scalar_select %p3041_p11, 1, 0 }
  0x23   : > { %s3587_s26 = scalar_select %p3045_p12, 1, 0 }
  0x24   : > { %3586 = sst [smem:[#allocation33_spill]] %s3585_s25  ;;  %p2369_p1 = pneg %p3049_p13 }
  0x25   : > { %3588 = sst [smem:[#allocation34_spill]] %s3587_s26  ;;  %s2915_s28 = smov [#allocation13]  }
  0x26   : > { %s3589_s27 = scalar_select %p3049_p13, 1, 0 }
  0x27   : > { %s320_s29 = sshll.u32 %s2915_s28, 4  ;;  %p3057_p2 = pnand %p2369_p1, %p3552_p4  ;;  %s321_s29 = int_to_ptr.vmem [resolvable:$true] %s320_s29 }
  0x28   : > { %s2916_s11 = smov [#allocation14]   ;;  %s3591_s6 = sld [smem:[#allocation37_spill]] }
  0x29   : > { %s3590_s30 = scalar_select %p3057_p2, 1, 0 }
  0x2a   : > { %s334_s12 = sshll.u32 %s2916_s11, 4  ;;  %p3071_p8 = pneg %p3057_p2  ;;  %s335_s12 = int_to_ptr.vmem [resolvable:$true] %s334_s12 }
  0x2c   : > { %s3592_s28 = scalar_select %p3071_p8, 1, 0 }
  0x2e   : > { %s2531_s21 = scalar_lea.hbm %s3591_s6, 9216 }
  0x2f   : > { %p2532_p7 = scmp.ne.s32.totalorder %s3591_s6, %s2531_s21  ;;  %p2538_p1 = scmp.lt.u32.totalorder %s2531_s21, %s3591_s6 }
  0x31   : > { %p2534_p9 = pnand %p3071_p8, %p2532_p7 }
  0x33   : > { %p2535_p10 = pneg %p2534_p9 }
  0x35   : > { %p2540_p0 = pnand %p2538_p1, %p2535_p10 }
  0x37   : > { %2543 = shalt.err (!%p2540_p0)
}
  0x38   : > { %s2544_s11 = scalar_lea.vmem %s321_s29, 9216  ;;  %p2552_p11 = scmp.lt.s32.totalorder %s321_s29, %s321_s29 }
  0x39   : > { %p2545_p4 = scmp.ne.s32.totalorder %s321_s29, %s2544_s11  ;;  %p2553_p6 = scmp.lt.s32.totalorder %s2544_s11, %s2544_s11 }
  0x3b   : > { %p2547_p3 = pnand %p2545_p4, %p3071_p8  ;;  %p2554_p13 = por %p2553_p6, %p2552_p11 }
  0x3d   : > { %p2548_p12 = pneg %p2547_p3 }
  0x3f   : > { %p2555_p5 = pnand %p2554_p13, %p2548_p12 }
  0x41   : > { %2558 = shalt.err (!%p2555_p5)
}
  0x42   : > { %s2917_s19 = smov 64   ;;  %s2918_s22 = smov 4  }
  0x43   : > { %2372 = dma.hbm_to_vmem [thread:$0]  (!%p3057_p2), %s3591_s6, 9216, %s321_s29, [#allocation12], %s2917_s19, %s2917_s19, %s2918_s22  }
  0x44   : > { %s3088_s18 = sand.u32 1, %s2909_s15   ;;  %s3593_s7 = sld [smem:[#allocation38_spill]] }
  0x4a   : > { %s2559_s11 = scalar_lea.hbm %s3593_s7, 16 }
  0x4b   : > { %p2560_p4 = scmp.ne.s32.totalorder %s3593_s7, %s2559_s11  ;;  %p2566_p11 = scmp.lt.u32.totalorder %s2559_s11, %s3593_s7 }
  0x4d   : > { %p2562_p5 = pnand %p2560_p4, %p3071_p8 }
  0x4f   : > { %p2563_p6 = pneg %p2562_p5 }
  0x51   : > { %p2568_p12 = pnand %p2566_p11, %p2563_p6 }
  0x53   : > { %2571 = shalt.err (!%p2568_p12)
}
  0x54   : > { %s2572_s29 = scalar_lea.vmem %s335_s12, 16  ;;  %s2579_s19 = scalar_lea.vmem %s335_s12, 32 }
  0x55   : > { %p2573_p13 = scmp.ne.s32.totalorder %s335_s12, %s2572_s29  ;;  %p2580_p7 = scmp.lt.s32.totalorder %s335_s12, %s335_s12 }
  0x56   : > { %p2581_p9 = scmp.lt.s32.totalorder %s2579_s19, %s2572_s29 }
  0x57   : > { %p2575_p0 = pnand %p2573_p13, %p3071_p8 }
  0x58   : > { %p2582_p10 = por %p2581_p9, %p2580_p7 }
  0x59   : > { %p2576_p3 = pneg %p2575_p0 }
  0x5b   : > { %p2583_p1 = pnand %p2582_p10, %p2576_p3 }
  0x5d   : > { %2586 = shalt.err (!%p2583_p1)
}
  0x5e   : > { %2375 = dma.hbm_to_vmem [thread:$0]  (!%p3057_p2), %s3593_s7, 16, %s335_s12, [#allocation15]  }
  0x5f   : > { %s3109_s17 = sshll.u32 %s2913_s16, 4  ;;  %p3594_p4 = scmp.ne.s32.totalorder %s3582_s23, 0 }
  0x60   : > { %p3595_p5 = scmp.lt.s32.totalorder %s2913_s16, 2  ;;  %s3120_s22 = sand.u32 1, %s2913_s16  }
  0x61   : > { %s3597_s1 = sld [smem:[#allocation35_spill]]  ;;  %s389_s23 = scalar_lea.vmem [#allocation5], %s3088_s18 }
  0x62   : > { %p3115_p6 = pnand %p3595_p5, %p3594_p4  ;;  %s396_s12 = sshll.u32 %s389_s23, 4  ;;  %s3129_s12 = int_to_ptr.vmem [resolvable:$true] %s396_s12 }
  0x63   : > { %s3567_s21 = scalar_lea.sflag [#allocation6], %s3120_s22 }
  0x64   : > { %s3596_s24 = scalar_select %p3115_p6, 1, 0 }
  0x65   : > { %p3136_p12 = pneg %p3115_p6 }
  0x67   : > { %s3126_s20 = scalar_lea.hbm %s3597_s1, %s3109_s17  ;;  %s2592_s25 = scalar_lea.hbm %s3597_s1, 32 }
  0x68   : > { %s2587_s11 = scalar_lea.hbm %s3126_s20, 16  ;;  %p2593_p3 = scmp.lt.u32.totalorder %s3126_s20, %s3597_s1 }
  0x69   : > { %p2588_p11 = scmp.ne.s32.totalorder %s3126_s20, %s2587_s11  ;;  %p2594_p7 = scmp.lt.u32.totalorder %s2592_s25, %s2587_s11 }
  0x6a   : > { %s3598_s29 = scalar_select %p3136_p12, 1, 0 }
  0x6b   : > { %p2590_p13 = pnand %p3136_p12, %p2588_p11  ;;  %p2595_p9 = por %p2594_p7, %p2593_p3 }
  0x6c   : > { %p2596_p10 = scmp.lt.u32.totalorder %s2587_s11, %s3126_s20 }
  0x6d   : > { %p2591_p0 = pneg %p2590_p13 }
  0x6e   : > { %p2597_p1 = por %p2596_p10, %p2595_p9 }
  0x70   : > { %p2598_p4 = pnand %p2597_p1, %p2591_p0 }
  0x72   : > { %2601 = shalt.err (!%p2598_p4)
}
  0x73   : > { %s2602_s23 = scalar_lea.vmem %s3129_s12, 16  ;;  %s2919_s19 = smov [#allocation5]  }
  0x74   : > { %p2603_p5 = scmp.ne.s32.totalorder %s3129_s12, %s2602_s23  ;;  %s2607_s10 = sshll.u32 %s2919_s19, 4  ;;  %s2608_s10 = int_to_ptr.vmem [resolvable:$false] %s2607_s10 }
  0x75   : > { %s2609_s13 = scalar_lea.vmem %s2608_s10, 32  ;;  %p2610_p2 = scmp.lt.s32.totalorder %s3129_s12, %s2608_s10 }
  0x76   : > { %p2605_p11 = pnand %p2603_p5, %p3136_p12  ;;  %p2611_p8 = scmp.lt.s32.totalorder %s2609_s13, %s2602_s23 }
  0x78   : > { %p2606_p13 = pneg %p2605_p11  ;;  %p2612_p3 = por %p2611_p8, %p2610_p2 }
  0x7a   : > { %p2613_p7 = pnand %p2612_p3, %p2606_p13 }
  0x7c   : > { %2616 = shalt.err (!%p2613_p7)
}
  0x7d   : > { %2388 = dma.hbm_to_vmem [thread:$0]  (!%p3115_p6), %s3126_s20, 16, %s3129_s12, %s3567_s21  }
  0x7e   : > { %s3599_s3 = sld [smem:[#allocation36_spill]]  ;;  %s423_s23 = scalar_lea.vmem [#allocation8], %s3088_s18 }
  0x7f   : > { %s430_s19 = sshll.u32 %s423_s23, 4  ;;  %s2920_s10 = smov [#allocation16]   ;;  %s3168_s19 = int_to_ptr.vmem [resolvable:$true] %s430_s19 }
  0x80   : > { %s3170_s13 = sshll.u32 %s2920_s10, 4  ;;  %s3570_s1 = scalar_lea.sflag [#allocation9], %s3120_s22  ;;  %s345_s13 = int_to_ptr.vmem [resolvable:$true] %s3170_s13 }
  0x84   : > { %s3165_s26 = scalar_lea.hbm %s3599_s3, %s3109_s17  ;;  %s2622_s11 = scalar_lea.hbm %s3599_s3, 32 }
  0x85   : > { %s2617_s6 = scalar_lea.hbm %s3165_s26, 16  ;;  %p2623_p9 = scmp.lt.u32.totalorder %s3165_s26, %s3599_s3 }
  0x86   : > { %p2618_p2 = scmp.ne.s32.totalorder %s3165_s26, %s2617_s6  ;;  %p2624_p10 = scmp.lt.u32.totalorder %s2622_s11, %s2617_s6 }
  0x87   : > { %p2626_p4 = scmp.lt.u32.totalorder %s2617_s6, %s3165_s26 }
  0x88   : > { %p2620_p8 = pnand %p2618_p2, %p3136_p12  ;;  %p2625_p1 = por %p2624_p10, %p2623_p9 }
  0x8a   : > { %p2621_p0 = pneg %p2620_p8  ;;  %p2627_p5 = por %p2626_p4, %p2625_p1 }
  0x8c   : > { %p2628_p11 = pnand %p2627_p5, %p2621_p0 }
  0x8e   : > { %2631 = shalt.err (!%p2628_p11)
}
  0x8f   : > { %s2632_s23 = scalar_lea.vmem %s3168_s19, 16  ;;  %s2921_s10 = smov [#allocation8]  }
  0x90   : > { %p2633_p13 = scmp.ne.s32.totalorder %s3168_s19, %s2632_s23  ;;  %s2637_s20 = sshll.u32 %s2921_s10, 4  ;;  %s2638_s20 = int_to_ptr.vmem [resolvable:$false] %s2637_s20 }
  0x91   : > { %s2639_s21 = scalar_lea.vmem %s2638_s20, 32  ;;  %p2640_p2 = scmp.lt.s32.totalorder %s3168_s19, %s2638_s20 }
  0x92   : > { %p2635_p3 = pnand %p2633_p13, %p3136_p12  ;;  %p2641_p8 = scmp.lt.s32.totalorder %s2639_s21, %s2632_s23 }
  0x94   : > { %p2636_p7 = pneg %p2635_p3  ;;  %p2642_p9 = por %p2641_p8, %p2640_p2 }
  0x96   : > { %p2643_p10 = pnand %p2642_p9, %p2636_p7 }
  0x98   : > { %2646 = shalt.err (!%p2643_p10)
}
  0x99   : > { %2394 = dma.hbm_to_vmem [thread:$0]  (!%p3115_p6), %s3165_s26, 16, %s3168_s19, %s3570_s1  }
  0x9a   : > { %s2647_s11 = scalar_lea.hbm %s3545_s8, 2048  ;;  %p3600_p1 = scmp.ne.s32.totalorder %s3592_s28, 0 }
  0x9b   : > { %p2648_p0 = scmp.ne.s32.totalorder %s3545_s8, %s2647_s11  ;;  %p2654_p11 = scmp.lt.u32.totalorder %s2647_s11, %s3545_s8 }
  0x9d   : > { %p2650_p4 = pnand %p2648_p0, %p3600_p1 }
  0x9f   : > { %p2651_p5 = pneg %p2650_p4 }
  0xa1   : > { %p2656_p13 = pnand %p2654_p11, %p2651_p5 }
  0xa3   : > { %2659 = shalt.err (!%p2656_p13)
}
  0xa4   : > { %s2660_s21 = scalar_lea.vmem %s345_s13, 2048  ;;  %p2668_p8 = scmp.lt.s32.totalorder %s345_s13, %s345_s13 }
  0xa5   : > { %p2661_p3 = scmp.ne.s32.totalorder %s345_s13, %s2660_s21  ;;  %p2669_p9 = scmp.lt.s32.totalorder %s2660_s21, %s2660_s21 }
  0xa7   : > { %p2663_p7 = pnand %p2661_p3, %p3600_p1  ;;  %p2670_p10 = por %p2669_p9, %p2668_p8 }
  0xa9   : > { %p2664_p2 = pneg %p2663_p7 }
  0xab   : > { %p2671_p6 = pnand %p2670_p10, %p2664_p2 }
  0xad   : > { %2674 = shalt.err (!%p2671_p6)
}
  0xae   : > { %s2922_s26 = smov 128   ;;  %s2923_s19 = smov 8  }
  0xaf   : > { %p3601_p0 = scmp.ne.s32.totalorder %s3590_s30, 0  ;;  %s2924_s11 = smov [#allocation17]  }
  0xb0   : > { %s358_s25 = sshll.u32 %s2924_s11, 4  ;;  %s2675_s20 = scalar_lea.hbm %s3546_s9, 16  ;;  %s359_s25 = int_to_ptr.vmem [resolvable:$true] %s358_s25 }
  0xb1   : > { %2378 = dma.hbm_to_vmem [thread:$0]  (!%p3601_p0), %s3545_s8, 2048, %s345_s13, [#allocation15], %s2922_s26, %s2922_s26, %s2923_s19  }
  0xb2   : > { %p2676_p6 = scmp.ne.s32.totalorder %s3546_s9, %s2675_s20  ;;  %p2682_p11 = scmp.lt.u32.totalorder %s2675_s20, %s3546_s9 }
  0xb4   : > { %p2678_p4 = pnand %p2676_p6, %p3600_p1 }
  0xb6   : > { %p2679_p5 = pneg %p2678_p4 }
  0xb8   : > { %p2684_p13 = pnand %p2682_p11, %p2679_p5 }
  0xba   : > { %2687 = shalt.err (!%p2684_p13)
}
  0xbb   : > { %s2688_s13 = scalar_lea.vmem %s359_s25, 16  ;;  %s2695_s26 = scalar_lea.vmem %s359_s25, 32 }
  0xbc   : > { %p2689_p3 = scmp.ne.s32.totalorder %s359_s25, %s2688_s13  ;;  %p2696_p8 = scmp.lt.s32.totalorder %s359_s25, %s359_s25 }
  0xbd   : > { %p2697_p9 = scmp.lt.s32.totalorder %s2695_s26, %s2688_s13 }
  0xbe   : > { %p2691_p7 = pnand %p2689_p3, %p3600_p1 }
  0xbf   : > { %p2698_p10 = por %p2697_p9, %p2696_p8 }
  0xc0   : > { %p2692_p2 = pneg %p2691_p7 }
  0xc2   : > { %p2699_p12 = pnand %p2698_p10, %p2692_p2 }
  0xc4   : > { %2702 = shalt.err (!%p2699_p12)
}
  0xc5   : > { %2381 = dma.hbm_to_vmem [thread:$0]  (!%p3601_p0), %s3546_s9, 16, %s359_s25, [#allocation18]  }
  0xc6   : > { %s3237_s28 = scalar_lea.hbm %s3537_s0, %s3109_s17  ;;  %s372_s6 = scalar_lea.vmem [#allocation2], %s3088_s18 }
  0xc7   : > { %s379_s12 = sshll.u32 %s372_s6, 4  ;;  %s370_s30 = scalar_lea.sflag [#allocation3], %s3088_s18  ;;  %s380_s12 = int_to_ptr.vmem [resolvable:$true] %s379_s12 }
  0xc8   : > { %s2703_s11 = scalar_lea.hbm %s3237_s28, 16  ;;  %p3602_p1 = scmp.ne.s32.totalorder %s3598_s29, 0 }
  0xc9   : > { %p2704_p12 = scmp.ne.s32.totalorder %s3237_s28, %s2703_s11  ;;  %s2708_s23 = scalar_lea.hbm %s3537_s0, 32 }
  0xca   : > { %p2709_p0 = scmp.lt.u32.totalorder %s3237_s28, %s3537_s0  ;;  %p2710_p5 = scmp.lt.u32.totalorder %s2708_s23, %s2703_s11 }
  0xcb   : > { %p2706_p6 = pnand %p2704_p12, %p3602_p1  ;;  %p2712_p13 = scmp.lt.u32.totalorder %s2703_s11, %s3237_s28 }
  0xcc   : > { %p2711_p11 = por %p2710_p5, %p2709_p0 }
  0xcd   : > { %p2707_p4 = pneg %p2706_p6 }
  0xce   : > { %p2713_p3 = por %p2712_p13, %p2711_p11 }
  0xd0   : > { %p2714_p7 = pnand %p2713_p3, %p2707_p4 }
  0xd2   : > { %2717 = shalt.err (!%p2714_p7)
}
  0xd3   : > { %s2718_s13 = scalar_lea.vmem %s380_s12, 16  ;;  %s2925_s26 = smov [#allocation2]  }
  0xd4   : > { %p2719_p2 = scmp.ne.s32.totalorder %s380_s12, %s2718_s13  ;;  %s2723_s1 = sshll.u32 %s2925_s26, 4  ;;  %s2724_s1 = int_to_ptr.vmem [resolvable:$false] %s2723_s1 }
  0xd5   : > { %s2725_s19 = scalar_lea.vmem %s2724_s1, 32  ;;  %p2726_p10 = scmp.lt.s32.totalorder %s380_s12, %s2724_s1 }
  0xd6   : > { %p2721_p8 = pnand %p2719_p2, %p3602_p1  ;;  %p2727_p12 = scmp.lt.s32.totalorder %s2725_s19, %s2718_s13 }
  0xd8   : > { %p2722_p9 = pneg %p2721_p8  ;;  %p2728_p6 = por %p2727_p12, %p2726_p10 }
  0xda   : > { %p2729_p0 = pnand %p2728_p6, %p2722_p9 }
  0xdc   : > { %2732 = shalt.err (!%p2729_p0)
}
  0xdd   : > { %p3603_p5 = scmp.ne.s32.totalorder %s3596_s24, 0  ;;  %s3262_s6 = scalar_lea.hbm %s3539_s2, %s3109_s17 }
  0xde   : > { %s406_s11 = scalar_lea.vmem [#allocation7], %s3088_s18  ;;  %s2733_s25 = scalar_lea.hbm %s3262_s6, 16 }
  0xdf   : > { %2385 = dma.hbm_to_vmem [thread:$0]  (!%p3603_p5), %s3237_s28, 16, %s380_s12, %s370_s30  }
  0xe0   : > { %s413_s10 = sshll.u32 %s406_s11, 4  ;;  %p2734_p4 = scmp.ne.s32.totalorder %s3262_s6, %s2733_s25  ;;  %s414_s10 = int_to_ptr.vmem [resolvable:$true] %s413_s10 }
  0xe1   : > { %s2738_s28 = scalar_lea.hbm %s3539_s2, 32  ;;  %p2739_p3 = scmp.lt.u32.totalorder %s3262_s6, %s3539_s2 }
  0xe2   : > { %p2736_p11 = pnand %p2734_p4, %p3602_p1  ;;  %p2740_p7 = scmp.lt.u32.totalorder %s2738_s28, %s2733_s25 }
  0xe3   : > { %p2742_p8 = scmp.lt.u32.totalorder %s2733_s25, %s3262_s6 }
  0xe4   : > { %p2737_p13 = pneg %p2736_p11  ;;  %p2741_p2 = por %p2740_p7, %p2739_p3 }
  0xe6   : > { %p2743_p9 = por %p2742_p8, %p2741_p2 }
  0xe8   : > { %p2744_p10 = pnand %p2743_p9, %p2737_p13 }
  0xea   : > { %2747 = shalt.err (!%p2744_p10)
}
  0xeb   : > { %s2748_s21 = scalar_lea.vmem %s414_s10, 16  ;;  %s2926_s13 = smov [#allocation7]  }
  0xec   : > { %p2749_p12 = scmp.ne.s32.totalorder %s414_s10, %s2748_s21  ;;  %s2753_s26 = sshll.u32 %s2926_s13, 4  ;;  %s2754_s26 = int_to_ptr.vmem [resolvable:$false] %s2753_s26 }
  0xed   : > { %s2755_s1 = scalar_lea.vmem %s2754_s26, 32  ;;  %p2756_p4 = scmp.lt.s32.totalorder %s414_s10, %s2754_s26 }
  0xee   : > { %p2751_p6 = pnand %p2749_p12, %p3602_p1  ;;  %p2757_p11 = scmp.lt.s32.totalorder %s2755_s1, %s2748_s21 }
  0xf0   : > { %p2752_p0 = pneg %p2751_p6  ;;  %p2758_p5 = por %p2757_p11, %p2756_p4 }
  0xf2   : > { %p2759_p3 = pnand %p2758_p5, %p2752_p0 }
  0xf4   : > { %2762 = shalt.err (!%p2759_p3)
}
  0xf5   : > { %p3604_p7 = scmp.ne.s32.totalorder %s3596_s24, 0  ;;  %s3605_s19 = scalar_lea.sflag [#allocation6], %s3120_s22 }
  0xf6   : > { %s3288_s11 = scalar_lea.hbm %s3541_s4, %s3109_s17  ;;  %s440_s25 = scalar_lea.vmem [#allocation10], %s3088_s18 }
  0xf7   : > { %2391 = dma.hbm_to_vmem [thread:$0]  (!%p3604_p7), %s3262_s6, 16, %s414_s10, %s3605_s19  }
  0xf8   : > { %s447_s23 = sshll.u32 %s440_s25, 4  ;;  %s2763_s20 = scalar_lea.hbm %s3288_s11, 16  ;;  %s448_s23 = int_to_ptr.vmem [resolvable:$true] %s447_s23 }
  0xf9   : > { %p2764_p5 = scmp.ne.s32.totalorder %s3288_s11, %s2763_s20  ;;  %s2768_s6 = scalar_lea.hbm %s3541_s4, 32 }
  0xfa   : > { %p2769_p8 = scmp.lt.u32.totalorder %s3288_s11, %s3541_s4  ;;  %p2770_p9 = scmp.lt.u32.totalorder %s2768_s6, %s2763_s20 }
  0xfb   : > { %p2766_p13 = pnand %p2764_p5, %p3602_p1  ;;  %p2772_p12 = scmp.lt.u32.totalorder %s2763_s20, %s3288_s11 }
  0xfc   : > { %p2771_p10 = por %p2770_p9, %p2769_p8 }
  0xfd   : > { %p2767_p2 = pneg %p2766_p13 }
  0xfe   : > { %p2773_p6 = por %p2772_p12, %p2771_p10 }
 0x100   : > { %p2774_p0 = pnand %p2773_p6, %p2767_p2 }
 0x102   : > { %2777 = shalt.err (!%p2774_p0)
}
 0x103   : > { %s2778_s21 = scalar_lea.vmem %s448_s23, 16  ;;  %s2927_s13 = smov [#allocation10]  }
 0x104   : > { %p2779_p4 = scmp.ne.s32.totalorder %s448_s23, %s2778_s21  ;;  %s2783_s26 = sshll.u32 %s2927_s13, 4  ;;  %s2784_s26 = int_to_ptr.vmem [resolvable:$false] %s2783_s26 }
 0x105   : > { %s2785_s1 = scalar_lea.vmem %s2784_s26, 32  ;;  %p2786_p5 = scmp.lt.s32.totalorder %s448_s23, %s2784_s26 }
 0x106   : > { %p2781_p11 = pnand %p2779_p4, %p3602_p1  ;;  %p2787_p13 = scmp.lt.s32.totalorder %s2785_s1, %s2778_s21 }
 0x108   : > { %p2782_p3 = pneg %p2781_p11  ;;  %p2788_p7 = por %p2787_p13, %p2786_p5 }
 0x10a   : > { %p2789_p8 = pnand %p2788_p7, %p2782_p3 }
 0x10c   : > { %2792 = shalt.err (!%p2789_p8)
}
 0x10d   : > { %p3606_p9 = scmp.ne.s32.totalorder %s3596_s24, 0  ;;  %s3607_s19 = scalar_lea.sflag [#allocation9], %s3120_s22 }
 0x10e   : > { %s3314_s25 = scalar_lea.hbm %s3542_s5, %s3109_s17  ;;  %s457_s20 = scalar_lea.vmem [#allocation11], %s3088_s18 }
 0x10f   : > { %2397 = dma.hbm_to_vmem [thread:$0]  (!%p3606_p9), %s3288_s11, 16, %s448_s23, %s3607_s19  }
 0x110   : > { %s464_s28 = sshll.u32 %s457_s20, 4  ;;  %s455_s12 = scalar_lea.sflag [#allocation12], %s3120_s22  ;;  %s465_s28 = int_to_ptr.vmem [resolvable:$true] %s464_s28 }
 0x111   : > { %s2793_s6 = scalar_lea.hbm %s3314_s25, 16  ;;  %s2798_s23 = scalar_lea.hbm %s3542_s5, 32 }
 0x112   : > { %p2794_p7 = scmp.ne.s32.totalorder %s3314_s25, %s2793_s6  ;;  %p2799_p12 = scmp.lt.u32.totalorder %s3314_s25, %s3542_s5 }
 0x113   : > { %p2800_p6 = scmp.lt.u32.totalorder %s2798_s23, %s2793_s6  ;;  %p2802_p4 = scmp.lt.u32.totalorder %s2793_s6, %s3314_s25 }
 0x114   : > { %p2796_p2 = pnand %p2794_p7, %p3602_p1 }
 0x115   : > { %p2801_p0 = por %p2800_p6, %p2799_p12 }
 0x116   : > { %p2797_p10 = pneg %p2796_p2 }
 0x117   : > { %p2803_p11 = por %p2802_p4, %p2801_p0 }
 0x119   : > { %p2804_p3 = pnand %p2803_p11, %p2797_p10 }
 0x11b   : > { %2807 = shalt.err (!%p2804_p3)
}
 0x11c   : > { %s2808_s18 = scalar_lea.vmem %s465_s28, 16  ;;  %s2928_s22 = smov [#allocation11]  }
 0x11d   : > { %p2809_p5 = scmp.ne.s32.totalorder %s465_s28, %s2808_s18  ;;  %s2813_s21 = sshll.u32 %s2928_s22, 4  ;;  %s2814_s21 = int_to_ptr.vmem [resolvable:$false] %s2813_s21 }
 0x11e   : > { %s2815_s13 = scalar_lea.vmem %s2814_s21, 32  ;;  %p2816_p7 = scmp.lt.s32.totalorder %s465_s28, %s2814_s21 }
 0x11f   : > { %p2811_p13 = pnand %p2809_p5, %p3602_p1  ;;  %p2817_p2 = scmp.lt.s32.totalorder %s2815_s13, %s2808_s18 }
 0x121   : > { %p2812_p8 = pneg %p2811_p13  ;;  %p2818_p9 = por %p2817_p2, %p2816_p7 }
 0x123   : > { %p2819_p6 = pnand %p2818_p9, %p2812_p8 }
 0x125   : > { %2822 = shalt.err (!%p2819_p6)
}
 0x126   : > { %p3608_p12 = scmp.ne.s32.totalorder %s3596_s24, 0  ;;  %p3609_p10 = scmp.ne.s32.totalorder %s3589_s27, 0 }
 0x127   : > { %s3610_s29 = sld [smem:[#allocation32_spill]] (!%p3609_p10)  ;;  %s3338_s26 = sand.u32 (!%p3609_p10), 1, %s2905_s14  }
 0x128   : > { %2400 = dma.hbm_to_vmem [thread:$0]  (!%p3608_p12), %s3314_s25, 16, %s465_s28, %s455_s12  }
 0x129   : > { %473 = sbr.rel (%p3609_p10) target bundleno = 939 (0x3ab), region = 60  ;;  %s476_s1 = scalar_lea.sflag (!%p3609_p10), [#allocation3], %s3338_s26 }
 0x12a   : > { %s478_s19 = scalar_lea.vmem (!%p3609_p10), [#allocation2], %s3338_s26 }
 0x12d   : > { %p3611_p1 = scmp.ne.s32.totalorder (!%p3609_p10), %s3610_s29, 0 }
 0x130   : > { %2868 = dma.done.wait (%p3611_p1), %s476_s1, 16  }
 0x131   : > { %2870 = vsyncadd (%p3611_p1), %s476_s1, 4294967280  ;;  %s3612_s3 = sld [smem:[#allocation29_spill]]  ;;  %s486_s27 = scalar_lea.vmem [#allocation5], %s3338_s26 }
 0x137   : > { %s483_s24 = sand.u32 1, %s3612_s3  }
 0x138   : > { %s484_s7 = scalar_lea.sflag [#allocation6], %s483_s24 }
 0x139   : > { %2872 = dma.done.wait (%p3611_p1), %s484_s7, 32  }
 0x13a   : > { %2874 = vsyncadd (%p3611_p1), %s484_s7, 4294967264  ;;  %s494_s25 = scalar_lea.vmem [#allocation7], %s3338_s26  ;;  %s500_s20 = scalar_lea.sflag [#allocation9], %s483_s24 }
 0x13b   : > { %s502_s28 = scalar_lea.vmem [#allocation8], %s3338_s26 }
 0x13c   : > { %2876 = dma.done.wait (%p3611_p1), %s500_s20, 32  }
 0x13d   : > { %2878 = vsyncadd (%p3611_p1), %s500_s20, 4294967264  ;;  %s510_s12 = scalar_lea.vmem [#allocation10], %s3338_s26  ;;  %s516_s6 = scalar_lea.sflag [#allocation12], %s483_s24 }
 0x13e   : > { %s518_s10 = scalar_lea.vmem [#allocation11], %s3338_s26 }
 0x13f   : > { %2880 = dma.done.wait (%p3611_p1), %s516_s6, 16  }
 0x140   : > { %2882 = vsyncadd (%p3611_p1), %s516_s6, 4294967280  ;;  %p3613_p9 = scmp.eq.s32.totalorder %s3612_s3, 0 }
 0x142   : > { %2884 = dma.done.wait (%p3613_p9), [#allocation12], 9216   ;;  %p3614_p0 = pmov %p3613_p9 }
 0x144   : > { %2886 = vsyncadd (%p3614_p0), [#allocation12], 4294958080  ;;  %p3615_p4 = pmov %p3614_p0 }
 0x145   : > { %p3616_p11 = pmov %p3614_p0 }
 0x146   : > { %2888 = dma.done.wait (%p3615_p4), [#allocation15], 2064  }
 0x147   : > { %2890 = vsyncadd (%p3616_p11), [#allocation15], 4294965232  ;;  %p3617_p3 = pmov %p3614_p0 }
 0x148   : > { %p3618_p5 = pmov %p3614_p0 }
 0x149   : > { %2892 = dma.done.wait (%p3617_p3), [#allocation18], 16  }
 0x14a   : > { %2894 = vsyncadd (%p3618_p5), [#allocation18], 4294967280  ;;  %v2929_v0 = vmov 0.0   ;;  %vm2930_vm0 = vmmov 0   ;;  %v2459_v1 = vld [vmem:[#allocation13 + $0x40] sm:$0xff]   ;;  %v2461_v3 = vld [vmem:[#allocation13 + $0x48] sm:$0xff]   ;;  %v1250_v63 = vlaneseq }
 0x14b   : > { %2100 = vmatprep.subr.bf16.mxu0 %v2929_v0  ;;  %2120 = vmatprep.subr.bf16.mxu1 %v2929_v0  ;;  %v2460_v2 = vld [vmem:[#allocation13] sm:$0xff]   ;;  %v2462_v4 = vld [vmem:[#allocation13 + $0x8] sm:$0xff]   ;;  %v2463_v5 = vld [vmem:[#allocation13 + $0x50] sm:$0xff]   ;;  %v2931_v61 = vmov 1966171168   ;;  %s3619_s11 = sld [smem:[#allocation33_spill]] }
 0x14c   : > { %2116 = vmatprep.mubr.msk.bf16.mxu0 %vm2930_vm0, %v2929_v0  ;;  %2136 = vmatprep.mubr.msk.bf16.mxu1 %vm2930_vm0, %v2929_v0  ;;  %v2464_v6 = vld [vmem:[#allocation13 + $0x10] sm:$0xff]   ;;  %v2465_v7 = vld [vmem:[#allocation13 + $0x58] sm:$0xff]   ;;  %v2467_v9 = vld [vmem:[#allocation13 + $0x60] sm:$0xff]   ;;  %v1248_v62 = vunpack.c.l.s4 %v2931_v61  ;;  %s1999_s23 = sshll.u32 %s3612_s3, 4  ;;  %s588_s30 = scalar_lea.vmem [#allocation19], %s3338_s26 }
 0x14d   : > { %2101 = vmatpush3.bf16.msra.mxu0 %v2459_v1  ;;  %2121 = vmatpush3.bf16.msra.mxu1 %v2460_v2  ;;  %v2466_v8 = vld [vmem:[#allocation13 + $0x18] sm:$0xff]   ;;  %v2468_v10 = vld [vmem:[#allocation13 + $0x20] sm:$0xff]   ;;  %v2469_v11 = vld [vmem:[#allocation13 + $0x68] sm:$0xff]   ;;  %s1712_s17 = sshll.u32 %s588_s30, 4  ;;  %s3620_s21 = sld [smem:[#allocation39_spill]]  ;;  %s3495_s17 = int_to_ptr.vmem [resolvable:$true] %s1712_s17 }
 0x14e   : > { %2102 = vmatprep.subr.bf16.mxu0 %v2929_v0  ;;  %2122 = vmatprep.subr.bf16.mxu1 %v2929_v0  ;;  %v2470_v12 = vld [vmem:[#allocation13 + $0x28] sm:$0xff]   ;;  %v2471_v13 = vld [vmem:[#allocation13 + $0x70] sm:$0xff]   ;;  %v2473_v15 = vld [vmem:[#allocation13 + $0x78] sm:$0xff]   ;;  %s1700_s29 = scalar_lea.sflag [#allocation4], %s3338_s26  ;;  %s2823_s1 = scalar_lea.vmem %s3495_s17, 16 }
 0x14f   : > { %v2472_v14 = vld [vmem:[#allocation13 + $0x30] sm:$0xff]   ;;  %v2474_v16 = vld [vmem:[#allocation13 + $0x38] sm:$0xff]   ;;  %v2475_v19 = vld [vmem:[#allocation13 + $0x80] sm:$0xff]   ;;  %p2824_p13 = scmp.ne.s32.totalorder %s3495_s17, %s2823_s1 }
 0x150   : > { %v607_v17 = vld [vmem:[%s486_s27] sm:$0x1]  ;;  %v2476_v20 = vld [vmem:[#allocation13 + $0xc0] sm:$0xff]   ;;  %v2477_v21 = vld [vmem:[#allocation13 + $0x88] sm:$0xff]  }
 0x151   : > { %2103 = vmatpush3.bf16.msra.mxu0 %v2461_v3  ;;  %2123 = vmatpush3.bf16.msra.mxu1 %v2462_v4  ;;  %v3400_v18 = vld [vmem:[%s478_s19] sm:$0x1]  ;;  %v2478_v22 = vld [vmem:[#allocation13 + $0xc8] sm:$0xff]   ;;  %v2481_v25 = vld [vmem:[#allocation13 + $0x98] sm:$0xff]   ;;  %v1249_v3 = vunpack.c.0.s8 %v1248_v62  ;;  %v1251_v4 = vshrl.u32 %v1250_v63, 7  ;;  %p3621_p8 = scmp.ne.s32.totalorder %s3619_s11, 0 }
 0x152   : > { %2104 = vmatprep.subr.bf16.mxu0 %v2929_v0  ;;  %2124 = vmatprep.subr.bf16.mxu1 %v2929_v0  ;;  %v2479_v23 = vld [vmem:[#allocation13 + $0x90] sm:$0xff]   ;;  %v2482_v26 = vld [vmem:[#allocation13 + $0xd8] sm:$0xff]   ;;  %v2483_v27 = vld [vmem:[#allocation13 + $0xa0] sm:$0xff]   ;;  %s2933_s19 = smov [#allocation19]  }
 0x153   : > { %v2480_v24 = vld [vmem:[#allocation13 + $0xd0] sm:$0xff]   ;;  %v2484_v28 = vld [vmem:[#allocation13 + $0xe0] sm:$0xff]   ;;  %v2485_v29 = vld [vmem:[#allocation13 + $0xa8] sm:$0xff]   ;;  %s3493_s13 = scalar_lea.hbm %s3620_s21, %s1999_s23  ;;  %p2825_p7 = pnand %p2824_p13, %p3621_p8 }
 0x154   : > { %v2486_v30 = vld [vmem:[#allocation13 + $0xe8] sm:$0xff]   ;;  %v2487_v31 = vld [vmem:[#allocation13 + $0xb0] sm:$0xff]   ;;  %v2489_v33 = vld [vmem:[#allocation13 + $0xb8] sm:$0xff]   ;;  %s2827_s3 = sshll.u32 %s2933_s19, 4  ;;  %s2828_s3 = int_to_ptr.vmem [resolvable:$false] %s2827_s3 }
 0x155   : > { %2105 = vmatpush3.bf16.msra.mxu0 %v2463_v5  ;;  %2125 = vmatpush3.bf16.msra.mxu1 %v2464_v6  ;;  %v2488_v32 = vld [vmem:[#allocation13 + $0xf0] sm:$0xff]   ;;  %v2490_v34 = vld [vmem:[#allocation13 + $0xf8] sm:$0xff]   ;;  %v2491_v36 = vld [vmem:[#allocation13 + $0x100] sm:$0xff]   ;;  %p2826_p2 = pneg %p2825_p7  ;;  %s2829_s24 = scalar_lea.vmem %s2828_s3, 32 }
 0x156   : > { %2106 = vmatprep.subr.bf16.mxu0 %v2929_v0  ;;  %2126 = vmatprep.subr.bf16.mxu1 %v2929_v0  ;;  %v801_v35 = vld [vmem:[%s494_s25] sm:$0x1]  ;;  %v2492_v38 = vld [vmem:[#allocation13 + $0x140] sm:$0xff]   ;;  %v2493_v39 = vld [vmem:[#allocation13 + $0x108] sm:$0xff]   ;;  %p2830_p6 = scmp.lt.s32.totalorder %s3495_s17, %s2828_s3  ;;  %p2831_p12 = scmp.lt.s32.totalorder %s2829_s24, %s2823_s1 }
 0x157   : > { %v908_v37 = vld [vmem:[%s502_s28] sm:$0x1]  ;;  %v2494_v40 = vld [vmem:[#allocation13 + $0x148] sm:$0xff]   ;;  %v2497_v43 = vld [vmem:[#allocation13 + $0x118] sm:$0xff]  }
 0x158   : > { %v2495_v41 = vld [vmem:[#allocation13 + $0x110] sm:$0xff]   ;;  %v2498_v44 = vld [vmem:[#allocation13 + $0x158] sm:$0xff]   ;;  %v2499_v45 = vld [vmem:[#allocation13 + $0x120] sm:$0xff]   ;;  %p2832_p10 = por %p2831_p12, %p2830_p6 }
 0x159   : > { %2107 = vmatpush3.bf16.msra.mxu0 %v2465_v7  ;;  %2127 = vmatpush3.bf16.msra.mxu1 %v2466_v8  ;;  %v2496_v42 = vld [vmem:[#allocation13 + $0x150] sm:$0xff]   ;;  %v2500_v46 = vld [vmem:[#allocation13 + $0x160] sm:$0xff]   ;;  %v2501_v47 = vld [vmem:[#allocation13 + $0x128] sm:$0xff]   ;;  %v1252_v7 = vsub.s32 %v1249_v3, %v1251_v4 }
 0x15a   : > { %2108 = vmatprep.subr.bf16.mxu0 %v2929_v0  ;;  %2128 = vmatprep.subr.bf16.mxu1 %v2929_v0  ;;  %v2502_v48 = vld [vmem:[#allocation13 + $0x168] sm:$0xff]   ;;  %v2503_v49 = vld [vmem:[#allocation13 + $0x130] sm:$0xff]   ;;  %v2505_v51 = vld [vmem:[#allocation13 + $0x138] sm:$0xff]   ;;  %p2833_p1 = pnand %p2832_p10, %p2826_p2 }
 0x15b   : > { %v2504_v50 = vld [vmem:[#allocation13 + $0x170] sm:$0xff]   ;;  %v2506_v52 = vld [vmem:[#allocation13 + $0x178] sm:$0xff]   ;;  %v2507_v54 = vld [vmem:[#allocation13 + $0x180] sm:$0xff]  }
 0x15c   : > { %v1015_v53 = vld [vmem:[%s510_s12] sm:$0x1]  ;;  %v2508_v56 = vld [vmem:[#allocation13 + $0x1c0] sm:$0xff]   ;;  %v2509_v57 = vld [vmem:[#allocation13 + $0x188] sm:$0xff]  }
 0x15d   : > { %2109 = vmatpush3.bf16.msra.mxu0 %v2467_v9  ;;  %2129 = vmatpush3.bf16.msra.mxu1 %v2468_v10  ;;  %v1122_v55 = vld [vmem:[%s518_s10] sm:$0x1]  ;;  %v2510_v58 = vld [vmem:[#allocation13 + $0x1c8] sm:$0xff]   ;;  %v2513_v1 = vld [vmem:[#allocation13 + $0x198] sm:$0xff]   ;;  %v1253_v10 = vrot.slane %v3400_v18, %v1252_v7 }
 0x15e   : > { %2110 = vmatprep.subr.bf16.mxu0 %v2929_v0  ;;  %2130 = vmatprep.subr.bf16.mxu1 %v2929_v0  ;;  %v2511_v59 = vld [vmem:[#allocation13 + $0x190] sm:$0xff]   ;;  %v2514_v2 = vld [vmem:[#allocation13 + $0x1d8] sm:$0xff]   ;;  %v2515_v5 = vld [vmem:[#allocation13 + $0x1a0] sm:$0xff]  }
 0x15f   : > { %v2512_v60 = vld [vmem:[#allocation13 + $0x1d0] sm:$0xff]   ;;  %v2516_v6 = vld [vmem:[#allocation13 + $0x1e0] sm:$0xff]   ;;  %v2517_v8 = vld [vmem:[#allocation13 + $0x1a8] sm:$0xff]  }
 0x160   : > { %v2518_v9 = vld [vmem:[#allocation13 + $0x1e8] sm:$0xff]  }
 0x161   : > { %2111 = vmatpush3.bf16.msra.mxu0 %v2469_v11  ;;  %2131 = vmatpush3.bf16.msra.mxu1 %v2470_v12  ;;  %v2519_v11 = vld [vmem:[#allocation13 + $0x1b0] sm:$0xff]  }
 0x162   : > { %2112 = vmatprep.subr.bf16.mxu0 %v2929_v0  ;;  %2132 = vmatprep.subr.bf16.mxu1 %v2929_v0  ;;  %v2520_v12 = vld [vmem:[#allocation13 + $0x1f0] sm:$0xff]  }
 0x165   : > { %2113 = vmatpush3.bf16.msra.mxu0 %v2471_v13  ;;  %2133 = vmatpush3.bf16.msra.mxu1 %v2472_v14  ;;  %v1981_v13 = vld.sshfl [vmem:[%s486_s27] sm:$0x1 pattern:$0x75316420]  ;;  %v1260_v14 = vrot.slane %v1253_v10, %v1252_v7 }
 0x166   : > { %2114 = vmatprep.subr.bf16.mxu0 %v2929_v0  ;;  %2134 = vmatprep.subr.bf16.mxu1 %v2929_v0 }
 0x169   : > { %2115 = vmatpush3.bf16.msra.mxu0 %v2473_v15  ;;  %2135 = vmatpush3.bf16.msra.mxu1 %v2474_v16  ;;  %v2521_v15 = vld [vmem:[#allocation13 + $0x1b8] sm:$0xff]   ;;  %v1386_v16 = vrot.slane %v1981_v13, %v1252_v7 }
 0x16a   : > { %2140 = vmatprep.subr.bf16.mxu0 %v2929_v0  ;;  %2160 = vmatprep.subr.bf16.mxu1 %v2929_v0 }
 0x16c   : > { %2117 = vmatmul.mubr.bf16.vlgmr.msra.gmra.mrb[0].mxu0 %v607_v17  ;;  %2137 = vmatmul.mubr.bf16.vlgmr.msra.gmra.mrb[0].mxu1 %v3400_v18  ;;  %v2522_v17 = vld [vmem:[#allocation13 + $0x1f8] sm:$0xff]   ;;  %v1262_v18 = vshrl.u32 %v1260_v14, 16 }
 0x16d   : > { %2141 = vmatpush3.bf16.msra.mxu0 %v2475_v19  ;;  %2161 = vmatpush3.bf16.msra.mxu1 %v2476_v20  ;;  %v2523_v19 = vld [vmem:[#allocation13 + $0x200] sm:$0xff]   ;;  %v1388_v20 = vshrl.u32 %v1386_v16, 16 }
 0x16e   : > { %2142 = vmatprep.subr.bf16.mxu0 %v2929_v0  ;;  %2162 = vmatprep.subr.bf16.mxu1 %v2929_v0 }
 0x16f   : > { %2156 = vmatprep.mubr.msk.bf16.mxu0 %vm2930_vm0, %v2929_v0  ;;  %2176 = vmatprep.mubr.msk.bf16.mxu1 %vm2930_vm0, %v2929_v0 }
 0x171   : > { %2143 = vmatpush3.bf16.msra.mxu0 %v2477_v21  ;;  %2163 = vmatpush3.bf16.msra.mxu1 %v2478_v22  ;;  %v2524_v21 = vld [vmem:[#allocation13 + $0x208] sm:$0xff]   ;;  %v2525_v22 = vld [vmem:[#allocation13 + $0x210] sm:$0xff]  }
 0x172   : > { %2144 = vmatprep.subr.bf16.mxu0 %v2929_v0  ;;  %2164 = vmatprep.subr.bf16.mxu1 %v2929_v0 }
 0x175   : > { %2145 = vmatpush3.bf16.msra.mxu0 %v2479_v23  ;;  %2165 = vmatpush3.bf16.msra.mxu1 %v2480_v24  ;;  %v2526_v23 = vld [vmem:[#allocation13 + $0x218] sm:$0xff]   ;;  %v2527_v24 = vld [vmem:[#allocation13 + $0x220] sm:$0xff]  }
 0x176   : > { %2146 = vmatprep.subr.bf16.mxu0 %v2929_v0  ;;  %2166 = vmatprep.subr.bf16.mxu1 %v2929_v0 }
 0x179   : > { %2147 = vmatpush3.bf16.msra.mxu0 %v2481_v25  ;;  %2167 = vmatpush3.bf16.msra.mxu1 %v2482_v26  ;;  %v2528_v25 = vld [vmem:[#allocation13 + $0x228] sm:$0xff]   ;;  %v2529_v26 = vld [vmem:[#allocation13 + $0x230] sm:$0xff]  }
 0x17a   : > { %2148 = vmatprep.subr.bf16.mxu0 %v2929_v0  ;;  %2168 = vmatprep.subr.bf16.mxu1 %v2929_v0 }
 0x17d   : > { %2149 = vmatpush3.bf16.msra.mxu0 %v2483_v27  ;;  %2169 = vmatpush3.bf16.msra.mxu1 %v2484_v28  ;;  %v1990_v27 = vld.sshfl [vmem:[%s494_s25] sm:$0x1 pattern:$0x75316420] }
 0x17e   : > { %2150 = vmatprep.subr.bf16.mxu0 %v2929_v0  ;;  %2170 = vmatprep.subr.bf16.mxu1 %v2929_v0  ;;  %v1512_v28 = vrot.slane %v1990_v27, %v1252_v7 }
 0x181   : > { %2151 = vmatpush3.bf16.msra.mxu0 %v2485_v29  ;;  %2171 = vmatpush3.bf16.msra.mxu1 %v2486_v30  ;;  %v2530_v29 = vld [vmem:[#allocation13 + $0x238] sm:$0xff]   ;;  %v1514_v30 = vshrl.u32 %v1512_v28, 16 }
 0x182   : > { %2152 = vmatprep.subr.bf16.mxu0 %v2929_v0  ;;  %2172 = vmatprep.subr.bf16.mxu1 %v2929_v0 }
 0x185   : > { %2153 = vmatpush3.bf16.msra.mxu0 %v2487_v31  ;;  %2173 = vmatpush3.bf16.msra.mxu1 %v2488_v32  ;;  %v1611_v31 = vld [vmem:[#allocation16] sm:$0xff]  ;;  %v1612_v32 = vld [vmem:[#allocation16 + $0x8] sm:$0xff] }
 0x186   : > { %2154 = vmatprep.subr.bf16.mxu0 %v2929_v0  ;;  %2174 = vmatprep.subr.bf16.mxu1 %v2929_v0 }
 0x189   : > { %2155 = vmatpush3.bf16.msra.mxu0 %v2489_v33  ;;  %2175 = vmatpush3.bf16.msra.mxu1 %v2490_v34  ;;  %v1613_v33 = vld [vmem:[#allocation16 + $0x10] sm:$0xff]  ;;  %v2932_v34 = vmov 0.0|0.0  }
 0x18a   : > { %2180 = vmatprep.subr.bf16.mxu0 %v2929_v0  ;;  %2200 = vmatprep.subr.bf16.mxu1 %v2929_v0 }
 0x18c   : > { %2157 = vmatmul.mubr.bf16.vlgmr.msra.gmra.mrb[4].mxu0 %v801_v35  ;;  %2177 = vmatmul.mubr.bf16.vlgmr.msra.gmra.mrb[4].mxu1 %v908_v37  ;;  %v2316_v35 = vpack.c.bf16 %v1612_v32, %v1611_v31  ;;  %v1606_v32 = vld [vmem:[#allocation14] sm:$0x1] }
 0x18d   : > { %2181 = vmatpush3.bf16.msra.mxu0 %v2491_v36  ;;  %2201 = vmatpush3.bf16.msra.mxu1 %v2492_v38  ;;  %v1614_v36 = vld [vmem:[#allocation16 + $0x18] sm:$0xff]  ;;  %v1615_v38 = vld [vmem:[#allocation16 + $0x20] sm:$0xff] }
 0x18e   : > { %2182 = vmatprep.subr.bf16.mxu0 %v2929_v0  ;;  %2202 = vmatprep.subr.bf16.mxu1 %v2929_v0  ;;  %v2319_v37 = vpack.c.bf16 %v1614_v36, %v1613_v33 }
 0x18f   : > { %2196 = vmatprep.mubr.msk.bf16.mxu0 %vm2930_vm0, %v2929_v0  ;;  %2216 = vmatprep.mubr.msk.bf16.mxu1 %vm2930_vm0, %v2929_v0 }
 0x191   : > { %2183 = vmatpush3.bf16.msra.mxu0 %v2493_v39  ;;  %2203 = vmatpush3.bf16.msra.mxu1 %v2494_v40  ;;  %v1616_v39 = vld [vmem:[#allocation16 + $0x28] sm:$0xff] }
 0x192   : > { %2184 = vmatprep.subr.bf16.mxu0 %v2929_v0  ;;  %2204 = vmatprep.subr.bf16.mxu1 %v2929_v0  ;;  %v2322_v40 = vpack.c.bf16 %v1616_v39, %v1615_v38 }
 0x195   : > { %2185 = vmatpush3.bf16.msra.mxu0 %v2495_v41  ;;  %2205 = vmatpush3.bf16.msra.mxu1 %v2496_v42  ;;  %v1617_v41 = vld [vmem:[#allocation16 + $0x30] sm:$0xff] }
 0x196   : > { %2186 = vmatprep.subr.bf16.mxu0 %v2929_v0  ;;  %2206 = vmatprep.subr.bf16.mxu1 %v2929_v0 }
 0x199   : > { %2187 = vmatpush3.bf16.msra.mxu0 %v2497_v43  ;;  %2207 = vmatpush3.bf16.msra.mxu1 %v2498_v44  ;;  %v1619_v43 = vld [vmem:[#allocation16 + $0x40] sm:$0xff]  ;;  %v1620_v44 = vld [vmem:[#allocation16 + $0x48] sm:$0xff] }
 0x19a   : > { %2188 = vmatprep.subr.bf16.mxu0 %v2929_v0  ;;  %2208 = vmatprep.subr.bf16.mxu1 %v2929_v0 }
 0x19d   : > { %2189 = vmatpush3.bf16.msra.mxu0 %v2499_v45  ;;  %2209 = vmatpush3.bf16.msra.mxu1 %v2500_v46  ;;  %v2328_v45 = vpack.c.bf16 %v1620_v44, %v1619_v43  ;;  %v1621_v46 = vld [vmem:[#allocation16 + $0x50] sm:$0xff] }
 0x19e   : > { %2190 = vmatprep.subr.bf16.mxu0 %v2929_v0  ;;  %2210 = vmatprep.subr.bf16.mxu1 %v2929_v0 }
 0x1a1   : > { %2191 = vmatpush3.bf16.msra.mxu0 %v2501_v47  ;;  %2211 = vmatpush3.bf16.msra.mxu1 %v2502_v48  ;;  %v1622_v47 = vld [vmem:[#allocation16 + $0x58] sm:$0xff] }
 0x1a2   : > { %2192 = vmatprep.subr.bf16.mxu0 %v2929_v0  ;;  %2212 = vmatprep.subr.bf16.mxu1 %v2929_v0  ;;  %v2331_v48 = vpack.c.bf16 %v1622_v47, %v1621_v46 }
 0x1a5   : > { %2193 = vmatpush3.bf16.msra.mxu0 %v2503_v49  ;;  %2213 = vmatpush3.bf16.msra.mxu1 %v2504_v50  ;;  %v1623_v49 = vld [vmem:[#allocation16 + $0x60] sm:$0xff]  ;;  %v1624_v50 = vld [vmem:[#allocation16 + $0x68] sm:$0xff] }
 0x1a6   : > { %2194 = vmatprep.subr.bf16.mxu0 %v2929_v0  ;;  %2214 = vmatprep.subr.bf16.mxu1 %v2929_v0 }
 0x1a9   : > { %2195 = vmatpush3.bf16.msra.mxu0 %v2505_v51  ;;  %2215 = vmatpush3.bf16.msra.mxu1 %v2506_v52  ;;  %v2334_v51 = vpack.c.bf16 %v1624_v50, %v1623_v49 }
 0x1aa   : > { %2220 = vmatprep.subr.bf16.mxu0 %v2929_v0  ;;  %2240 = vmatprep.subr.bf16.mxu1 %v2929_v0 }
 0x1ac   : > { %2197 = vmatmul.mubr.bf16.vlgmr.msra.gmra.mrb[8].mxu0 %v1015_v53  ;;  %2217 = vmatmul.mubr.bf16.vlgmr.msra.gmra.mrb[8].mxu1 %v1122_v55 }
 0x1ad   : > { %2221 = vmatpush3.bf16.msra.mxu0 %v2507_v54  ;;  %2241 = vmatpush3.bf16.msra.mxu1 %v2508_v56 }
 0x1ae   : > { %2222 = vmatprep.subr.bf16.mxu0 %v2929_v0  ;;  %2242 = vmatprep.subr.bf16.mxu1 %v2929_v0 }
 0x1af   : > { %2236 = vmatprep.mubr.msk.bf16.mxu0 %vm2930_vm0, %v2929_v0  ;;  %2256 = vmatprep.mubr.msk.bf16.mxu1 %vm2930_vm0, %v2929_v0 }
 0x1b1   : > { %2223 = vmatpush3.bf16.msra.mxu0 %v2509_v57  ;;  %2243 = vmatpush3.bf16.msra.mxu1 %v2510_v58  ;;  %v1625_v58 = vld [vmem:[#allocation16 + $0x70] sm:$0xff] }
 0x1b2   : > { %2224 = vmatprep.subr.bf16.mxu0 %v2929_v0  ;;  %2244 = vmatprep.subr.bf16.mxu1 %v2929_v0 }
 0x1b5   : > { %2225 = vmatpush3.bf16.msra.mxu0 %v2511_v59  ;;  %2245 = vmatpush3.bf16.msra.mxu1 %v2512_v60  ;;  %v1626_v59 = vld [vmem:[#allocation16 + $0x78] sm:$0xff] }
 0x1b6   : > { %2226 = vmatprep.subr.bf16.mxu0 %v2929_v0  ;;  %2246 = vmatprep.subr.bf16.mxu1 %v2929_v0  ;;  %v2337_v62 = vpack.c.bf16 %v1626_v59, %v1625_v58 }
 0x1b9   : > { %2227 = vmatpush3.bf16.msra.mxu0 %v2513_v1  ;;  %2247 = vmatpush3.bf16.msra.mxu1 %v2514_v2 }
 0x1ba   : > { %2228 = vmatprep.subr.bf16.mxu0 %v2929_v0  ;;  %2248 = vmatprep.subr.bf16.mxu1 %v2929_v0 }
 0x1bd   : > { %2229 = vmatpush3.bf16.msra.mxu0 %v2515_v5  ;;  %2249 = vmatpush3.bf16.msra.mxu1 %v2516_v6 }
 0x1be   : > { %2230 = vmatprep.subr.bf16.mxu0 %v2929_v0  ;;  %2250 = vmatprep.subr.bf16.mxu1 %v2929_v0 }
 0x1c1   : > { %2231 = vmatpush3.bf16.msra.mxu0 %v2517_v8  ;;  %2251 = vmatpush3.bf16.msra.mxu1 %v2518_v9 }
 0x1c2   : > { %2232 = vmatprep.subr.bf16.mxu0 %v2929_v0  ;;  %2252 = vmatprep.subr.bf16.mxu1 %v2929_v0 }
 0x1c5   : > { %2233 = vmatpush3.bf16.msra.mxu0 %v2519_v11  ;;  %2253 = vmatpush3.bf16.msra.mxu1 %v2520_v12 }
 0x1c6   : > { %2234 = vmatprep.subr.bf16.mxu0 %v2929_v0  ;;  %2254 = vmatprep.subr.bf16.mxu1 %v2929_v0 }
 0x1c9   : > { %2235 = vmatpush3.bf16.msra.mxu0 %v2521_v15  ;;  %2255 = vmatpush3.bf16.msra.mxu1 %v2522_v17 }
 0x1ca   : > { %2260 = vmatprep.subr.bf16.mxu0 %v2929_v0  ;;  %2315 = vmatprep.subr.bf16.mxu1 %v2932_v34 }
 0x1cc   : > { %2237 = vmatmul.mubr.bf16.vlgmr.msra.gmra.mrb[12].mxu0 %v1262_v18  ;;  %2257 = vmatmul.mubr.bf16.vlgmr.msra.gmra.mrb[12].mxu1 %v1388_v20 }
 0x1cd   : > { %2261 = vmatpush3.bf16.msra.mxu0 %v2523_v19  ;;  %2276 = vmatprep.mubr.msk.bf16.mxu0 %vm2930_vm0, %v2929_v0 }
 0x1ce   : > { %2262 = vmatprep.subr.bf16.mxu0 %v2929_v0  ;;  %2312 = vmatprep.mubr.msk.f32.mxu1 %vm2930_vm0, %v2929_v0 }
 0x1cf   : > { %2317 = vmatpush3.bf16.msra.mxu1 %v2316_v35 }
 0x1d0   : > { %2318 = vmatprep.subr.bf16.mxu1 %v2932_v34 }
 0x1d1   : > { %2263 = vmatpush3.bf16.msra.mxu0 %v2524_v21 }
 0x1d2   : > { %2264 = vmatprep.subr.bf16.mxu0 %v2929_v0 }
 0x1d3   : > { %2320 = vmatpush3.bf16.msra.mxu1 %v2319_v37 }
 0x1d4   : > { %2321 = vmatprep.subr.bf16.mxu1 %v2932_v34 }
 0x1d5   : > { %2265 = vmatpush3.bf16.msra.mxu0 %v2525_v22 }
 0x1d6   : > { %2266 = vmatprep.subr.bf16.mxu0 %v2929_v0 }
 0x1d7   : > { %2323 = vmatpush3.bf16.msra.mxu1 %v2322_v40  ;;  %v1627_v40 = vld [vmem:[#allocation17] sm:$0x1] }
 0x1d8   : > { %2324 = vmatprep.subr.bf16.mxu1 %v2932_v34 }
 0x1d9   : > { %2267 = vmatpush3.bf16.msra.mxu0 %v2526_v23 }
 0x1da   : > { %2268 = vmatprep.subr.bf16.mxu0 %v2929_v0 }
 0x1dd   : > { %2269 = vmatpush3.bf16.msra.mxu0 %v2527_v24 }
 0x1de   : > { %2270 = vmatprep.subr.bf16.mxu0 %v2929_v0 }
 0x1e1   : > { %2271 = vmatpush3.bf16.msra.mxu0 %v2528_v25 }
 0x1e2   : > { %2272 = vmatprep.subr.bf16.mxu0 %v2929_v0 }
 0x1e5   : > { %2273 = vmatpush3.bf16.msra.mxu0 %v2529_v26 }
 0x1e6   : > { %2274 = vmatprep.subr.bf16.mxu0 %v2929_v0  ;;  %v1618_v0 = vld [vmem:[#allocation16 + $0x38] sm:$0xff] }
 0x1e7   : > { %v2325_v42 = vpack.c.bf16 %v1618_v0, %v1617_v41 }
 0x1e9   : > { %2275 = vmatpush3.bf16.msra.mxu0 %v2530_v29  ;;  %2326 = vmatpush3.bf16.msra.mxu1 %v2325_v42 }
 0x1ea   : > { %2327 = vmatprep.subr.bf16.mxu1 %v2932_v34 }
 0x1ec   : > { %2277 = vmatmul.mubr.bf16.vlgmr.msra.gmra.mrb[16].mxu0 %v1514_v30 }
 0x1ed   : > { %2329 = vmatpush3.bf16.msra.mxu1 %v2328_v45 }
 0x1ee   : > { %2330 = vmatprep.subr.bf16.mxu1 %v2932_v34 }
 0x1f1   : > { %2332 = vmatpush3.bf16.msra.mxu1 %v2331_v48 }
 0x1f2   : > { %2333 = vmatprep.subr.bf16.mxu1 %v2932_v34 }
 0x1f5   : > { %2335 = vmatpush3.bf16.msra.mxu1 %v2334_v51 }
 0x1f6   : > { %2336 = vmatprep.subr.bf16.mxu1 %v2932_v34 }
 0x1f9   : > { %2338 = vmatpush3.bf16.msra.mxu1 %v2337_v62 }
 0x23f   : > { %v707_v52 = vpop.f32.mrb[0].mxu0  ;;  %v795_v54 = vpop.f32.mrb[0].mxu1 }
 0x240   : > { %v2118_v53 = vpop.f32.mrb[1].mxu0  ;;  %v796_v55 = vadd.f32 %v795_v54, %v707_v52  ;;  %v2138_v57 = vpop.f32.mrb[1].mxu1 }
 0x241   : > { %v710_v56 = vpop.f32.mrb[2].mxu0  ;;  %v798_v61 = vpop.f32.mrb[2].mxu1 }
 0x242   : > { %v2119_v60 = vpop.f32.mrb[3].mxu0  ;;  %v2139_v63 = vpop.f32.mrb[3].mxu1 }
 0x25f   : > { %v901_v1 = vpop.f32.mrb[4].mxu0  ;;  %v1008_v4 = vpop.f32.mrb[4].mxu1 }
 0x260   : > { %v907_v2 = vadd.f32 %v901_v1, %v796_v55  ;;  %v2158_v3 = vpop.f32.mrb[5].mxu0  ;;  %v2178_v6 = vpop.f32.mrb[5].mxu1 }
 0x261   : > { %v904_v5 = vpop.f32.mrb[6].mxu0  ;;  %v1011_v9 = vpop.f32.mrb[6].mxu1 }
 0x262   : > { %v1014_v7 = vadd.f32 %v1008_v4, %v907_v2  ;;  %v2159_v8 = vpop.f32.mrb[7].mxu0  ;;  %v2179_v10 = vpop.f32.mrb[7].mxu1 }
 0x27f   : > { %v1115_v11 = vpop.f32.mrb[8].mxu0  ;;  %v1222_v14 = vpop.f32.mrb[8].mxu1 }
 0x280   : > { %v1121_v12 = vadd.f32 %v1115_v11, %v1014_v7  ;;  %v2198_v13 = vpop.f32.mrb[9].mxu0  ;;  %v2218_v16 = vpop.f32.mrb[9].mxu1 }
 0x281   : > { %v1118_v15 = vpop.f32.mrb[10].mxu0  ;;  %v1225_v19 = vpop.f32.mrb[10].mxu1 }
 0x282   : > { %v1228_v17 = vadd.f32 %v1222_v14, %v1121_v12  ;;  %v2199_v18 = vpop.f32.mrb[11].mxu0  ;;  %v2219_v20 = vpop.f32.mrb[11].mxu1 }
 0x29f   : > { %v1347_v21 = vpop.f32.mrb[12].mxu0  ;;  %v1473_v24 = vpop.f32.mrb[12].mxu1 }
 0x2a0   : > { %v1353_v22 = vadd.f32 %v1347_v21, %v1228_v17  ;;  %v2238_v23 = vpop.f32.mrb[13].mxu0  ;;  %v2258_v26 = vpop.f32.mrb[13].mxu1 }
 0x2a1   : > { %v1350_v25 = vpop.f32.mrb[14].mxu0  ;;  %v1476_v29 = vpop.f32.mrb[14].mxu1 }
 0x2a2   : > { %v1479_v27 = vadd.f32 %v1473_v24, %v1353_v22  ;;  %v2239_v28 = vpop.f32.mrb[15].mxu0  ;;  %v2259_v30 = vpop.f32.mrb[15].mxu1 }
 0x2bf   : > { %v1599_v31 = vpop.f32.mrb[16].mxu0 }
 0x2c0   : > { %v1605_v33 = vadd.f32 %v1599_v31, %v1479_v27  ;;  %v2278_v34 = vpop.f32.mrb[17].mxu0 }
 0x2c1   : > { %v1602_v35 = vpop.f32.mrb[18].mxu0 }
 0x2c2   : > { %v1607_v36 = vadd.f32 %v1606_v32, %v1605_v33  ;;  %v2279_v37 = vpop.f32.mrb[19].mxu0 }
 0x2c4   : > { %v1609_v38 = vmul.f32 0.01, %v1607_v36  ;;  %vm1608_vm1 = vcmp.ge.f32.partialorder %v1607_v36, 0.0 }
 0x2c6   : > { %v1610_v39 = vsel %vm1608_vm1, %v1607_v36, %v1609_v38 }
 0x2c7   : > { %2313 = vmatmul.mubr.f32.vlgmr.msra.gmra.mrb[16].mxu1 %v1610_v39 }
 0x39a   : > { %v1694_v41 = vpop.f32.mrb[16].mxu1 }
 0x39b   : > { %v1695_v0 = vadd.f32 %v1694_v41, %v1627_v40  ;;  %v2314_v42 = vpop.f32.mrb[17].mxu1 }
 0x39d   : > { %1698 = vst [vmem:[%s588_s30] sm:$0x1] %v1695_v0 }
 0x39e   : > { %2836 = shalt.err (!%p2833_p1)
}
 0x39f   : > { %s2837_s26 = scalar_lea.hbm %s3493_s13, 16  ;;  %s2841_s25 = scalar_lea.hbm %s3620_s21, 32 }
 0x3a0   : > { %p2838_p9 = scmp.ne.s32.totalorder %s3493_s13, %s2837_s26  ;;  %p2842_p11 = scmp.lt.u32.totalorder %s3493_s13, %s3620_s21 }
 0x3a1   : > { %p2843_p3 = scmp.lt.u32.totalorder %s2841_s25, %s2837_s26  ;;  %p2845_p13 = scmp.lt.u32.totalorder %s2837_s26, %s3493_s13 }
 0x3a2   : > { %p2839_p0 = pnand %p2838_p9, %p3621_p8 }
 0x3a3   : > { %p2844_p5 = por %p2843_p3, %p2842_p11 }
 0x3a4   : > { %p2840_p4 = pneg %p2839_p0 }
 0x3a5   : > { %p2846_p7 = por %p2845_p13, %p2844_p5 }
 0x3a7   : > { %p2847_p2 = pnand %p2846_p7, %p2840_p4 }
 0x3a9   : > { %2850 = shalt.err (!%p2847_p2)
}
 0x3aa   : > { %2367 = dma.vmem_to_hbm [thread:$0]  (%p3621_p8), %s3495_s17, 16, %s3493_s13, %s1700_s29  }
 0x3ab PF: > { %s3622_s12 = sld [smem:[#allocation28_spill]]  ;;  %s3623_s6 = sld [smem:[#allocation34_spill]] }
 0x3ac   : > { %p3625_p12 = scmp.ge.s32.totalorder %s2913_s16, 2 }
 0x3b1   : > { %s1724_s10 = sand.u32 1, %s3622_s12   ;;  %p3624_p6 = scmp.ne.s32.totalorder %s3623_s6, 0 }
 0x3b2   : > { %s1725_s23 = scalar_lea.sflag [#allocation4], %s1724_s10 }
 0x3b3   : > { %p2402_p10 = pnand %p3625_p12, %p3624_p6 }
 0x3b5   : > { %2896 = dma.done.wait (!%p2402_p10), %s1725_s23, 16  }
 0x3b6   : > { %2898 = vsyncadd (!%p2402_p10), %s1725_s23, 4294967280  ;;  %s3626_s16 = sld [smem:[#allocation30_spill]]  ;;  %s3627_s30 = sld [smem:[#allocation31_spill]] }
 0x3b7   : > { %s3628_s13 = smov %s2905_s14  ;;  %s3629_s14 = smov %s2909_s15 }
 0x3bc   : > { %p34_p1 = scmp.ge.s32.totalorder %s3626_s16, 4   ;;  %s3630_s15 = smov %s3627_s30 }
 0x3be   :  { %36 = sbr.rel (!%p34_p1) target bundleno = 19 (0x13), region = 190 }
 0x3c5   :  { %1729 = vsyncpa [#allocation3], 1 }
 0x3c6   :  { %1731 = vsyncpa [#allocation3 + $0x1], 1 }
 0x3c7   :  { %1732 = vsyncpa [#allocation6], 1 }
 0x3c8   :  { %1734 = vsyncpa [#allocation6 + $0x1], 1 }
 0x3c9   :  { %1735 = vsyncpa [#allocation9], 1 }
 0x3ca   :  { %1737 = vsyncpa [#allocation9 + $0x1], 1 }
 0x3cb   :  { %1738 = vsyncpa [#allocation12], 1 }
 0x3cc   :  { %1740 = vsyncpa [#allocation12 + $0x1], 1 }
 0x3cd   :  { %1741 = vsyncpa [#allocation15], 1 }
 0x3ce   :  { %1742 = vsyncpa [#allocation18], 1 }
 0x3cf   :  { %1743 = vsyncpa [#allocation4], 1 }
 0x3d0   :  { %1745 = vsyncpa [#allocation4 + $0x1], 1 }

</bundles_post_ra>
